<compile_context>
chip_gen: v6e
topology: v6e:2x2x1
jax: 0.10.0
libtpu: 0.0.40
codegen_flags: <defaults>
</compile_context>

<pallas_src>
import functools

import jax
import jax.numpy as jnp
import numpy as np
from jax.experimental import pallas as pl
from jax.experimental.pallas import tpu as pltpu

_INV_SQRT2 = 0.7071067811865476


# ----------------------------- kernel helpers ------------------------------

def _erf(x):
    # Abramowitz & Stegun 7.1.26 (|abs err| <= 1.5e-7): exact-erf GELU
    # semantics well within the test tolerance using only exp/div/select.
    a1, a2, a3, a4, a5 = (0.254829592, -0.284496736, 1.421413741,
                          -1.453152027, 1.061405429)
    p = 0.3275911
    ax = jnp.abs(x)
    t = 1.0 / (1.0 + p * ax)
    poly = ((((a5 * t + a4) * t + a3) * t + a2) * t + a1) * t
    y = 1.0 - poly * jnp.exp(-ax * ax)
    return jnp.where(x >= 0.0, y, -y)


def _gelu(x):
    return 0.5 * x * (1.0 + _erf(x * _INV_SQRT2))


def _conv_bn_pool(p_img, w, shift, m2, w2):
    """Fused conv (one matmul) + folded-BN affine + MaxPool2d(4, 2).

    p_img: [K, 4*m2] bf16 im2col patches; quarter q = 2a+b occupies lanes
           [q*m2, (q+1)*m2) and holds conv outputs at (2*h2+a, 2*w2+b),
           flattened as h2*w2dim + w2.
    w:     [C, K] bf16  (conv weight * BN scale, OIHW-flattened)
    shift: [C, 1] f32   ((bias - running_mean) * scale + beta)
    Returns cm: [C, m2 - w2 - 1] f32 where cm[:, hp*w2 + wp] is the pooled
    output at (hp, wp) (valid for wp < w2 - 1).
    """
    y = jnp.dot(w, p_img, preferred_element_type=jnp.float32)       # [C, 4*m2]
    # Stage 1: non-overlapping 2x2 max == max over the four lane quarters.
    z = jnp.maximum(jnp.maximum(y[:, :m2], y[:, m2:2 * m2]),
                    jnp.maximum(y[:, 2 * m2:3 * m2], y[:, 3 * m2:]))
    z = z + shift            # per-channel BN shift (commutes with max)
    # Stage 2: overlapping stride-1 2x2 max over the (h2, w2) grid.
    rm = jnp.maximum(z[:, :m2 - w2], z[:, w2:])                     # rows
    return jnp.maximum(rm[:, :-1], rm[:, 1:])                       # cols


# ------------------------------ Pallas kernels ------------------------------

def conv1_block_kernel(p_ref, w_ref, s_ref, o_ref, *, m2, w2):
    """Conv1 + BN1 + MaxPool for one image; one lane-dense bf16 slab store."""
    cm = _conv_bn_pool(p_ref[0], w_ref[...], s_ref[...], m2, w2)
    o_ref[0] = cm.astype(o_ref.dtype)


def conv23_head_kernel(p_ref, w2_ref, s2_ref, w3_ref, s3_ref, sel_ref,
                       fwt_ref, fb_ref, o_ref, *, m2, w2, c3):
    """conv2+BN2+pool2 -> conv3+BN3+pool3 -> GELU -> fc1, fully in VMEM.

    p_ref:  [1, K2, 4*m2] bf16  conv2 patches (quarters along lanes)
    w2_ref: [C2, K2] bf16       conv2 weight * BN2 scale
    s2_ref: [C2, 1]  f32        folded BN2 shift
    w3_ref: [16*C3, C2] bf16    conv3 weight * BN3 scale, row = tap*C3 + o
    s3_ref: [C3, 1]  f32        folded BN3 shift
    sel_ref:[16, L, 16] f32     0/1 selection: conv3 im2col gather as matmul
    fwt_ref:[C3, OUT] f32       fc1 weight transposed, fb_ref: [1, OUT] f32
    o_ref:  [1, 1, OUT] f32
    """
    pw = _conv_bn_pool(p_ref[0], w2_ref[...], s2_ref[...], m2, w2)
    pw = pw.astype(jnp.bfloat16)                           # [C2, L] pool2 lanes
    n_tap, _, n_pos = sel_ref.shape
    acc = jnp.zeros((c3, n_pos), jnp.float32)
    for tap in range(n_tap):
        # m_tap[o, l] = sum_c (w3*scale)[o, c, tap] * pool2[c, l]
        m_tap = jnp.dot(w3_ref[tap * c3:(tap + 1) * c3, :], pw,
                        preferred_element_type=jnp.float32)        # [C3, L]
        # gather the tap's spatial offsets via a constant 0/1 matmul
        acc = acc + jnp.dot(m_tap, sel_ref[tap],
                            preferred_element_type=jnp.float32)    # [C3, 16]
    pooled = jnp.max(acc, axis=-1, keepdims=True) + s3_ref[...]    # pool3: 1x1
    g = _gelu(pooled)
    # OUT == 1 here; for wide heads a [1,C3]x[C3,OUT] dot would be preferred.
    o_ref[0] = jnp.sum(fwt_ref[...] * g, axis=0, keepdims=True) + fb_ref[...]


# ------------------------------ host-side glue ------------------------------

def _bn_scale_shift(bias, gamma, beta, mean, var, eps=1e-5):
    scale = gamma / jnp.sqrt(var + eps)
    shift = (bias - mean) * scale + beta
    return scale, shift


def _prep_patches(x, pad):
    """NCHW input -> bf16 patches (N, K, 4*h2*w2), quarters along lanes.

    Lane index = q*(h2*w2) + h2_idx*w2 + w2_idx with q = 2a+b holding the
    conv output at (2*h2_idx + a, 2*w2_idx + b); K ordered (ci, ki, kj).
    """
    n, c, h, w = x.shape
    xp = jnp.pad(x, ((0, 0), (0, 0), (pad, pad), (pad, pad)))
    hq, wq = h + 2 * pad, w + 2 * pad
    ho, wo = (hq - 4) // 2 + 1, (wq - 4) // 2 + 1
    h2, w2 = ho // 2, wo // 2
    taps = []
    for ki in range(4):
        for kj in range(4):
            taps.append(xp[:, :, ki:ki + 2 * ho - 1:2, kj:kj + 2 * wo - 1:2])
    t = jnp.stack(taps, axis=2)                      # (N, C, 16, Ho, Wo)
    t = t[:, :, :, :2 * h2, :2 * w2]                 # even region only
    t = t.reshape(n, c * 16, h2, 2, w2, 2)           # (N, K, h2, a, w2, b)
    t = jnp.transpose(t, (0, 1, 3, 5, 2, 4))         # (N, K, a, b, h2, w2)
    return (t.reshape(n, c * 16, 4 * h2 * w2).astype(jnp.bfloat16), (h2, w2))


def _conv3_selection(hp, wp, row_stride, n_lanes, pad):
    """0/1 matrices expressing conv3's im2col gather over the pool2 lanes.

    sel[tap, l, pos] = 1 iff pool2 lane l = r*row_stride + s holds the input
    element used by conv3 tap (ki, kj) at output position pos = 4*i3 + j3
    (zero padding handled by simply omitting out-of-range entries).
    """
    sel = np.zeros((16, n_lanes, 16), np.float32)
    for ki in range(4):
        for kj in range(4):
            for i3 in range(4):
                for j3 in range(4):
                    r = 2 * i3 + ki - pad
                    s = 2 * j3 + kj - pad
                    if 0 <= r < hp and 0 <= s < wp:
                        sel[ki * 4 + kj, r * row_stride + s, i3 * 4 + j3] = 1.0
    return sel


def critic_forward(x_nchw, params, padding):
    """Critic.forward: conv1 -> conv2 -> conv3 -> flatten -> GELU -> fc1."""
    x = x_nchw.astype(jnp.float32)
    n = x.shape[0]
    cparams = pltpu.CompilerParams(dimension_semantics=("parallel",))

    # ---- Kernel A: conv1 + BN1 + MaxPool2d(4,2), lane-dense bf16 slab ------
    w1, b1, g1, bt1, mn1, vr1 = params["conv1"]
    c1 = w1.shape[0]
    sc1, sh1 = _bn_scale_shift(b1, g1, bt1, mn1, vr1)
    w1f = (w1.reshape(c1, -1) * sc1[:, None]).astype(jnp.bfloat16)
    p1, (h2a, w2a) = _prep_patches(x, padding)
    k1, m2a = p1.shape[1], h2a * w2a
    assert h2a >= 2 and w2a >= 2, "input too small for MaxPool2d(4, 2)"
    l1 = m2a - w2a - 1
    slab = pl.pallas_call(
        functools.partial(conv1_block_kernel, m2=m2a, w2=w2a),
        grid=(n,),
        in_specs=[pl.BlockSpec((1, k1, 4 * m2a), lambda i: (i, 0, 0)),
                  pl.BlockSpec((c1, k1), lambda i: (0, 0)),
                  pl.BlockSpec((c1, 1), lambda i: (0, 0))],
        out_specs=pl.BlockSpec((1, c1, l1), lambda i: (i, 0, 0)),
        out_shape=jax.ShapeDtypeStruct((n, c1, l1), jnp.bfloat16),
        compiler_params=cparams,
    )(p1, w1f, sh1.reshape(c1, 1).astype(jnp.float32))

    # Tiny host relayout of the slab into NCHW for conv2's patch prep.
    hp1, wp1 = h2a - 1, w2a - 1
    a1 = jnp.pad(slab, ((0, 0), (0, 0), (0, 1)))
    a1 = a1.reshape(n, c1, hp1, w2a)[:, :, :, :wp1]       # [N, C1, 31, 31] bf16

    # ---- Kernel B: conv2+BN2+pool2+conv3+BN3+pool3+GELU+fc1 (one call) -----
    w2_, b2_, g2, bt2, mn2, vr2 = params["conv2"]
    c2 = w2_.shape[0]
    sc2, sh2 = _bn_scale_shift(b2_, g2, bt2, mn2, vr2)
    w2f = (w2_.reshape(c2, -1) * sc2[:, None]).astype(jnp.bfloat16)
    p2, (h2b, w2b) = _prep_patches(a1, padding)
    k2, m2b = p2.shape[1], h2b * w2b
    assert h2b >= 2 and w2b >= 2
    l2 = m2b - w2b - 1
    hp2, wp2 = h2b - 1, w2b - 1

    w3_, b3_, g3, bt3, mn3, vr3 = params["conv3"]
    c3 = w3_.shape[0]
    sc3, sh3 = _bn_scale_shift(b3_, g3, bt3, mn3, vr3)
    w3s = (w3_ * sc3[:, None, None, None]).reshape(c3, w3_.shape[1], 16)
    w3s = jnp.transpose(w3s, (2, 0, 1)).reshape(16 * c3, c2).astype(jnp.bfloat16)

    h3o = (hp2 + 2 * padding - 4) // 2 + 1
    w3o = (wp2 + 2 * padding - 4) // 2 + 1
    # TODO(synk): geometries whose conv3 + pool3 output is not 1x1 (other
    # linear_input_size configurations) are not handled by the fused head.
    assert h3o >= 4 and w3o >= 4
    assert (h3o - 4) // 2 + 1 == 1 and (w3o - 4) // 2 + 1 == 1

    fc_w, fc_b = params["fc1"]
    out_features = fc_w.shape[0]
    assert fc_w.shape[1] == c3
    sel = jnp.asarray(_conv3_selection(hp2, wp2, w2b, l2, padding))

    out = pl.pallas_call(
        functools.partial(conv23_head_kernel, m2=m2b, w2=w2b, c3=c3),
        grid=(n,),
        in_specs=[pl.BlockSpec((1, k2, 4 * m2b), lambda i: (i, 0, 0)),
                  pl.BlockSpec((c2, k2), lambda i: (0, 0)),
                  pl.BlockSpec((c2, 1), lambda i: (0, 0)),
                  pl.BlockSpec((16 * c3, c2), lambda i: (0, 0)),
                  pl.BlockSpec((c3, 1), lambda i: (0, 0)),
                  pl.BlockSpec((16, l2, 16), lambda i: (0, 0, 0)),
                  pl.BlockSpec((c3, out_features), lambda i: (0, 0)),
                  pl.BlockSpec((1, out_features), lambda i: (0, 0))],
        out_specs=pl.BlockSpec((1, 1, out_features), lambda i: (i, 0, 0)),
        out_shape=jax.ShapeDtypeStruct((n, 1, out_features), jnp.float32),
        compiler_params=cparams,
    )(p2, w2f, sh2.reshape(c2, 1).astype(jnp.float32),
      w3s, sh3.reshape(c3, 1).astype(jnp.float32), sel,
      jnp.transpose(fc_w).astype(jnp.float32),
      fc_b.reshape(1, -1).astype(jnp.float32))
    return out[:, 0, :]


# --------------------------- reference (pure JAX) ---------------------------

def critic_reference(x_nchw, params, padding):
    x = x_nchw.astype(jnp.float32)

    def block(x, p):
        w, b, gamma, beta, mean, var = p
        y = jax.lax.conv_general_dilated(
            x, w, window_strides=(2, 2),
            padding=[(padding, padding), (padding, padding)],
            dimension_numbers=("NCHW", "OIHW", "NCHW"))
        y = y + b[None, :, None, None]
        y = ((y - mean[None, :, None, None])
             / jnp.sqrt(var[None, :, None, None] + 1e-5)
             * gamma[None, :, None, None] + beta[None, :, None, None])
        return jax.lax.reduce_window(y, -jnp.inf, jax.lax.max,
                                     (1, 1, 4, 4), (1, 1, 2, 2), "VALID")

    for name in ("conv1", "conv2", "conv3"):
        x = block(x, params[name])
    flat = x.reshape(x.shape[0], -1)
    w, b = params["fc1"]
    return jax.nn.gelu(flat, approximate=False) @ w.T + b


# ------------------------------ params / main -------------------------------

def init_params(key, in_channels, out_channels, linear_input_size,
                out_features):
    ks = jax.random.split(key, 5)

    def conv_p(k, cin, cout, w_std):
        k1, k2 = jax.random.split(k)
        return (
            jax.random.normal(k1, (cout, cin, 4, 4), jnp.float32) * w_std,  # OIHW
            jax.random.normal(k2, (cout,), jnp.float32) * 0.05,             # bias
            jnp.full((cout,), 0.9, jnp.float32),                            # gamma
            jnp.full((cout,), 0.05, jnp.float32),                           # beta
            jnp.full((cout,), 0.1, jnp.float32),                            # running_mean
            jnp.full((cout,), 1.2, jnp.float32),                            # running_var
        )

    return {
        "conv1": conv_p(ks[0], in_channels, out_channels, 0.10),
        "conv2": conv_p(ks[1], out_channels, out_channels * 2, 0.05),
        "conv3": conv_p(ks[2], out_channels * 2, out_channels * 4, 0.04),
        "fc1": (jax.random.normal(ks[3], (out_features, linear_input_size),
                                  jnp.float32) * 0.1,
                jax.random.normal(ks[4], (out_features,), jnp.float32) * 0.1),
    }


if __name__ == "__main__":
    # Synthetic, deterministic module hyper-parameters.
    IN_CHANNELS = 3
    OUT_CHANNELS = 8
    PADDING_SIZE = 2
    OUT_FEATURES = 1            # the Critic emits one value per sample
    N, H, W = 2, 128, 128
    # Spatial trace (pad=2): 128 ->65->31 ->16->7 ->4->1; channels 3->8->16->32
    LINEAR_INPUT_SIZE = OUT_CHANNELS * 4 * 1 * 1

    root = jax.random.PRNGKey(0)
    k_x, k_p = jax.random.split(root)
    x = jax.random.normal(k_x, (N, IN_CHANNELS, H, W), jnp.float32)
    params = init_params(k_p, IN_CHANNELS, OUT_CHANNELS, LINEAR_INPUT_SIZE,
                         OUT_FEATURES)

    fwd = jax.jit(critic_forward, static_argnums=2)
    value = jax.block_until_ready(fwd(x, params, PADDING_SIZE))
    ref = jax.block_until_ready(critic_reference(x, params, PADDING_SIZE))
    # Tolerance sized for bf16 MXU operands / bf16 intermediates (f32
    # accumulation) vs. the pure f32 reference.
    np.testing.assert_allclose(np.asarray(value), np.asarray(ref),
                               rtol=2e-2, atol=2e-2)
    print("KERNEL_OK")
</pallas_src>

<mosaic_0001>
module attributes {stable_mosaic.version = 11 : i64} {
  func.func @conv1_block_kernel(%arg0: i32, %arg1: memref<1x48x4096xbf16, #tpu.memory_space<vmem>>, %arg2: memref<8x48xbf16, #tpu.memory_space<vmem>>, %arg3: memref<8x1xf32, #tpu.memory_space<vmem>>, %arg4: memref<1x8x991xbf16, #tpu.memory_space<vmem>>) attributes {dimension_semantics = [#tpu.dimension_semantics<parallel>], iteration_bounds = array<i64: 2>, scalar_prefetch = 0 : i64, scratch_operands = 0 : i64, tpu.core_type = #tpu.core_type<tc>, window_params = [{transform_indices = @transform_0, window_bounds = array<i64: 1, 48, 4096>}, {pipeline_mode = #tpu.pipeline_mode<synchronous>, transform_indices = @transform_1, window_bounds = array<i64: 8, 48>}, {pipeline_mode = #tpu.pipeline_mode<synchronous>, transform_indices = @transform_2, window_bounds = array<i64: 8, 1>}, {transform_indices = @transform_3, window_bounds = array<i64: 1, 8, 991>}]} {
    %c0 = arith.constant 0 : index
    %c0_0 = arith.constant 0 : index
    %c0_1 = arith.constant 0 : index
    %0 = vector.load %arg1[%c0, %c0_0, %c0_1] : memref<1x48x4096xbf16, #tpu.memory_space<vmem>>, vector<1x48x4096xbf16>
    %1 = vector.shape_cast %0 : vector<1x48x4096xbf16> to vector<48x4096xbf16>
    %c0_2 = arith.constant 0 : index
    %c0_3 = arith.constant 0 : index
    %2 = vector.load %arg2[%c0_2, %c0_3] : memref<8x48xbf16, #tpu.memory_space<vmem>>, vector<8x48xbf16>
    %c0_4 = arith.constant 0 : index
    %c0_5 = arith.constant 0 : index
    %3 = vector.load %arg3[%c0_4, %c0_5] : memref<8x1xf32, #tpu.memory_space<vmem>>, vector<8x1xf32>
    %cst = arith.constant dense<0.000000e+00> : vector<8x4096xf32>
    %4 = tpu.matmul %2, %1, %cst {dimension_numbers = #tpu.dot_dimension_numbers<[1], [0], [0], [1], [0, 0, 1, 1], [], []>} : vector<8x48xbf16>, vector<48x4096xbf16>, vector<8x4096xf32> -> vector<8x4096xf32>
    %5 = vector.extract_strided_slice %4 {offsets = [0, 0], sizes = [8, 1024], strides = [1, 1]} : vector<8x4096xf32> to vector<8x1024xf32>
    %6 = vector.extract_strided_slice %4 {offsets = [0, 1024], sizes = [8, 1024], strides = [1, 1]} : vector<8x4096xf32> to vector<8x1024xf32>
    %7 = arith.maximumf %5, %6 : vector<8x1024xf32>
    %8 = vector.extract_strided_slice %4 {offsets = [0, 2048], sizes = [8, 1024], strides = [1, 1]} : vector<8x4096xf32> to vector<8x1024xf32>
    %9 = vector.extract_strided_slice %4 {offsets = [0, 3072], sizes = [8, 1024], strides = [1, 1]} : vector<8x4096xf32> to vector<8x1024xf32>
    %10 = arith.maximumf %8, %9 : vector<8x1024xf32>
    %11 = arith.maximumf %7, %10 : vector<8x1024xf32>
    %12 = vector.broadcast %3 : vector<8x1xf32> to vector<8x1024xf32>
    %13 = arith.addf %11, %12 : vector<8x1024xf32>
    %14 = vector.extract_strided_slice %13 {offsets = [0, 0], sizes = [8, 992], strides = [1, 1]} : vector<8x1024xf32> to vector<8x992xf32>
    %15 = vector.extract_strided_slice %13 {offsets = [0, 32], sizes = [8, 992], strides = [1, 1]} : vector<8x1024xf32> to vector<8x992xf32>
    %16 = arith.maximumf %14, %15 : vector<8x992xf32>
    %17 = vector.extract_strided_slice %16 {offsets = [0, 0], sizes = [8, 991], strides = [1, 1]} : vector<8x992xf32> to vector<8x991xf32>
    %18 = vector.extract_strided_slice %16 {offsets = [0, 1], sizes = [8, 991], strides = [1, 1]} : vector<8x992xf32> to vector<8x991xf32>
    %19 = arith.maximumf %17, %18 : vector<8x991xf32>
    %20 = arith.truncf %19 : vector<8x991xf32> to vector<8x991xbf16>
    %c0_6 = arith.constant 0 : index
    %c0_7 = arith.constant 0 : index
    %c0_8 = arith.constant 0 : index
    %21 = vector.load %arg4[%c0_6, %c0_7, %c0_8] : memref<1x8x991xbf16, #tpu.memory_space<vmem>>, vector<1x8x991xbf16>
    %22 = vector.shape_cast %21 : vector<1x8x991xbf16> to vector<8x991xbf16>
    %23 = vector.shape_cast %20 : vector<8x991xbf16> to vector<1x8x991xbf16>
    tpu.vector_store %arg4[%c0_6, %c0_7, %c0_8], %23 {strides = array<i32>} : memref<1x8x991xbf16, #tpu.memory_space<vmem>>, vector<1x8x991xbf16>,
    return
  }
  func.func @transform_0(%arg0: i32) -> (i32, i32, i32) {
    %c0_i32 = arith.constant 0 : i32
    %c0_i32_0 = arith.constant 0 : i32
    %c0_i32_1 = arith.constant 0 : i32
    return %arg0, %c0_i32, %c0_i32_0 : i32, i32, i32
  }
  func.func @transform_1(%arg0: i32) -> (i32, i32) {
    %c0_i32 = arith.constant 0 : i32
    %c0_i32_0 = arith.constant 0 : i32
    %c0_i32_1 = arith.constant 0 : i32
    return %c0_i32, %c0_i32_0 : i32, i32
  }
  func.func @transform_2(%arg0: i32) -> (i32, i32) {
    %c0_i32 = arith.constant 0 : i32
    %c0_i32_0 = arith.constant 0 : i32
    %c0_i32_1 = arith.constant 0 : i32
    return %c0_i32, %c0_i32_0 : i32, i32
  }
  func.func @transform_3(%arg0: i32) -> (i32, i32, i32) {
    %c0_i32 = arith.constant 0 : i32
    %c0_i32_0 = arith.constant 0 : i32
    %c0_i32_1 = arith.constant 0 : i32
    return %arg0, %c0_i32, %c0_i32_0 : i32, i32, i32
  }
}

module attributes {stable_mosaic.version = 11 : i64} {
  func.func @conv23_head_kernel(%arg0: i32, %arg1: memref<1x128x256xbf16, #tpu.memory_space<vmem>>, %arg2: memref<16x128xbf16, #tpu.memory_space<vmem>>, %arg3: memref<16x1xf32, #tpu.memory_space<vmem>>, %arg4: memref<512x16xbf16, #tpu.memory_space<vmem>>, %arg5: memref<32x1xf32, #tpu.memory_space<vmem>>, %arg6: memref<16x55x16xf32, #tpu.memory_space<vmem>>, %arg7: memref<32x1xf32, #tpu.memory_space<vmem>>, %arg8: memref<1x1xf32, #tpu.memory_space<vmem>>, %arg9: memref<1x1x1xf32, #tpu.memory_space<vmem>>) attributes {dimension_semantics = [#tpu.dimension_semantics<parallel>], iteration_bounds = array<i64: 2>, scalar_prefetch = 0 : i64, scratch_operands = 0 : i64, tpu.core_type = #tpu.core_type<tc>, window_params = [{transform_indices = @transform_0, window_bounds = array<i64: 1, 128, 256>}, {pipeline_mode = #tpu.pipeline_mode<synchronous>, transform_indices = @transform_1, window_bounds = array<i64: 16, 128>}, {pipeline_mode = #tpu.pipeline_mode<synchronous>, transform_indices = @transform_2, window_bounds = array<i64: 16, 1>}, {pipeline_mode = #tpu.pipeline_mode<synchronous>, transform_indices = @transform_3, window_bounds = array<i64: 512, 16>}, {pipeline_mode = #tpu.pipeline_mode<synchronous>, transform_indices = @transform_4, window_bounds = array<i64: 32, 1>}, {pipeline_mode = #tpu.pipeline_mode<synchronous>, transform_indices = @transform_5, window_bounds = array<i64: 16, 55, 16>}, {pipeline_mode = #tpu.pipeline_mode<synchronous>, transform_indices = @transform_6, window_bounds = array<i64: 32, 1>}, {pipeline_mode = #tpu.pipeline_mode<synchronous>, transform_indices = @transform_7, window_bounds = array<i64: 1, 1>}, {transform_indices = @transform_8, window_bounds = array<i64: 1, 1, 1>}]} {
    %c0 = arith.constant 0 : index
    %c0_0 = arith.constant 0 : index
    %c0_1 = arith.constant 0 : index
    %0 = vector.load %arg1[%c0, %c0_0, %c0_1] : memref<1x128x256xbf16, #tpu.memory_space<vmem>>, vector<1x128x256xbf16>
    %1 = vector.shape_cast %0 : vector<1x128x256xbf16> to vector<128x256xbf16>
    %c0_2 = arith.constant 0 : index
    %c0_3 = arith.constant 0 : index
    %2 = vector.load %arg2[%c0_2, %c0_3] : memref<16x128xbf16, #tpu.memory_space<vmem>>, vector<16x128xbf16>
    %c0_4 = arith.constant 0 : index
    %c0_5 = arith.constant 0 : index
    %3 = vector.load %arg3[%c0_4, %c0_5] : memref<16x1xf32, #tpu.memory_space<vmem>>, vector<16x1xf32>
    %cst = arith.constant dense<0.000000e+00> : vector<16x256xf32>
    %4 = tpu.matmul %2, %1, %cst {dimension_numbers = #tpu.dot_dimension_numbers<[1], [0], [0], [1], [0, 0, 1, 1], [], []>} : vector<16x128xbf16>, vector<128x256xbf16>, vector<16x256xf32> -> vector<16x256xf32>
    %5 = vector.extract_strided_slice %4 {offsets = [0, 0], sizes = [16, 64], strides = [1, 1]} : vector<16x256xf32> to vector<16x64xf32>
    %6 = vector.extract_strided_slice %4 {offsets = [0, 64], sizes = [16, 64], strides = [1, 1]} : vector<16x256xf32> to vector<16x64xf32>
    %7 = arith.maximumf %5, %6 : vector<16x64xf32>
    %8 = vector.extract_strided_slice %4 {offsets = [0, 128], sizes = [16, 64], strides = [1, 1]} : vector<16x256xf32> to vector<16x64xf32>
    %9 = vector.extract_strided_slice %4 {offsets = [0, 192], sizes = [16, 64], strides = [1, 1]} : vector<16x256xf32> to vector<16x64xf32>
    %10 = arith.maximumf %8, %9 : vector<16x64xf32>
    %11 = arith.maximumf %7, %10 : vector<16x64xf32>
    %12 = vector.broadcast %3 : vector<16x1xf32> to vector<16x64xf32>
    %13 = arith.addf %11, %12 : vector<16x64xf32>
    %14 = vector.extract_strided_slice %13 {offsets = [0, 0], sizes = [16, 56], strides = [1, 1]} : vector<16x64xf32> to vector<16x56xf32>
    %15 = vector.extract_strided_slice %13 {offsets = [0, 8], sizes = [16, 56], strides = [1, 1]} : vector<16x64xf32> to vector<16x56xf32>
    %16 = arith.maximumf %14, %15 : vector<16x56xf32>
    %17 = vector.extract_strided_slice %16 {offsets = [0, 0], sizes = [16, 55], strides = [1, 1]} : vector<16x56xf32> to vector<16x55xf32>
    %18 = vector.extract_strided_slice %16 {offsets = [0, 1], sizes = [16, 55], strides = [1, 1]} : vector<16x56xf32> to vector<16x55xf32>
    %19 = arith.maximumf %17, %18 : vector<16x55xf32>
    %20 = arith.truncf %19 : vector<16x55xf32> to vector<16x55xbf16>
    %cst_6 = arith.constant 0.000000e+00 : f32
    %21 = vector.broadcast %cst_6 : f32 to vector<32x16xf32>
    %c0_7 = arith.constant 0 : index
    %c0_8 = arith.constant 0 : index
    %22 = vector.load %arg4[%c0_7, %c0_8] : memref<512x16xbf16, #tpu.memory_space<vmem>>, vector<32x16xbf16>
    %cst_9 = arith.constant dense<0.000000e+00> : vector<32x55xf32>
    %23 = tpu.matmul %22, %20, %cst_9 {dimension_numbers = #tpu.dot_dimension_numbers<[1], [0], [0], [1], [0, 0, 1, 1], [], []>} : vector<32x16xbf16>, vector<16x55xbf16>, vector<32x55xf32> -> vector<32x55xf32>
    %c0_10 = arith.constant 0 : index
    %c0_11 = arith.constant 0 : index
    %c0_12 = arith.constant 0 : index
    %24 = vector.load %arg6[%c0_10, %c0_11, %c0_12] : memref<16x55x16xf32, #tpu.memory_space<vmem>>, vector<1x55x16xf32>
    %25 = vector.shape_cast %24 : vector<1x55x16xf32> to vector<55x16xf32>
    %cst_13 = arith.constant dense<0.000000e+00> : vector<32x16xf32>
    %26 = tpu.matmul %23, %25, %cst_13 {dimension_numbers = #tpu.dot_dimension_numbers<[1], [0], [0], [1], [0, 0, 1, 1], [], []>} : vector<32x55xf32>, vector<55x16xf32>, vector<32x16xf32> -> vector<32x16xf32>
    %27 = arith.addf %21, %26 : vector<32x16xf32>
    %c32 = arith.constant 32 : index
    %c0_14 = arith.constant 0 : index
    %28 = vector.load %arg4[%c32, %c0_14] : memref<512x16xbf16, #tpu.memory_space<vmem>>, vector<32x16xbf16>
    %cst_15 = arith.constant dense<0.000000e+00> : vector<32x55xf32>
    %29 = tpu.matmul %28, %20, %cst_15 {dimension_numbers = #tpu.dot_dimension_numbers<[1], [0], [0], [1], [0, 0, 1, 1], [], []>} : vector<32x16xbf16>, vector<16x55xbf16>, vector<32x55xf32> -> vector<32x55xf32>
    %c1 = arith.constant 1 : index
    %c0_16 = arith.constant 0 : index
    %c0_17 = arith.constant 0 : index
    %30 = vector.load %arg6[%c1, %c0_16, %c0_17] : memref<16x55x16xf32, #tpu.memory_space<vmem>>, vector<1x55x16xf32>
    %31 = vector.shape_cast %30 : vector<1x55x16xf32> to vector<55x16xf32>
    %cst_18 = arith.constant dense<0.000000e+00> : vector<32x16xf32>
    %32 = tpu.matmul %29, %31, %cst_18 {dimension_numbers = #tpu.dot_dimension_numbers<[1], [0], [0], [1], [0, 0, 1, 1], [], []>} : vector<32x55xf32>, vector<55x16xf32>, vector<32x16xf32> -> vector<32x16xf32>
    %33 = arith.addf %27, %32 : vector<32x16xf32>
    %c64 = arith.constant 64 : index
    %c0_19 = arith.constant 0 : index
    %34 = vector.load %arg4[%c64, %c0_19] : memref<512x16xbf16, #tpu.memory_space<vmem>>, vector<32x16xbf16>
    %cst_20 = arith.constant dense<0.000000e+00> : vector<32x55xf32>
    %35 = tpu.matmul %34, %20, %cst_20 {dimension_numbers = #tpu.dot_dimension_numbers<[1], [0], [0], [1], [0, 0, 1, 1], [], []>} : vector<32x16xbf16>, vector<16x55xbf16>, vector<32x55xf32> -> vector<32x55xf32>
    %c2 = arith.constant 2 : index
    %c0_21 = arith.constant 0 : index
    %c0_22 = arith.constant 0 : index
    %36 = vector.load %arg6[%c2, %c0_21, %c0_22] : memref<16x55x16xf32, #tpu.memory_space<vmem>>, vector<1x55x16xf32>
    %37 = vector.shape_cast %36 : vector<1x55x16xf32> to vector<55x16xf32>
    %cst_23 = arith.constant dense<0.000000e+00> : vector<32x16xf32>
    %38 = tpu.matmul %35, %37, %cst_23 {dimension_numbers = #tpu.dot_dimension_numbers<[1], [0], [0], [1], [0, 0, 1, 1], [], []>} : vector<32x55xf32>, vector<55x16xf32>, vector<32x16xf32> -> vector<32x16xf32>
    %39 = arith.addf %33, %38 : vector<32x16xf32>
    %c96 = arith.constant 96 : index
    %c0_24 = arith.constant 0 : index
    %40 = vector.load %arg4[%c96, %c0_24] : memref<512x16xbf16, #tpu.memory_space<vmem>>, vector<32x16xbf16>
    %cst_25 = arith.constant dense<0.000000e+00> : vector<32x55xf32>
    %41 = tpu.matmul %40, %20, %cst_25 {dimension_numbers = #tpu.dot_dimension_numbers<[1], [0], [0], [1], [0, 0, 1, 1], [], []>} : vector<32x16xbf16>, vector<16x55xbf16>, vector<32x55xf32> -> vector<32x55xf32>
    %c3 = arith.constant 3 : index
    %c0_26 = arith.constant 0 : index
    %c0_27 = arith.constant 0 : index
    %42 = vector.load %arg6[%c3, %c0_26, %c0_27] : memref<16x55x16xf32, #tpu.memory_space<vmem>>, vector<1x55x16xf32>
    %43 = vector.shape_cast %42 : vector<1x55x16xf32> to vector<55x16xf32>
    %cst_28 = arith.constant dense<0.000000e+00> : vector<32x16xf32>
    %44 = tpu.matmul %41, %43, %cst_28 {dimension_numbers = #tpu.dot_dimension_numbers<[1], [0], [0], [1], [0, 0, 1, 1], [], []>} : vector<32x55xf32>, vector<55x16xf32>, vector<32x16xf32> -> vector<32x16xf32>
    %45 = arith.addf %39, %44 : vector<32x16xf32>
    %c128 = arith.constant 128 : index
    %c0_29 = arith.constant 0 : index
    %46 = vector.load %arg4[%c128, %c0_29] : memref<512x16xbf16, #tpu.memory_space<vmem>>, vector<32x16xbf16>
    %cst_30 = arith.constant dense<0.000000e+00> : vector<32x55xf32>
    %47 = tpu.matmul %46, %20, %cst_30 {dimension_numbers = #tpu.dot_dimension_numbers<[1], [0], [0], [1], [0, 0, 1, 1], [], []>} : vector<32x16xbf16>, vector<16x55xbf16>, vector<32x55xf32> -> vector<32x55xf32>
    %c4 = arith.constant 4 : index
    %c0_31 = arith.constant 0 : index
    %c0_32 = arith.constant 0 : index
    %48 = vector.load %arg6[%c4, %c0_31, %c0_32] : memref<16x55x16xf32, #tpu.memory_space<vmem>>, vector<1x55x16xf32>
    %49 = vector.shape_cast %48 : vector<1x55x16xf32> to vector<55x16xf32>
    %cst_33 = arith.constant dense<0.000000e+00> : vector<32x16xf32>
    %50 = tpu.matmul %47, %49, %cst_33 {dimension_numbers = #tpu.dot_dimension_numbers<[1], [0], [0], [1], [0, 0, 1, 1], [], []>} : vector<32x55xf32>, vector<55x16xf32>, vector<32x16xf32> -> vector<32x16xf32>
    %51 = arith.addf %45, %50 : vector<32x16xf32>
    %c160 = arith.constant 160 : index
    %c0_34 = arith.constant 0 : index
    %52 = vector.load %arg4[%c160, %c0_34] : memref<512x16xbf16, #tpu.memory_space<vmem>>, vector<32x16xbf16>
    %cst_35 = arith.constant dense<0.000000e+00> : vector<32x55xf32>
    %53 = tpu.matmul %52, %20, %cst_35 {dimension_numbers = #tpu.dot_dimension_numbers<[1], [0], [0], [1], [0, 0, 1, 1], [], []>} : vector<32x16xbf16>, vector<16x55xbf16>, vector<32x55xf32> -> vector<32x55xf32>
    %c5 = arith.constant 5 : index
    %c0_36 = arith.constant 0 : index
    %c0_37 = arith.constant 0 : index
    %54 = vector.load %arg6[%c5, %c0_36, %c0_37] : memref<16x55x16xf32, #tpu.memory_space<vmem>>, vector<1x55x16xf32>
    %55 = vector.shape_cast %54 : vector<1x55x16xf32> to vector<55x16xf32>
    %cst_38 = arith.constant dense<0.000000e+00> : vector<32x16xf32>
    %56 = tpu.matmul %53, %55, %cst_38 {dimension_numbers = #tpu.dot_dimension_numbers<[1], [0], [0], [1], [0, 0, 1, 1], [], []>} : vector<32x55xf32>, vector<55x16xf32>, vector<32x16xf32> -> vector<32x16xf32>
    %57 = arith.addf %51, %56 : vector<32x16xf32>
    %c192 = arith.constant 192 : index
    %c0_39 = arith.constant 0 : index
    %58 = vector.load %arg4[%c192, %c0_39] : memref<512x16xbf16, #tpu.memory_space<vmem>>, vector<32x16xbf16>
    %cst_40 = arith.constant dense<0.000000e+00> : vector<32x55xf32>
    %59 = tpu.matmul %58, %20, %cst_40 {dimension_numbers = #tpu.dot_dimension_numbers<[1], [0], [0], [1], [0, 0, 1, 1], [], []>} : vector<32x16xbf16>, vector<16x55xbf16>, vector<32x55xf32> -> vector<32x55xf32>
    %c6 = arith.constant 6 : index
    %c0_41 = arith.constant 0 : index
    %c0_42 = arith.constant 0 : index
    %60 = vector.load %arg6[%c6, %c0_41, %c0_42] : memref<16x55x16xf32, #tpu.memory_space<vmem>>, vector<1x55x16xf32>
    %61 = vector.shape_cast %60 : vector<1x55x16xf32> to vector<55x16xf32>
    %cst_43 = arith.constant dense<0.000000e+00> : vector<32x16xf32>
    %62 = tpu.matmul %59, %61, %cst_43 {dimension_numbers = #tpu.dot_dimension_numbers<[1], [0], [0], [1], [0, 0, 1, 1], [], []>} : vector<32x55xf32>, vector<55x16xf32>, vector<32x16xf32> -> vector<32x16xf32>
    %63 = arith.addf %57, %62 : vector<32x16xf32>
    %c224 = arith.constant 224 : index
    %c0_44 = arith.constant 0 : index
    %64 = vector.load %arg4[%c224, %c0_44] : memref<512x16xbf16, #tpu.memory_space<vmem>>, vector<32x16xbf16>
    %cst_45 = arith.constant dense<0.000000e+00> : vector<32x55xf32>
    %65 = tpu.matmul %64, %20, %cst_45 {dimension_numbers = #tpu.dot_dimension_numbers<[1], [0], [0], [1], [0, 0, 1, 1], [], []>} : vector<32x16xbf16>, vector<16x55xbf16>, vector<32x55xf32> -> vector<32x55xf32>
    %c7 = arith.constant 7 : index
    %c0_46 = arith.constant 0 : index
    %c0_47 = arith.constant 0 : index
    %66 = vector.load %arg6[%c7, %c0_46, %c0_47] : memref<16x55x16xf32, #tpu.memory_space<vmem>>, vector<1x55x16xf32>
    %67 = vector.shape_cast %66 : vector<1x55x16xf32> to vector<55x16xf32>
    %cst_48 = arith.constant dense<0.000000e+00> : vector<32x16xf32>
    %68 = tpu.matmul %65, %67, %cst_48 {dimension_numbers = #tpu.dot_dimension_numbers<[1], [0], [0], [1], [0, 0, 1, 1], [], []>} : vector<32x55xf32>, vector<55x16xf32>, vector<32x16xf32> -> vector<32x16xf32>
    %69 = arith.addf %63, %68 : vector<32x16xf32>
    %c256 = arith.constant 256 : index
    %c0_49 = arith.constant 0 : index
    %70 = vector.load %arg4[%c256, %c0_49] : memref<512x16xbf16, #tpu.memory_space<vmem>>, vector<32x16xbf16>
    %cst_50 = arith.constant dense<0.000000e+00> : vector<32x55xf32>
    %71 = tpu.matmul %70, %20, %cst_50 {dimension_numbers = #tpu.dot_dimension_numbers<[1], [0], [0], [1], [0, 0, 1, 1], [], []>} : vector<32x16xbf16>, vector<16x55xbf16>, vector<32x55xf32> -> vector<32x55xf32>
    %c8 = arith.constant 8 : index
    %c0_51 = arith.constant 0 : index
    %c0_52 = arith.constant 0 : index
    %72 = vector.load %arg6[%c8, %c0_51, %c0_52] : memref<16x55x16xf32, #tpu.memory_space<vmem>>, vector<1x55x16xf32>
    %73 = vector.shape_cast %72 : vector<1x55x16xf32> to vector<55x16xf32>
    %cst_53 = arith.constant dense<0.000000e+00> : vector<32x16xf32>
    %74 = tpu.matmul %71, %73, %cst_53 {dimension_numbers = #tpu.dot_dimension_numbers<[1], [0], [0], [1], [0, 0, 1, 1], [], []>} : vector<32x55xf32>, vector<55x16xf32>, vector<32x16xf32> -> vector<32x16xf32>
    %75 = arith.addf %69, %74 : vector<32x16xf32>
    %c288 = arith.constant 288 : index
    %c0_54 = arith.constant 0 : index
    %76 = vector.load %arg4[%c288, %c0_54] : memref<512x16xbf16, #tpu.memory_space<vmem>>, vector<32x16xbf16>
    %cst_55 = arith.constant dense<0.000000e+00> : vector<32x55xf32>
    %77 = tpu.matmul %76, %20, %cst_55 {dimension_numbers = #tpu.dot_dimension_numbers<[1], [0], [0], [1], [0, 0, 1, 1], [], []>} : vector<32x16xbf16>, vector<16x55xbf16>, vector<32x55xf32> -> vector<32x55xf32>
    %c9 = arith.constant 9 : index
    %c0_56 = arith.constant 0 : index
    %c0_57 = arith.constant 0 : index
    %78 = vector.load %arg6[%c9, %c0_56, %c0_57] : memref<16x55x16xf32, #tpu.memory_space<vmem>>, vector<1x55x16xf32>
    %79 = vector.shape_cast %78 : vector<1x55x16xf32> to vector<55x16xf32>
    %cst_58 = arith.constant dense<0.000000e+00> : vector<32x16xf32>
    %80 = tpu.matmul %77, %79, %cst_58 {dimension_numbers = #tpu.dot_dimension_numbers<[1], [0], [0], [1], [0, 0, 1, 1], [], []>} : vector<32x55xf32>, vector<55x16xf32>, vector<32x16xf32> -> vector<32x16xf32>
    %81 = arith.addf %75, %80 : vector<32x16xf32>
    %c320 = arith.constant 320 : index
    %c0_59 = arith.constant 0 : index
    %82 = vector.load %arg4[%c320, %c0_59] : memref<512x16xbf16, #tpu.memory_space<vmem>>, vector<32x16xbf16>
    %cst_60 = arith.constant dense<0.000000e+00> : vector<32x55xf32>
    %83 = tpu.matmul %82, %20, %cst_60 {dimension_numbers = #tpu.dot_dimension_numbers<[1], [0], [0], [1], [0, 0, 1, 1], [], []>} : vector<32x16xbf16>, vector<16x55xbf16>, vector<32x55xf32> -> vector<32x55xf32>
    %c10 = arith.constant 10 : index
    %c0_61 = arith.constant 0 : index
    %c0_62 = arith.constant 0 : index
    %84 = vector.load %arg6[%c10, %c0_61, %c0_62] : memref<16x55x16xf32, #tpu.memory_space<vmem>>, vector<1x55x16xf32>
    %85 = vector.shape_cast %84 : vector<1x55x16xf32> to vector<55x16xf32>
    %cst_63 = arith.constant dense<0.000000e+00> : vector<32x16xf32>
    %86 = tpu.matmul %83, %85, %cst_63 {dimension_numbers = #tpu.dot_dimension_numbers<[1], [0], [0], [1], [0, 0, 1, 1], [], []>} : vector<32x55xf32>, vector<55x16xf32>, vector<32x16xf32> -> vector<32x16xf32>
    %87 = arith.addf %81, %86 : vector<32x16xf32>
    %c352 = arith.constant 352 : index
    %c0_64 = arith.constant 0 : index
    %88 = vector.load %arg4[%c352, %c0_64] : memref<512x16xbf16, #tpu.memory_space<vmem>>, vector<32x16xbf16>
    %cst_65 = arith.constant dense<0.000000e+00> : vector<32x55xf32>
    %89 = tpu.matmul %88, %20, %cst_65 {dimension_numbers = #tpu.dot_dimension_numbers<[1], [0], [0], [1], [0, 0, 1, 1], [], []>} : vector<32x16xbf16>, vector<16x55xbf16>, vector<32x55xf32> -> vector<32x55xf32>
    %c11 = arith.constant 11 : index
    %c0_66 = arith.constant 0 : index
    %c0_67 = arith.constant 0 : index
    %90 = vector.load %arg6[%c11, %c0_66, %c0_67] : memref<16x55x16xf32, #tpu.memory_space<vmem>>, vector<1x55x16xf32>
    %91 = vector.shape_cast %90 : vector<1x55x16xf32> to vector<55x16xf32>
    %cst_68 = arith.constant dense<0.000000e+00> : vector<32x16xf32>
    %92 = tpu.matmul %89, %91, %cst_68 {dimension_numbers = #tpu.dot_dimension_numbers<[1], [0], [0], [1], [0, 0, 1, 1], [], []>} : vector<32x55xf32>, vector<55x16xf32>, vector<32x16xf32> -> vector<32x16xf32>
    %93 = arith.addf %87, %92 : vector<32x16xf32>
    %c384 = arith.constant 384 : index
    %c0_69 = arith.constant 0 : index
    %94 = vector.load %arg4[%c384, %c0_69] : memref<512x16xbf16, #tpu.memory_space<vmem>>, vector<32x16xbf16>
    %cst_70 = arith.constant dense<0.000000e+00> : vector<32x55xf32>
    %95 = tpu.matmul %94, %20, %cst_70 {dimension_numbers = #tpu.dot_dimension_numbers<[1], [0], [0], [1], [0, 0, 1, 1], [], []>} : vector<32x16xbf16>, vector<16x55xbf16>, vector<32x55xf32> -> vector<32x55xf32>
    %c12 = arith.constant 12 : index
    %c0_71 = arith.constant 0 : index
    %c0_72 = arith.constant 0 : index
    %96 = vector.load %arg6[%c12, %c0_71, %c0_72] : memref<16x55x16xf32, #tpu.memory_space<vmem>>, vector<1x55x16xf32>
    %97 = vector.shape_cast %96 : vector<1x55x16xf32> to vector<55x16xf32>
    %cst_73 = arith.constant dense<0.000000e+00> : vector<32x16xf32>
    %98 = tpu.matmul %95, %97, %cst_73 {dimension_numbers = #tpu.dot_dimension_numbers<[1], [0], [0], [1], [0, 0, 1, 1], [], []>} : vector<32x55xf32>, vector<55x16xf32>, vector<32x16xf32> -> vector<32x16xf32>
    %99 = arith.addf %93, %98 : vector<32x16xf32>
    %c416 = arith.constant 416 : index
    %c0_74 = arith.constant 0 : index
    %100 = vector.load %arg4[%c416, %c0_74] : memref<512x16xbf16, #tpu.memory_space<vmem>>, vector<32x16xbf16>
    %cst_75 = arith.constant dense<0.000000e+00> : vector<32x55xf32>
    %101 = tpu.matmul %100, %20, %cst_75 {dimension_numbers = #tpu.dot_dimension_numbers<[1], [0], [0], [1], [0, 0, 1, 1], [], []>} : vector<32x16xbf16>, vector<16x55xbf16>, vector<32x55xf32> -> vector<32x55xf32>
    %c13 = arith.constant 13 : index
    %c0_76 = arith.constant 0 : index
    %c0_77 = arith.constant 0 : index
    %102 = vector.load %arg6[%c13, %c0_76, %c0_77] : memref<16x55x16xf32, #tpu.memory_space<vmem>>, vector<1x55x16xf32>
    %103 = vector.shape_cast %102 : vector<1x55x16xf32> to vector<55x16xf32>
    %cst_78 = arith.constant dense<0.000000e+00> : vector<32x16xf32>
    %104 = tpu.matmul %101, %103, %cst_78 {dimension_numbers = #tpu.dot_dimension_numbers<[1], [0], [0], [1], [0, 0, 1, 1], [], []>} : vector<32x55xf32>, vector<55x16xf32>, vector<32x16xf32> -> vector<32x16xf32>
    %105 = arith.addf %99, %104 : vector<32x16xf32>
    %c448 = arith.constant 448 : index
    %c0_79 = arith.constant 0 : index
    %106 = vector.load %arg4[%c448, %c0_79] : memref<512x16xbf16, #tpu.memory_space<vmem>>, vector<32x16xbf16>
    %cst_80 = arith.constant dense<0.000000e+00> : vector<32x55xf32>
    %107 = tpu.matmul %106, %20, %cst_80 {dimension_numbers = #tpu.dot_dimension_numbers<[1], [0], [0], [1], [0, 0, 1, 1], [], []>} : vector<32x16xbf16>, vector<16x55xbf16>, vector<32x55xf32> -> vector<32x55xf32>
    %c14 = arith.constant 14 : index
    %c0_81 = arith.constant 0 : index
    %c0_82 = arith.constant 0 : index
    %108 = vector.load %arg6[%c14, %c0_81, %c0_82] : memref<16x55x16xf32, #tpu.memory_space<vmem>>, vector<1x55x16xf32>
    %109 = vector.shape_cast %108 : vector<1x55x16xf32> to vector<55x16xf32>
    %cst_83 = arith.constant dense<0.000000e+00> : vector<32x16xf32>
    %110 = tpu.matmul %107, %109, %cst_83 {dimension_numbers = #tpu.dot_dimension_numbers<[1], [0], [0], [1], [0, 0, 1, 1], [], []>} : vector<32x55xf32>, vector<55x16xf32>, vector<32x16xf32> -> vector<32x16xf32>
    %111 = arith.addf %105, %110 : vector<32x16xf32>
    %c480 = arith.constant 480 : index
    %c0_84 = arith.constant 0 : index
    %112 = vector.load %arg4[%c480, %c0_84] : memref<512x16xbf16, #tpu.memory_space<vmem>>, vector<32x16xbf16>
    %cst_85 = arith.constant dense<0.000000e+00> : vector<32x55xf32>
    %113 = tpu.matmul %112, %20, %cst_85 {dimension_numbers = #tpu.dot_dimension_numbers<[1], [0], [0], [1], [0, 0, 1, 1], [], []>} : vector<32x16xbf16>, vector<16x55xbf16>, vector<32x55xf32> -> vector<32x55xf32>
    %c15 = arith.constant 15 : index
    %c0_86 = arith.constant 0 : index
    %c0_87 = arith.constant 0 : index
    %114 = vector.load %arg6[%c15, %c0_86, %c0_87] : memref<16x55x16xf32, #tpu.memory_space<vmem>>, vector<1x55x16xf32>
    %115 = vector.shape_cast %114 : vector<1x55x16xf32> to vector<55x16xf32>
    %cst_88 = arith.constant dense<0.000000e+00> : vector<32x16xf32>
    %116 = tpu.matmul %113, %115, %cst_88 {dimension_numbers = #tpu.dot_dimension_numbers<[1], [0], [0], [1], [0, 0, 1, 1], [], []>} : vector<32x55xf32>, vector<55x16xf32>, vector<32x16xf32> -> vector<32x16xf32>
    %117 = arith.addf %111, %116 : vector<32x16xf32>
    %cst_89 = arith.constant dense<0xFF800000> : vector<32xf32>
    %118 = vector.multi_reduction <maximumf>, %117, %cst_89 [1] : vector<32x16xf32> to vector<32xf32>
    %119 = vector.shape_cast %118 : vector<32xf32> to vector<32x1xf32>
    %c0_90 = arith.constant 0 : index
    %c0_91 = arith.constant 0 : index
    %120 = vector.load %arg5[%c0_90, %c0_91] : memref<32x1xf32, #tpu.memory_space<vmem>>, vector<32x1xf32>
    %121 = arith.addf %119, %120 : vector<32x1xf32>
    %cst_92 = arith.constant 5.000000e-01 : f32
    %122 = vector.broadcast %cst_92 : f32 to vector<32x1xf32>
    %123 = arith.mulf %122, %121 : vector<32x1xf32>
    %cst_93 = arith.constant 0.707106769 : f32
    %124 = vector.broadcast %cst_93 : f32 to vector<32x1xf32>
    %125 = arith.mulf %121, %124 : vector<32x1xf32>
    %126 = math.absf %125 : vector<32x1xf32>
    %cst_94 = arith.constant 0.327591091 : f32
    %127 = vector.broadcast %cst_94 : f32 to vector<32x1xf32>
    %128 = arith.mulf %127, %126 : vector<32x1xf32>
    %cst_95 = arith.constant 1.000000e+00 : f32
    %129 = vector.broadcast %cst_95 : f32 to vector<32x1xf32>
    %130 = arith.addf %129, %128 : vector<32x1xf32>
    %cst_96 = arith.constant 1.000000e+00 : f32
    %131 = vector.broadcast %cst_96 : f32 to vector<32x1xf32>
    %132 = arith.divf %131, %130 : vector<32x1xf32>
    %cst_97 = arith.constant 1.06140542 : f32
    %133 = vector.broadcast %cst_97 : f32 to vector<32x1xf32>
    %134 = arith.mulf %133, %132 : vector<32x1xf32>
    %cst_98 = arith.constant -1.45315206 : f32
    %135 = vector.broadcast %cst_98 : f32 to vector<32x1xf32>
    %136 = arith.addf %134, %135 : vector<32x1xf32>
    %137 = arith.mulf %136, %132 : vector<32x1xf32>
    %cst_99 = arith.constant 1.42141378 : f32
    %138 = vector.broadcast %cst_99 : f32 to vector<32x1xf32>
    %139 = arith.addf %137, %138 : vector<32x1xf32>
    %140 = arith.mulf %139, %132 : vector<32x1xf32>
    %cst_100 = arith.constant -0.284496725 : f32
    %141 = vector.broadcast %cst_100 : f32 to vector<32x1xf32>
    %142 = arith.addf %140, %141 : vector<32x1xf32>
    %143 = arith.mulf %142, %132 : vector<32x1xf32>
    %cst_101 = arith.constant 0.254829586 : f32
    %144 = vector.broadcast %cst_101 : f32 to vector<32x1xf32>
    %145 = arith.addf %143, %144 : vector<32x1xf32>
    %146 = arith.mulf %145, %132 : vector<32x1xf32>
    %cst_102 = arith.constant 0.000000e+00 : f32
    %147 = vector.broadcast %cst_102 : f32 to vector<32x1xf32>
    %148 = arith.subf %147, %126 : vector<32x1xf32>
    %149 = arith.mulf %148, %126 : vector<32x1xf32>
    %150 = math.exp %149 : vector<32x1xf32>
    %151 = arith.mulf %146, %150 : vector<32x1xf32>
    %cst_103 = arith.constant 1.000000e+00 : f32
    %152 = vector.broadcast %cst_103 : f32 to vector<32x1xf32>
    %153 = arith.subf %152, %151 : vector<32x1xf32>
    %cst_104 = arith.constant 0.000000e+00 : f32
    %154 = vector.broadcast %cst_104 : f32 to vector<32x1xf32>
    %155 = arith.cmpf oge, %125, %154 : vector<32x1xf32>
    %cst_105 = arith.constant 0.000000e+00 : f32
    %156 = vector.broadcast %cst_105 : f32 to vector<32x1xf32>
    %157 = arith.subf %156, %153 : vector<32x1xf32>
    %158 = arith.select %155, %153, %157 : vector<32x1xi1>, vector<32x1xf32>
    %cst_106 = arith.constant 1.000000e+00 : f32
    %159 = vector.broadcast %cst_106 : f32 to vector<32x1xf32>
    %160 = arith.addf %159, %158 : vector<32x1xf32>
    %161 = arith.mulf %123, %160 : vector<32x1xf32>
    %c0_107 = arith.constant 0 : index
    %c0_108 = arith.constant 0 : index
    %162 = vector.load %arg7[%c0_107, %c0_108] : memref<32x1xf32, #tpu.memory_space<vmem>>, vector<32x1xf32>
    %163 = arith.mulf %162, %161 : vector<32x1xf32>
    %cst_109 = arith.constant dense<0.000000e+00> : vector<1xf32>
    %164 = vector.multi_reduction <add>, %163, %cst_109 [0] : vector<32x1xf32> to vector<1xf32>
    %165 = vector.shape_cast %164 : vector<1xf32> to vector<1x1xf32>
    %c0_110 = arith.constant 0 : index
    %c0_111 = arith.constant 0 : index
    %166 = vector.load %arg8[%c0_110, %c0_111] : memref<1x1xf32, #tpu.memory_space<vmem>>, vector<1x1xf32>
    %167 = arith.addf %165, %166 : vector<1x1xf32>
    %c0_112 = arith.constant 0 : index
    %c0_113 = arith.constant 0 : index
    %c0_114 = arith.constant 0 : index
    %168 = vector.load %arg9[%c0_112, %c0_113, %c0_114] : memref<1x1x1xf32, #tpu.memory_space<vmem>>, vector<1x1x1xf32>
    %169 = vector.shape_cast %168 : vector<1x1x1xf32> to vector<1x1xf32>
    %170 = vector.shape_cast %167 : vector<1x1xf32> to vector<1x1x1xf32>
    tpu.vector_store %arg9[%c0_112, %c0_113, %c0_114], %170 {strides = array<i32>} : memref<1x1x1xf32, #tpu.memory_space<vmem>>, vector<1x1x1xf32>,
    return
  }
  func.func @transform_0(%arg0: i32) -> (i32, i32, i32) {
    %c0_i32 = arith.constant 0 : i32
    %c0_i32_0 = arith.constant 0 : i32
    %c0_i32_1 = arith.constant 0 : i32
    return %arg0, %c0_i32, %c0_i32_0 : i32, i32, i32
  }
  func.func @transform_1(%arg0: i32) -> (i32, i32) {
    %c0_i32 = arith.constant 0 : i32
    %c0_i32_0 = arith.constant 0 : i32
    %c0_i32_1 = arith.constant 0 : i32
    return %c0_i32, %c0_i32_0 : i32, i32
  }
  func.func @transform_2(%arg0: i32) -> (i32, i32) {
    %c0_i32 = arith.constant 0 : i32
    %c0_i32_0 = arith.constant 0 : i32
    %c0_i32_1 = arith.constant 0 : i32
    return %c0_i32, %c0_i32_0 : i32, i32
  }
  func.func @transform_3(%arg0: i32) -> (i32, i32) {
    %c0_i32 = arith.constant 0 : i32
    %c0_i32_0 = arith.constant 0 : i32
    %c0_i32_1 = arith.constant 0 : i32
    return %c0_i32, %c0_i32_0 : i32, i32
  }
  func.func @transform_4(%arg0: i32) -> (i32, i32) {
    %c0_i32 = arith.constant 0 : i32
    %c0_i32_0 = arith.constant 0 : i32
    %c0_i32_1 = arith.constant 0 : i32
    return %c0_i32, %c0_i32_0 : i32, i32
  }
  func.func @transform_5(%arg0: i32) -> (i32, i32, i32) {
    %c0_i32 = arith.constant 0 : i32
    %c0_i32_0 = arith.constant 0 : i32
    %c0_i32_1 = arith.constant 0 : i32
    %c0_i32_2 = arith.constant 0 : i32
    return %c0_i32, %c0_i32_0, %c0_i32_1 : i32, i32, i32
  }
  func.func @transform_6(%arg0: i32) -> (i32, i32) {
    %c0_i32 = arith.constant 0 : i32
    %c0_i32_0 = arith.constant 0 : i32
    %c0_i32_1 = arith.constant 0 : i32
    return %c0_i32, %c0_i32_0 : i32, i32
  }
  func.func @transform_7(%arg0: i32) -> (i32, i32) {
    %c0_i32 = arith.constant 0 : i32
    %c0_i32_0 = arith.constant 0 : i32
    %c0_i32_1 = arith.constant 0 : i32
    return %c0_i32, %c0_i32_0 : i32, i32
  }
  func.func @transform_8(%arg0: i32) -> (i32, i32, i32) {
    %c0_i32 = arith.constant 0 : i32
    %c0_i32_0 = arith.constant 0 : i32
    %c0_i32_1 = arith.constant 0 : i32
    return %arg0, %c0_i32, %c0_i32_0 : i32, i32, i32
  }
}

</mosaic_0001>

<bundles_post_ra>
// kernel: critic_forward.2
= control target key start
LH: loop header
LB: loop body
LE: loop exit
PB: predicated region body
PF: predicated region fallthrough
CT: control target
= control target key end

     0   :  { %s1852_s12 = smov 0   ;;  %s2072_s0 = inlined_call_operand.vmem [shape: bf16[2,48,4096], index: 0, kind: input, shape index: {}]   ;;  %s2073_s1 = inlined_call_operand.vmem [shape: bf16[8,48], index: 1, kind: input, shape index: {}]   ;;  %s2074_s2 = inlined_call_operand.vmem [shape: f32[8,1], index: 2, kind: input, shape index: {}]   ;;  %s2075_s3 = inlined_call_operand.vmem [shape: bf16[2,8,991], index: 3, kind: output, shape index: {}]  }
   0x1 LB: > { %s1637_s13 = sadd.s32 4294967295, %s1827_s12   ;;  %p1641_p0 = scmp.ge.s32.totalorder %s1827_s12, 1  ;;  %s1827_s12 = sphi %s1852_s12, %s13_s12  }
   0x2   : > { %p137_p1 = scmp.lt.s32.totalorder %s1827_s12, 3 }
   0x4   : > { %p138_p2 = pnand %p1641_p0, %p137_p1 }
   0x5   : > { %p161_p3 = scmp.lt.s32.totalorder (!%p138_p2), %s1637_s13, 1  ;;  %s1830_s22 = smov (!%p138_p2), 96  }
   0x6   : > { %141 = sbr.rel (%p138_p2) target bundleno = 567 (0x237), region = 32  ;;  %s1831_s23 = smov (!%p138_p2), 127  }
   0xb   : > { %v269_v0 = vld [vmem:[%s2074_s2] sm:$0xff]  ;;  %v1829_v1 = vmov 0   ;;  %s2077_s13 = smov (!%p161_p3, %s1637_s13), 1  ;;  %vm750_vm0 = vcmask 392192   ;;  %vm1471_vm1 = vcmask 785408   ;;  %vm1519_vm2 = vcmask 1039360  }
   0xc   : > { %786 = vmatprep.mubr.bf16.mxu0 %v1829_v1  ;;  %827 = vmatprep.mubr.bf16.mxu1 %v1829_v1  ;;  %s1768_s16 = smul.u32 768, %s2077_s13  ;;  %v1897_v36 = vld [vmem:[%s2073_s1] sm:$0xf]  ;;  %s1763_s24 = sshll.u32 %s2077_s13, 5  ;;  %vm1578_vm3 = vcmask 1043456   ;;  %vm1579_vm4 = vcmask 777220  }
   0xd   : > { %1780 = vset.pattern.permute.xlu0 %v1829_v1  ;;  %s170_s27 = scalar_lea.vmem %s2075_s3, %s1763_s24  ;;  %vm1580_vm5 = vmor %vm1579_vm4, %vm1578_vm3 }
   0xe   : > { %1436 = vperm.xlu0 %1780, %v269_v0   ;;  %s1872_s19 = scalar_lea.vmem %s2072_s0, %s1768_s16 }
   0xf   : > { %v236_v2 = vld [vmem:[%s1872_s19 + $0x200] sm:$0xff]  ;;  %v237_v4 = vld [vmem:[%s1872_s19 + $0x208] sm:$0xff]  ;;  %v238_v24 = vld [vmem:[%s1872_s19 + $0x210] sm:$0xff] }
  0x10   : > { %v252_v3 = vld [vmem:[%s1872_s19 + $0x280] sm:$0xff]  ;;  %v253_v6 = vld [vmem:[%s1872_s19 + $0x288] sm:$0xff]  ;;  %v254_v25 = vld [vmem:[%s1872_s19 + $0x290] sm:$0xff] }
  0x11   : > { %v1710_v5 = vcombine.high %v236_v2, %v252_v3  ;;  %v1709_v7 = vcombine.low %v236_v2, %v252_v3  ;;  %v204_v8 = vld [vmem:[%s1872_s19 + $0x100] sm:$0xff]  ;;  %v1712_v10 = vcombine.high %v237_v4, %v253_v6  ;;  %v1711_v11 = vcombine.low %v237_v4, %v253_v6  ;;  %v205_v13 = vld [vmem:[%s1872_s19 + $0x108] sm:$0xff]  ;;  %v239_v26 = vld [vmem:[%s1872_s19 + $0x218] sm:$0xff] }
  0x12   : > { %v220_v9 = vld [vmem:[%s1872_s19 + $0x180] sm:$0xff]  ;;  %v221_v14 = vld [vmem:[%s1872_s19 + $0x188] sm:$0xff]  ;;  %v255_v27 = vld [vmem:[%s1872_s19 + $0x298] sm:$0xff]  ;;  %v1714_v30 = vcombine.high %v238_v24, %v254_v25  ;;  %v1713_v37 = vcombine.low %v238_v24, %v254_v25 }
  0x13   : > { %v1678_v12 = vcombine.high %v204_v8, %v220_v9  ;;  %v172_v15 = vld [vmem:[%s1872_s19] sm:$0xff]  ;;  %764 = vmatprep.subr.bf16.mxu0 %v1710_v5  ;;  %v1680_v16 = vcombine.high %v205_v13, %v221_v14  ;;  %v173_v18 = vld [vmem:[%s1872_s19 + $0x8] sm:$0xff]  ;;  %805 = vmatprep.subr.bf16.mxu1 %v1712_v10  ;;  %v1677_v20 = vcombine.low %v204_v8, %v220_v9  ;;  %v206_v32 = vld [vmem:[%s1872_s19 + $0x110] sm:$0xff] }
  0x14   : > { %v188_v17 = vld [vmem:[%s1872_s19 + $0x80] sm:$0xff]  ;;  %v189_v19 = vld [vmem:[%s1872_s19 + $0x88] sm:$0xff]  ;;  %765 = vmatpush1.bf16.msra.mxu0 %v1709_v7  ;;  %806 = vmatpush1.bf16.msra.mxu1 %v1711_v11  ;;  %v1679_v21 = vcombine.low %v205_v13, %v221_v14  ;;  %v1716_v31 = vcombine.high %v239_v26, %v255_v27  ;;  %v222_v33 = vld [vmem:[%s1872_s19 + $0x190] sm:$0xff]  ;;  %v1715_v38 = vcombine.low %v239_v26, %v255_v27 }
  0x15   : > { %766 = vmatprep.subr.bf16.mxu0 %v1678_v12  ;;  %v1646_v22 = vcombine.high %v172_v15, %v188_v17  ;;  %807 = vmatprep.subr.bf16.mxu1 %v1680_v16  ;;  %v1648_v23 = vcombine.high %v173_v18, %v189_v19  ;;  %v1645_v28 = vcombine.low %v172_v15, %v188_v17  ;;  %v207_v34 = vld [vmem:[%s1872_s19 + $0x118] sm:$0xff]  ;;  %v174_v41 = vld [vmem:[%s1872_s19 + $0x10] sm:$0xff]  ;;  %v240_v49 = vld [vmem:[%s1872_s19 + $0x220] sm:$0xff] }
  0x16   : > { %v1647_v29 = vcombine.low %v173_v18, %v189_v19  ;;  %v223_v35 = vld [vmem:[%s1872_s19 + $0x198] sm:$0xff]  ;;  %v1682_v39 = vcombine.high %v206_v32, %v222_v33  ;;  %v190_v42 = vld [vmem:[%s1872_s19 + $0x90] sm:$0xff]  ;;  %v1681_v45 = vcombine.low %v206_v32, %v222_v33  ;;  %v256_v50 = vld [vmem:[%s1872_s19 + $0x2a0] sm:$0xff] }
  0x17   : > { %v1684_v40 = vcombine.high %v207_v34, %v223_v35  ;;  %v175_v43 = vld [vmem:[%s1872_s19 + $0x18] sm:$0xff]  ;;  %v1683_v46 = vcombine.low %v207_v34, %v223_v35  ;;  %v1650_v47 = vcombine.high %v174_v41, %v190_v42  ;;  %v241_v51 = vld [vmem:[%s1872_s19 + $0x228] sm:$0xff]  ;;  %v1649_v53 = vcombine.low %v174_v41, %v190_v42  ;;  %v208_v57 = vld [vmem:[%s1872_s19 + $0x120] sm:$0xff] }
  0x18   : > { %767 = vmatpush1.bf16.msra.mxu0 %v1677_v20  ;;  %808 = vmatpush1.bf16.msra.mxu1 %v1679_v21  ;;  %v191_v44 = vld [vmem:[%s1872_s19 + $0x98] sm:$0xff]  ;;  %v257_v52 = vld [vmem:[%s1872_s19 + $0x2a8] sm:$0xff]  ;;  %v1718_v55 = vcombine.high %v240_v49, %v256_v50  ;;  %v224_v58 = vld [vmem:[%s1872_s19 + $0x1a0] sm:$0xff]  ;;  %v1717_v61 = vcombine.low %v240_v49, %v256_v50 }
  0x19   : > { %768 = vmatprep.subr.bf16.mxu0 %v1646_v22  ;;  %809 = vmatprep.subr.bf16.mxu1 %v1648_v23  ;;  %v1652_v48 = vcombine.high %v175_v43, %v191_v44  ;;  %v1651_v54 = vcombine.low %v175_v43, %v191_v44  ;;  %v1720_v56 = vcombine.high %v241_v51, %v257_v52  ;;  %v209_v59 = vld [vmem:[%s1872_s19 + $0x128] sm:$0xff]  ;;  %v176_v2 = vld [vmem:[%s1872_s19 + $0x20] sm:$0xff]  ;;  %v242_v10 = vld [vmem:[%s1872_s19 + $0x230] sm:$0xff] }
  0x1a   : > { %v225_v60 = vld [vmem:[%s1872_s19 + $0x1a8] sm:$0xff]  ;;  %v1719_v62 = vcombine.low %v241_v51, %v257_v52  ;;  %v1686_v63 = vcombine.high %v208_v57, %v224_v58  ;;  %v192_v3 = vld [vmem:[%s1872_s19 + $0xa0] sm:$0xff]  ;;  %v1685_v6 = vcombine.low %v208_v57, %v224_v58  ;;  %v258_v11 = vld [vmem:[%s1872_s19 + $0x2b0] sm:$0xff] }
  0x1b   : > { %v1688_v0 = vcombine.high %v209_v59, %v225_v60  ;;  %v177_v4 = vld [vmem:[%s1872_s19 + $0x28] sm:$0xff]  ;;  %v1687_v7 = vcombine.low %v209_v59, %v225_v60  ;;  %v1654_v8 = vcombine.high %v176_v2, %v192_v3  ;;  %v243_v12 = vld [vmem:[%s1872_s19 + $0x238] sm:$0xff]  ;;  %v1653_v14 = vcombine.low %v176_v2, %v192_v3  ;;  %v210_v18 = vld [vmem:[%s1872_s19 + $0x130] sm:$0xff] }
  0x1c   : > { %769 = vmatpush1.bf16.msra.mxu0 %v1645_v28  ;;  %810 = vmatpush1.bf16.msra.mxu1 %v1647_v29  ;;  %v193_v5 = vld [vmem:[%s1872_s19 + $0xa8] sm:$0xff]  ;;  %v259_v13 = vld [vmem:[%s1872_s19 + $0x2b8] sm:$0xff]  ;;  %v1722_v16 = vcombine.high %v242_v10, %v258_v11  ;;  %v226_v19 = vld [vmem:[%s1872_s19 + $0x1b0] sm:$0xff]  ;;  %v1721_v22 = vcombine.low %v242_v10, %v258_v11 }
  0x1d   : > { %846 = vmatprep.subr.bf16.mxu0 %v1714_v30  ;;  %887 = vmatprep.subr.bf16.mxu1 %v1716_v31  ;;  %v1656_v9 = vcombine.high %v177_v4, %v193_v5  ;;  %v1655_v15 = vcombine.low %v177_v4, %v193_v5  ;;  %v1724_v17 = vcombine.high %v243_v12, %v259_v13  ;;  %v211_v20 = vld [vmem:[%s1872_s19 + $0x138] sm:$0xff]  ;;  %v178_v26 = vld [vmem:[%s1872_s19 + $0x30] sm:$0xff]  ;;  %v244_v34 = vld [vmem:[%s1872_s19 + $0x240] sm:$0xff] }
  0x1e   : > { %v227_v21 = vld [vmem:[%s1872_s19 + $0x1b8] sm:$0xff]  ;;  %v1723_v23 = vcombine.low %v243_v12, %v259_v13  ;;  %v1690_v24 = vcombine.high %v210_v18, %v226_v19  ;;  %v194_v27 = vld [vmem:[%s1872_s19 + $0xb0] sm:$0xff]  ;;  %v1689_v30 = vcombine.low %v210_v18, %v226_v19  ;;  %v260_v35 = vld [vmem:[%s1872_s19 + $0x2c0] sm:$0xff] }
  0x1f   : > { %1741 = vmatmul.mubr.msk.bf16.vlgmr.msra.gmra.mxu0 %vm750_vm0, %v1897_v36  ;;  %1742 = vmatmul.mubr.msk.bf16.vlgmr.msra.gmra.mxu1 %vm750_vm0, %v1897_v36  ;;  %v1692_v25 = vcombine.high %v211_v20, %v227_v21  ;;  %v179_v28 = vld [vmem:[%s1872_s19 + $0x38] sm:$0xff]  ;;  %v1691_v31 = vcombine.low %v211_v20, %v227_v21  ;;  %v1658_v32 = vcombine.high %v178_v26, %v194_v27  ;;  %v212_v43 = vld [vmem:[%s1872_s19 + $0x140] sm:$0xff]  ;;  %v246_v59 = vld [vmem:[%s1872_s19 + $0x250] sm:$0xff] }
  0x20   : > { %847 = vmatpush1.bf16.msra.mxu0 %v1713_v37  ;;  %888 = vmatpush1.bf16.msra.mxu1 %v1715_v38  ;;  %v195_v29 = vld [vmem:[%s1872_s19 + $0xb8] sm:$0xff]  ;;  %v245_v37 = vld [vmem:[%s1872_s19 + $0x248] sm:$0xff]  ;;  %v1726_v41 = vcombine.high %v244_v34, %v260_v35  ;;  %v228_v44 = vld [vmem:[%s1872_s19 + $0x1c0] sm:$0xff] }
  0x21   : > { %848 = vmatprep.subr.bf16.mxu0 %v1682_v39  ;;  %889 = vmatprep.subr.bf16.mxu1 %v1684_v40  ;;  %v1660_v33 = vcombine.high %v179_v28, %v195_v29  ;;  %v261_v38 = vld [vmem:[%s1872_s19 + $0x2c8] sm:$0xff]  ;;  %v1657_v39 = vcombine.low %v178_v26, %v194_v27  ;;  %v1659_v40 = vcombine.low %v179_v28, %v195_v29  ;;  %v180_v51 = vld [vmem:[%s1872_s19 + $0x40] sm:$0xff]  ;;  %v262_v60 = vld [vmem:[%s1872_s19 + $0x2d0] sm:$0xff] }
  0x22   : > { %868 = vmatprep.mubr.bf16.mxu0 %v1829_v1  ;;  %909 = vmatprep.mubr.bf16.mxu1 %v1829_v1  ;;  %v1728_v42 = vcombine.high %v245_v37, %v261_v38  ;;  %v1694_v49 = vcombine.high %v212_v43, %v228_v44  ;;  %v196_v52 = vld [vmem:[%s1872_s19 + $0xc0] sm:$0xff]  ;;  %v1730_v2 = vcombine.high %v246_v59, %v262_v60  ;;  %v214_v4 = vld [vmem:[%s1872_s19 + $0x150] sm:$0xff] }
  0x23   : > { %v1662_v57 = vcombine.high %v180_v51, %v196_v52  ;;  %v230_v5 = vld [vmem:[%s1872_s19 + $0x1d0] sm:$0xff]  ;;  %v248_v20 = vld [vmem:[%s1872_s19 + $0x260] sm:$0xff] }
  0x24   : > { %849 = vmatpush1.bf16.msra.mxu0 %v1681_v45  ;;  %890 = vmatpush1.bf16.msra.mxu1 %v1683_v46  ;;  %v213_v45 = vld [vmem:[%s1872_s19 + $0x148] sm:$0xff]  ;;  %v1698_v10 = vcombine.high %v214_v4, %v230_v5  ;;  %v182_v12 = vld [vmem:[%s1872_s19 + $0x50] sm:$0xff]  ;;  %v264_v21 = vld [vmem:[%s1872_s19 + $0x2e0] sm:$0xff] }
  0x25   : > { %850 = vmatprep.subr.bf16.mxu0 %v1650_v47  ;;  %891 = vmatprep.subr.bf16.mxu1 %v1652_v48  ;;  %v229_v46 = vld [vmem:[%s1872_s19 + $0x1c8] sm:$0xff]  ;;  %v1725_v47 = vcombine.low %v244_v34, %v260_v35  ;;  %v1727_v48 = vcombine.low %v245_v37, %v261_v38  ;;  %v198_v13 = vld [vmem:[%s1872_s19 + $0xd0] sm:$0xff]  ;;  %v1734_v26 = vcombine.high %v248_v20, %v264_v21  ;;  %v216_v28 = vld [vmem:[%s1872_s19 + $0x160] sm:$0xff] }
  0x26   : > { %v1696_v50 = vcombine.high %v213_v45, %v229_v46  ;;  %v1666_v18 = vcombine.high %v182_v12, %v198_v13  ;;  %v232_v29 = vld [vmem:[%s1872_s19 + $0x1e0] sm:$0xff] }
  0x27   : > { %v1702_v34 = vcombine.high %v216_v28, %v232_v29  ;;  %v184_v37 = vld [vmem:[%s1872_s19 + $0x60] sm:$0xff] }
  0x28   : > { %851 = vmatpush1.bf16.msra.mxu0 %v1649_v53  ;;  %892 = vmatpush1.bf16.msra.mxu1 %v1651_v54  ;;  %v181_v53 = vld [vmem:[%s1872_s19 + $0x48] sm:$0xff]  ;;  %v200_v38 = vld [vmem:[%s1872_s19 + $0xe0] sm:$0xff] }
  0x29   : > { %928 = vmatprep.subr.bf16.mxu0 %v1718_v55  ;;  %969 = vmatprep.subr.bf16.mxu1 %v1720_v56  ;;  %v197_v54 = vld [vmem:[%s1872_s19 + $0xc8] sm:$0xff]  ;;  %v1693_v55 = vcombine.low %v212_v43, %v228_v44  ;;  %v1695_v56 = vcombine.low %v213_v45, %v229_v46  ;;  %v1670_v43 = vcombine.high %v184_v37, %v200_v38  ;;  %v250_v45 = vld [vmem:[%s1872_s19 + $0x270] sm:$0xff] }
  0x2a   : > { %v1664_v58 = vcombine.high %v181_v53, %v197_v54  ;;  %v266_v46 = vld [vmem:[%s1872_s19 + $0x2f0] sm:$0xff] }
  0x2b   : > { %1743 = vmatmul.mubr.msk.bf16.vlgmr.msra.gmra.mxu0 %vm750_vm0, %v1897_v36  ;;  %1744 = vmatmul.mubr.msk.bf16.vlgmr.msra.gmra.mxu1 %vm750_vm0, %v1897_v36 }
  0x2c   : > { %929 = vmatpush1.bf16.msra.mxu0 %v1717_v61  ;;  %970 = vmatpush1.bf16.msra.mxu1 %v1719_v62  ;;  %v247_v61 = vld [vmem:[%s1872_s19 + $0x258] sm:$0xff] }
  0x2d   : > { %930 = vmatprep.subr.bf16.mxu0 %v1686_v63  ;;  %971 = vmatprep.subr.bf16.mxu1 %v1688_v0  ;;  %v263_v62 = vld [vmem:[%s1872_s19 + $0x2d8] sm:$0xff]  ;;  %v1661_v63 = vcombine.low %v180_v51, %v196_v52  ;;  %v1663_v0 = vcombine.low %v181_v53, %v197_v54  ;;  %v1738_v51 = vcombine.high %v250_v45, %v266_v46  ;;  %v218_v53 = vld [vmem:[%s1872_s19 + $0x170] sm:$0xff] }
  0x2e   : > { %950 = vmatprep.mubr.bf16.mxu0 %v1829_v1  ;;  %991 = vmatprep.mubr.bf16.mxu1 %v1829_v1  ;;  %v1732_v3 = vcombine.high %v247_v61, %v263_v62  ;;  %v234_v54 = vld [vmem:[%s1872_s19 + $0x1f0] sm:$0xff] }
  0x30   : > { %931 = vmatpush1.bf16.msra.mxu0 %v1685_v6  ;;  %972 = vmatpush1.bf16.msra.mxu1 %v1687_v7  ;;  %v215_v6 = vld [vmem:[%s1872_s19 + $0x158] sm:$0xff] }
  0x31   : > { %932 = vmatprep.subr.bf16.mxu0 %v1654_v8  ;;  %973 = vmatprep.subr.bf16.mxu1 %v1656_v9  ;;  %v231_v7 = vld [vmem:[%s1872_s19 + $0x1d8] sm:$0xff]  ;;  %v1729_v8 = vcombine.low %v246_v59, %v262_v60  ;;  %v1731_v9 = vcombine.low %v247_v61, %v263_v62  ;;  %v1706_v59 = vcombine.high %v218_v53, %v234_v54  ;;  %v186_v61 = vld [vmem:[%s1872_s19 + $0x70] sm:$0xff] }
  0x32   : > { %v1700_v11 = vcombine.high %v215_v6, %v231_v7  ;;  %v202_v62 = vld [vmem:[%s1872_s19 + $0xf0] sm:$0xff] }
  0x34   : > { %933 = vmatpush1.bf16.msra.mxu0 %v1653_v14  ;;  %974 = vmatpush1.bf16.msra.mxu1 %v1655_v15  ;;  %v183_v14 = vld [vmem:[%s1872_s19 + $0x58] sm:$0xff] }
  0x35   : > { %1010 = vmatprep.subr.bf16.mxu0 %v1722_v16  ;;  %1051 = vmatprep.subr.bf16.mxu1 %v1724_v17  ;;  %v199_v15 = vld [vmem:[%s1872_s19 + $0xd8] sm:$0xff]  ;;  %v1697_v16 = vcombine.low %v214_v4, %v230_v5  ;;  %v1699_v17 = vcombine.low %v215_v6, %v231_v7  ;;  %v1674_v4 = vcombine.high %v186_v61, %v202_v62 }
  0x36   : > { %v1668_v19 = vcombine.high %v183_v14, %v199_v15  ;;  %v1673_v6 = vcombine.low %v186_v61, %v202_v62 }
  0x37   : > { %1745 = vmatmul.mubr.msk.bf16.vlgmr.msra.gmra.mxu0 %vm750_vm0, %v1897_v36  ;;  %1746 = vmatmul.mubr.msk.bf16.vlgmr.msra.gmra.mxu1 %vm750_vm0, %v1897_v36 }
  0x38   : > { %1011 = vmatpush1.bf16.msra.mxu0 %v1721_v22  ;;  %1052 = vmatpush1.bf16.msra.mxu1 %v1723_v23  ;;  %v249_v22 = vld [vmem:[%s1872_s19 + $0x268] sm:$0xff] }
  0x39   : > { %1012 = vmatprep.subr.bf16.mxu0 %v1690_v24  ;;  %1053 = vmatprep.subr.bf16.mxu1 %v1692_v25  ;;  %v265_v23 = vld [vmem:[%s1872_s19 + $0x2e8] sm:$0xff]  ;;  %v1665_v24 = vcombine.low %v182_v12, %v198_v13  ;;  %v1667_v25 = vcombine.low %v183_v14, %v199_v15 }
  0x3a   : > { %1032 = vmatprep.mubr.bf16.mxu0 %v1829_v1  ;;  %1073 = vmatprep.mubr.bf16.mxu1 %v1829_v1  ;;  %v1736_v27 = vcombine.high %v249_v22, %v265_v23 }
  0x3c   : > { %1013 = vmatpush1.bf16.msra.mxu0 %v1689_v30  ;;  %1054 = vmatpush1.bf16.msra.mxu1 %v1691_v31  ;;  %v217_v30 = vld [vmem:[%s1872_s19 + $0x168] sm:$0xff] }
  0x3d   : > { %1014 = vmatprep.subr.bf16.mxu0 %v1658_v32  ;;  %1055 = vmatprep.subr.bf16.mxu1 %v1660_v33  ;;  %v233_v31 = vld [vmem:[%s1872_s19 + $0x1e8] sm:$0xff]  ;;  %v1733_v32 = vcombine.low %v248_v20, %v264_v21  ;;  %v1735_v33 = vcombine.low %v249_v22, %v265_v23 }
  0x3e   : > { %v1704_v35 = vcombine.high %v217_v30, %v233_v31 }
  0x40   : > { %1015 = vmatpush1.bf16.msra.mxu0 %v1657_v39  ;;  %1056 = vmatpush1.bf16.msra.mxu1 %v1659_v40  ;;  %v185_v39 = vld [vmem:[%s1872_s19 + $0x68] sm:$0xff] }
  0x41   : > { %1092 = vmatprep.subr.bf16.mxu0 %v1726_v41  ;;  %1133 = vmatprep.subr.bf16.mxu1 %v1728_v42  ;;  %v201_v40 = vld [vmem:[%s1872_s19 + $0xe8] sm:$0xff]  ;;  %v1701_v41 = vcombine.low %v216_v28, %v232_v29  ;;  %v1703_v42 = vcombine.low %v217_v30, %v233_v31 }
  0x42   : > { %v1672_v44 = vcombine.high %v185_v39, %v201_v40 }
  0x43   : > { %1747 = vmatmul.mubr.msk.bf16.vlgmr.msra.gmra.mxu0 %vm750_vm0, %v1897_v36  ;;  %1748 = vmatmul.mubr.msk.bf16.vlgmr.msra.gmra.mxu1 %vm750_vm0, %v1897_v36 }
  0x44   : > { %1093 = vmatpush1.bf16.msra.mxu0 %v1725_v47  ;;  %1134 = vmatpush1.bf16.msra.mxu1 %v1727_v48  ;;  %v251_v47 = vld [vmem:[%s1872_s19 + $0x278] sm:$0xff] }
  0x45   : > { %1094 = vmatprep.subr.bf16.mxu0 %v1694_v49  ;;  %1135 = vmatprep.subr.bf16.mxu1 %v1696_v50  ;;  %v267_v48 = vld [vmem:[%s1872_s19 + $0x2f8] sm:$0xff]  ;;  %v1669_v49 = vcombine.low %v184_v37, %v200_v38  ;;  %v1671_v50 = vcombine.low %v185_v39, %v201_v40 }
  0x46   : > { %1114 = vmatprep.mubr.bf16.mxu0 %v1829_v1  ;;  %1155 = vmatprep.mubr.bf16.mxu1 %v1829_v1  ;;  %v1740_v52 = vcombine.high %v251_v47, %v267_v48 }
  0x48   : > { %1095 = vmatpush1.bf16.msra.mxu0 %v1693_v55  ;;  %1136 = vmatpush1.bf16.msra.mxu1 %v1695_v56  ;;  %v219_v55 = vld [vmem:[%s1872_s19 + $0x178] sm:$0xff] }
  0x49   : > { %1096 = vmatprep.subr.bf16.mxu0 %v1662_v57  ;;  %1137 = vmatprep.subr.bf16.mxu1 %v1664_v58  ;;  %v235_v56 = vld [vmem:[%s1872_s19 + $0x1f8] sm:$0xff]  ;;  %v1737_v57 = vcombine.low %v250_v45, %v266_v46  ;;  %v1739_v58 = vcombine.low %v251_v47, %v267_v48 }
  0x4a   : > { %v1708_v60 = vcombine.high %v219_v55, %v235_v56 }
  0x4c   : > { %1097 = vmatpush1.bf16.msra.mxu0 %v1661_v63  ;;  %1138 = vmatpush1.bf16.msra.mxu1 %v1663_v0  ;;  %v187_v63 = vld [vmem:[%s1872_s19 + $0x78] sm:$0xff] }
  0x4d   : > { %1174 = vmatprep.subr.bf16.mxu0 %v1730_v2  ;;  %1215 = vmatprep.subr.bf16.mxu1 %v1732_v3  ;;  %v203_v0 = vld [vmem:[%s1872_s19 + $0xf8] sm:$0xff]  ;;  %v1705_v2 = vcombine.low %v218_v53, %v234_v54  ;;  %v1707_v3 = vcombine.low %v219_v55, %v235_v56 }
  0x4e   : > { %v1676_v5 = vcombine.high %v187_v63, %v203_v0  ;;  %v1675_v7 = vcombine.low %v187_v63, %v203_v0 }
  0x4f   : > { %1749 = vmatmul.mubr.msk.bf16.vlgmr.msra.gmra.mxu0 %vm750_vm0, %v1897_v36  ;;  %1750 = vmatmul.mubr.msk.bf16.vlgmr.msra.gmra.mxu1 %vm750_vm0, %v1897_v36 }
  0x50   : > { %1175 = vmatpush1.bf16.msra.mxu0 %v1729_v8  ;;  %1216 = vmatpush1.bf16.msra.mxu1 %v1731_v9 }
  0x51   : > { %1176 = vmatprep.subr.bf16.mxu0 %v1698_v10  ;;  %1217 = vmatprep.subr.bf16.mxu1 %v1700_v11 }
  0x52   : > { %1196 = vmatprep.mubr.bf16.mxu0 %v1829_v1  ;;  %1237 = vmatprep.mubr.bf16.mxu1 %v1829_v1 }
  0x54   : > { %1177 = vmatpush1.bf16.msra.mxu0 %v1697_v16  ;;  %1218 = vmatpush1.bf16.msra.mxu1 %v1699_v17 }
  0x55   : > { %1178 = vmatprep.subr.bf16.mxu0 %v1666_v18  ;;  %1219 = vmatprep.subr.bf16.mxu1 %v1668_v19 }
  0x58   : > { %1179 = vmatpush1.bf16.msra.mxu0 %v1665_v24  ;;  %1220 = vmatpush1.bf16.msra.mxu1 %v1667_v25 }
  0x59   : > { %1256 = vmatprep.subr.bf16.mxu0 %v1734_v26  ;;  %1297 = vmatprep.subr.bf16.mxu1 %v1736_v27 }
  0x5b   : > { %1751 = vmatmul.mubr.msk.bf16.vlgmr.msra.gmra.mxu0 %vm750_vm0, %v1897_v36  ;;  %1752 = vmatmul.mubr.msk.bf16.vlgmr.msra.gmra.mxu1 %vm750_vm0, %v1897_v36 }
  0x5c   : > { %1257 = vmatpush1.bf16.msra.mxu0 %v1733_v32  ;;  %1298 = vmatpush1.bf16.msra.mxu1 %v1735_v33 }
  0x5d   : > { %1258 = vmatprep.subr.bf16.mxu0 %v1702_v34  ;;  %1299 = vmatprep.subr.bf16.mxu1 %v1704_v35 }
  0x5e   : > { %1278 = vmatprep.mubr.bf16.mxu0 %v1829_v1  ;;  %1319 = vmatprep.mubr.bf16.mxu1 %v1829_v1 }
  0x60   : > { %1259 = vmatpush1.bf16.msra.mxu0 %v1701_v41  ;;  %1300 = vmatpush1.bf16.msra.mxu1 %v1703_v42 }
  0x61   : > { %1260 = vmatprep.subr.bf16.mxu0 %v1670_v43  ;;  %1301 = vmatprep.subr.bf16.mxu1 %v1672_v44 }
  0x64   : > { %1261 = vmatpush1.bf16.msra.mxu0 %v1669_v49  ;;  %1302 = vmatpush1.bf16.msra.mxu1 %v1671_v50 }
  0x65   : > { %1338 = vmatprep.subr.bf16.mxu0 %v1738_v51  ;;  %1379 = vmatprep.subr.bf16.mxu1 %v1740_v52 }
  0x67   : > { %1753 = vmatmul.mubr.msk.bf16.vlgmr.msra.gmra.mxu0 %vm750_vm0, %v1897_v36  ;;  %1754 = vmatmul.mubr.msk.bf16.vlgmr.msra.gmra.mxu1 %vm750_vm0, %v1897_v36 }
  0x68   : > { %1339 = vmatpush1.bf16.msra.mxu0 %v1737_v57  ;;  %1380 = vmatpush1.bf16.msra.mxu1 %v1739_v58 }
  0x69   : > { %1340 = vmatprep.subr.bf16.mxu0 %v1706_v59  ;;  %1381 = vmatprep.subr.bf16.mxu1 %v1708_v60 }
  0x6a   : > { %1360 = vmatprep.mubr.bf16.mxu0 %v1829_v1  ;;  %1401 = vmatprep.mubr.bf16.mxu1 %v1829_v1 }
  0x6c   : > { %1341 = vmatpush1.bf16.msra.mxu0 %v1705_v2  ;;  %1382 = vmatpush1.bf16.msra.mxu1 %v1707_v3 }
  0x6d   : > { %1342 = vmatprep.subr.bf16.mxu0 %v1674_v4  ;;  %1383 = vmatprep.subr.bf16.mxu1 %v1676_v5 }
  0x70   : > { %1343 = vmatpush1.bf16.msra.mxu0 %v1673_v6  ;;  %1384 = vmatpush1.bf16.msra.mxu1 %v1675_v7 }
  0x73   : > { %1755 = vmatmul.mubr.msk.bf16.vlgmr.msra.gmra.mxu0 %vm750_vm0, %v1897_v36  ;;  %1756 = vmatmul.mubr.msk.bf16.vlgmr.msra.gmra.mxu1 %vm750_vm0, %v1897_v36 }
  0x89   : > { %v1437_v6 = vpop.permute.xlu0 %1436 }
  0xdf   : > { %v788_v8 = vpop.f32.mrf.mxu0  ;;  %v829_v9 = vpop.f32.mrf.mxu1 }
  0xe1   : > { %v2021_v10 = vpop.f32.mrf.mxu0  ;;  %v2023_v11 = vpop.f32.mrf.mxu1 }
  0xe3   : > { %v792_v1 = vpop.f32.mrf.mxu0  ;;  %v833_v12 = vpop.f32.mrf.mxu1 }
  0xe5   : > { %v793_v13 = vpop.f32.mrf.mxu0  ;;  %v834_v14 = vpop.f32.mrf.mxu1 }
  0xeb   : > { %v2025_v15 = vpop.f32.mrf.mxu0  ;;  %v2027_v16 = vpop.f32.mrf.mxu1 }
  0xed   : > { %v2029_v17 = vpop.f32.mrf.mxu0  ;;  %v2031_v18 = vpop.f32.mrf.mxu1 }
  0xef   : > { %v874_v19 = vpop.f32.mrf.mxu0  ;;  %v915_v36 = vpop.f32.mrf.mxu1 }
  0xf1   : > { %v875_v20 = vpop.f32.mrf.mxu0  ;;  %v916_v21 = vpop.f32.mrf.mxu1 }
  0xf7   : > { %v952_v22 = vpop.f32.mrf.mxu0  ;;  %v993_v23 = vpop.f32.mrf.mxu1 }
  0xf8   : > { %v1410_v56 = vmax.f32 %v788_v8, %v952_v22  ;;  %v1412_v59 = vmax.f32 %v829_v9, %v993_v23 }
  0xf9   : > { %v954_v24 = vpop.f32.mrf.mxu0  ;;  %v995_v25 = vpop.f32.mrf.mxu1 }
  0xfa   : > { %v1411_v62 = vmax.f32 %v2021_v10, %v954_v24  ;;  %v1413_v3 = vmax.f32 %v2023_v11, %v995_v25 }
  0xfb   : > { %v956_v26 = vpop.f32.mrf.mxu0  ;;  %v997_v27 = vpop.f32.mrf.mxu1 }
  0xfd   : > { %v957_v28 = vpop.f32.mrf.mxu0  ;;  %v998_v29 = vpop.f32.mrf.mxu1 }
 0x103   : > { %v2033_v30 = vpop.f32.mrf.mxu0  ;;  %v2035_v31 = vpop.f32.mrf.mxu1 }
 0x104   : > { %v1414_v11 = vmax.f32 %v2025_v15, %v2033_v30  ;;  %v1416_v25 = vmax.f32 %v2027_v16, %v2035_v31 }
 0x105   : > { %v2037_v32 = vpop.f32.mrf.mxu0  ;;  %v2039_v33 = vpop.f32.mrf.mxu1 }
 0x106   : > { %v1415_v28 = vmax.f32 %v2029_v17, %v2037_v32 }
 0x107   : > { %v1038_v34 = vpop.f32.mrf.mxu0  ;;  %v1079_v35 = vpop.f32.mrf.mxu1 }
 0x109   : > { %v1039_v37 = vpop.f32.mrf.mxu0  ;;  %v1080_v38 = vpop.f32.mrf.mxu1 }
 0x10a   : > { %v1417_v37 = vmax.f32 %v2031_v18, %v2039_v33 }
 0x10f   : > { %v1116_v39 = vpop.f32.mrf.mxu0  ;;  %v1157_v40 = vpop.f32.mrf.mxu1 }
 0x111   : > { %v1118_v41 = vpop.f32.mrf.mxu0  ;;  %v1159_v42 = vpop.f32.mrf.mxu1 }
 0x113   : > { %v1120_v43 = vpop.f32.mrf.mxu0  ;;  %v1161_v44 = vpop.f32.mrf.mxu1 }
 0x115   : > { %v1121_v45 = vpop.f32.mrf.mxu0  ;;  %v1162_v46 = vpop.f32.mrf.mxu1 }
 0x11b   : > { %v1198_v47 = vpop.f32.mrf.mxu0  ;;  %v1239_v48 = vpop.f32.mrf.mxu1 }
 0x11d   : > { %v1200_v49 = vpop.f32.mrf.mxu0  ;;  %v1241_v50 = vpop.f32.mrf.mxu1 }
 0x11f   : > { %v1202_v51 = vpop.f32.mrf.mxu0  ;;  %v1243_v52 = vpop.f32.mrf.mxu1 }
 0x121   : > { %v1203_v53 = vpop.f32.mrf.mxu0  ;;  %v1244_v54 = vpop.f32.mrf.mxu1 }
 0x127   : > { %v1280_v55 = vpop.f32.mrf.mxu0  ;;  %v1321_v58 = vpop.f32.mrf.mxu1 }
 0x128   : > { %v1418_v57 = vmax.f32 %v1116_v39, %v1280_v55  ;;  %v1420_v60 = vmax.f32 %v1157_v40, %v1321_v58 }
 0x129   : > { %v1282_v61 = vpop.f32.mrf.mxu0  ;;  %v1323_v2 = vpop.f32.mrf.mxu1 }
 0x12a   : > { %v1426_v63 = vmax.f32 %v1410_v56, %v1418_v57  ;;  %v1419_v0 = vmax.f32 %v1118_v41, %v1282_v61  ;;  %v1428_v4 = vmax.f32 %v1412_v59, %v1420_v60  ;;  %v1421_v5 = vmax.f32 %v1159_v42, %v1323_v2 }
 0x12b   : > { %v1284_v7 = vpop.f32.mrf.mxu0  ;;  %v1325_v12 = vpop.f32.mrf.mxu1 }
 0x12c   : > { %v1427_v1 = vmax.f32 %v1411_v62, %v1419_v0  ;;  %v1429_v13 = vmax.f32 %v1413_v3, %v1421_v5  ;;  %v1439_v19 = vadd.f32 %v1437_v6, %v1426_v63  ;;  %v1441_v36 = vadd.f32 %v1437_v6, %v1428_v4 }
 0x12d   : > { %v1285_v8 = vpop.f32.mrf.mxu0  ;;  %v1326_v14 = vpop.f32.mrf.mxu1 }
 0x12e   : > { %v1440_v9 = vadd.f32 %v1437_v6, %v1427_v1  ;;  %v1442_v20 = vadd.f32 %v1437_v6, %v1429_v13 }
 0x130   : > { %v1781_v21 = vpack.i.bf16 %v1440_v9, %v1439_v19  ;;  %v1786_v10 = vpack.i.bf16 %v1442_v20, %v1441_v36 }
 0x132   : > { %1782 = vrot.lane.b32.xlu0 %v1781_v21, %s1830_s22  ;;  %1787 = vrot.lane.b32.xlu1 %v1786_v10, %s1830_s22 }
 0x133   : > { %v1362_v22 = vpop.f32.mrf.mxu0  ;;  %v1403_v24 = vpop.f32.mrf.mxu1 }
 0x134   : > { %v1422_v23 = vmax.f32 %v1198_v47, %v1362_v22  ;;  %v1424_v26 = vmax.f32 %v1239_v48, %v1403_v24 }
 0x135   : > { %v1364_v27 = vpop.f32.mrf.mxu0  ;;  %v1405_v35 = vpop.f32.mrf.mxu1 }
 0x136   : > { %v1430_v29 = vmax.f32 %v1414_v11, %v1422_v23  ;;  %v1423_v34 = vmax.f32 %v1200_v49, %v1364_v27  ;;  %v1432_v38 = vmax.f32 %v1416_v25, %v1424_v26  ;;  %v1425_v39 = vmax.f32 %v1241_v50, %v1405_v35 }
 0x137   : > { %v1366_v40 = vpop.f32.mrf.mxu0  ;;  %v1407_v30 = vpop.f32.mrf.mxu1 }
 0x138   : > { %v1431_v15 = vmax.f32 %v1415_v28, %v1423_v34  ;;  %v1433_v41 = vmax.f32 %v1417_v37, %v1425_v39  ;;  %v1443_v43 = vadd.f32 %v1437_v6, %v1430_v29  ;;  %v1445_v44 = vadd.f32 %v1437_v6, %v1432_v38 }
 0x139   : > { %v1367_v42 = vpop.f32.mrf.mxu0  ;;  %v1408_v31 = vpop.f32.mrf.mxu1 }
 0x13a   : > { %v1444_v16 = vadd.f32 %v1437_v6, %v1431_v15  ;;  %v1446_v45 = vadd.f32 %v1437_v6, %v1433_v41 }
 0x13c   : > { %v1791_v46 = vpack.i.bf16 %v1444_v16, %v1443_v43  ;;  %v1796_v17 = vpack.i.bf16 %v1446_v45, %v1445_v44 }
 0x13e   : > { %1792 = vrot.lane.b32.xlu1 %v1791_v46, %s1830_s22  ;;  %1797 = vrot.lane.b32.xlu0 %v1796_v17, %s1830_s22 }
 0x1a4   : > { %v1783_v32 = vpop.permute.xlu0 %1782  ;;  %v1788_v47 = vpop.permute.xlu1 %1787 }
 0x1a5   : > { %v1785_v18 = vunpack.i.h.bf16 %v1783_v32  ;;  %v1784_v33 = vunpack.i.l.bf16 %v1783_v32  ;;  %v1789_v48 = vunpack.i.l.bf16 %v1788_v47  ;;  %v1790_v54 = vunpack.i.h.bf16 %v1788_v47 }
 0x1a7   : > { %v1472_v49 = vsel %vm1471_vm1, %v1784_v33, %v1785_v18  ;;  %v1473_v50 = vsel %vm1471_vm1, %v1785_v18, %v1789_v48  ;;  %v1474_v59 = vsel %vm1471_vm1, %v1789_v48, %v1790_v54 }
 0x1a8   : > { %v1487_v51 = vmax.f32 %v1439_v19, %v1472_v49  ;;  %v1488_v52 = vmax.f32 %v1440_v9, %v1473_v50  ;;  %v1489_v5 = vmax.f32 %v1441_v36, %v1474_v59 }
 0x1aa   : > { %v1801_v53 = vpack.i.bf16 %v1488_v52, %v1487_v51 }
 0x1ac   : > { %1802 = vrot.lane.b32.xlu1 %v1801_v53, %s1831_s23 }
 0x1b0   : > { %v1793_v55 = vpop.permute.xlu1 %1792  ;;  %v1798_v56 = vpop.permute.xlu0 %1797 }
 0x1b1   : > { %v1795_v57 = vunpack.i.h.bf16 %v1793_v55  ;;  %v1794_v58 = vunpack.i.l.bf16 %v1793_v55  ;;  %v1800_v60 = vunpack.i.h.bf16 %v1798_v56  ;;  %v1799_v61 = vunpack.i.l.bf16 %v1798_v56 }
 0x1b3   : > { %v1475_v62 = vsel %vm1471_vm1, %v1790_v54, %v1794_v58  ;;  %v1476_v63 = vsel %vm1471_vm1, %v1794_v58, %v1795_v57  ;;  %v1478_v0 = vsel %vm1471_vm1, %v1799_v61, %v1800_v60  ;;  %v1477_v2 = vsel %vm1471_vm1, %v1795_v57, %v1799_v61 }
 0x1b4   : > { %v1491_v3 = vmax.f32 %v1443_v43, %v1476_v63  ;;  %v1492_v4 = vmax.f32 %v1444_v16, %v1477_v2  ;;  %v1490_v6 = vmax.f32 %v1442_v20, %v1475_v62  ;;  %v1494_v7 = vmax.f32 %v1446_v45, %v1800_v60 }
 0x1b5   : > { %v1493_v13 = vmax.f32 %v1445_v44, %v1478_v0 }
 0x1b6   : > { %v1811_v1 = vpack.i.bf16 %v1492_v4, %v1491_v3  ;;  %v1806_v12 = vpack.i.bf16 %v1490_v6, %v1489_v5 }
 0x1b7   : > { %v1816_v8 = vpack.i.bf16 %v1494_v7, %v1493_v13 }
 0x1b8   : > { %1812 = vrot.lane.b32.xlu1 %v1811_v1, %s1831_s23  ;;  %1807 = vrot.lane.b32.xlu0 %v1806_v12, %s1831_s23 }
 0x1bc   : > { %1817 = vrot.lane.b32.xlu0 %v1816_v8, %s1831_s23 }
 0x21e   : > { %v1803_v14 = vpop.permute.xlu1 %1802 }
 0x21f   : > { %v1805_v19 = vunpack.i.h.bf16 %v1803_v14  ;;  %v1804_v9 = vunpack.i.l.bf16 %v1803_v14 }
 0x221   : > { %v1520_v21 = vsel %vm1519_vm2, %v1804_v9, %v1805_v19 }
 0x222   : > { %v1535_v27 = vmax.f32 %v1487_v51, %v1520_v21 }
 0x22a   : > { %v1813_v10 = vpop.permute.xlu1 %1812  ;;  %v1808_v22 = vpop.permute.xlu0 %1807 }
 0x22b   : > { %v1815_v11 = vunpack.i.h.bf16 %v1813_v10  ;;  %v1814_v36 = vunpack.i.l.bf16 %v1813_v10  ;;  %v1810_v20 = vunpack.i.h.bf16 %v1808_v22  ;;  %v1809_v23 = vunpack.i.l.bf16 %v1808_v22 }
 0x22d   : > { %v1523_v24 = vsel %vm1519_vm2, %v1810_v20, %v1814_v36  ;;  %v1521_v25 = vsel %vm1519_vm2, %v1805_v19, %v1809_v23  ;;  %v1522_v26 = vsel %vm1519_vm2, %v1809_v23, %v1810_v20  ;;  %v1524_v37 = vsel %vm1519_vm2, %v1814_v36, %v1815_v11 }
 0x22e   : > { %v1538_v28 = vmax.f32 %v1490_v6, %v1523_v24  ;;  %v1536_v29 = vmax.f32 %v1488_v52, %v1521_v25  ;;  %v1537_v34 = vmax.f32 %v1489_v5, %v1522_v26  ;;  %v1818_v35 = vpop.permute.xlu0 %1817  ;;  %v1539_v43 = vmax.f32 %v1491_v3, %v1524_v37 }
 0x22f   : > { %v1820_v38 = vunpack.i.h.bf16 %v1818_v35  ;;  %v1819_v39 = vunpack.i.l.bf16 %v1818_v35 }
 0x230   : > { %v1764_v40 = vpack.c.bf16 %v1536_v29, %v1535_v27  ;;  %v1765_v15 = vpack.c.bf16 %v1538_v28, %v1537_v34 }
 0x231   : > { %v1542_v30 = vmax.f32 %v1494_v7, %v1820_v38  ;;  %v1525_v41 = vsel %vm1519_vm2, %v1815_v11, %v1819_v39  ;;  %v1526_v42 = vsel %vm1519_vm2, %v1819_v39, %v1820_v38 }
 0x232   : > { %1575 = vst [vmem:[%s170_s27] sm:$0xff] %v1764_v40  ;;  %1576 = vst [vmem:[%s170_s27 + $0x8] sm:$0xff] %v1765_v15  ;;  %v1540_v16 = vmax.f32 %v1492_v4, %v1525_v41  ;;  %v1541_v31 = vmax.f32 %v1493_v13, %v1526_v42 }
 0x234   : > { %v1766_v44 = vpack.c.bf16 %v1540_v16, %v1539_v43  ;;  %v1767_v45 = vpack.c.bf16 %v1542_v30, %v1541_v31 }
 0x236   : > { %1577 = vst [vmem:[%s170_s27 + $0x10] sm:$0xff] %v1766_v44  ;;  %1581 = vst.msk [vmem:[%s170_s27 + $0x18] sm:$0xff] %vm1580_vm5, %v1767_v45 }
 0x237 PF: > { %s13_s12 = sadd.s32 1, %s1827_s12  }
 0x238   : > { %p10_p4 = scmp.ge.s32.totalorder %s13_s12, 4  }
 0x23a   :  { %12 = sbr.rel (!%p10_p4) target bundleno = 1 (0x1), region = 62 }

// kernel: critic_forward.3
= control target key start
LH: loop header
LB: loop body
LE: loop exit
PB: predicated region body
PF: predicated region fallthrough
CT: control target
= control target key end

     0   :  { %s4672_s29 = smov 0   ;;  %s5422_s0 = inlined_call_operand.vmem [shape: bf16[2,128,256], index: 0, kind: input, shape index: {}]   ;;  %s5423_s1 = inlined_call_operand.vmem [shape: bf16[16,128], index: 1, kind: input, shape index: {}]   ;;  %s5424_s2 = inlined_call_operand.vmem [shape: f32[16,1], index: 2, kind: input, shape index: {}]   ;;  %s5425_s3 = inlined_call_operand.vmem [shape: bf16[512,16], index: 3, kind: input, shape index: {}]   ;;  %s5426_s4 = inlined_call_operand.vmem [shape: f32[32,1], index: 4, kind: input, shape index: {}]   ;;  %s5427_s5 = inlined_call_operand.vmem [shape: f32[16,55,16], index: 5, kind: input, shape index: {}]   ;;  %s5428_s6 = inlined_call_operand.vmem [shape: f32[32,1], index: 6, kind: input, shape index: {}]   ;;  %s5429_s7 = inlined_call_operand.<no memory space> [shape: f32[1,1], index: 7, kind: input, shape index: {}]   ;;  %s5430_s8 = inlined_call_operand.vmem [shape: f32[2,1,1], index: 8, kind: output, shape index: {}]  }
   0x1   :  { %v13_v0 = vstv %s5429_s7 }
   0x2   :  { %14 = vst [vmem:[#allocation2] sm:$0x1] %v13_v0 }
   0x3 LB: > { %s3600_s30 = sadd.s32 4294967295, %s4618_s29   ;;  %p3604_p0 = scmp.ge.s32.totalorder %s4618_s29, 1  ;;  %s4618_s29 = sphi %s4672_s29, %s20_s29  }
   0x4   : > { %p264_p1 = scmp.lt.s32.totalorder %s4618_s29, 3 }
   0x6   : > { %p265_p2 = pnand %p3604_p0, %p264_p1 }
   0x7   : > { %p296_p3 = scmp.lt.s32.totalorder (!%p265_p2), %s3600_s30, 1  ;;  %s4621_s18 = smov (!%p265_p2), 64  }
   0x8   : > { %268 = sbr.rel (%p265_p2) target bundleno = 2707 (0xa93), region = 52  ;;  %s4622_s19 = smov (!%p265_p2), 120  }
   0x9   : > { %s4623_s24 = smov (!%p265_p2), 127  }
   0xd   : > { %v4620_v1 = vmov 0   ;;  %v323_v2 = vld [vmem:[%s5424_s2] sm:$0xff]  ;;  %s5432_s30 = smov (!%p296_p3, %s3600_s30), 1  ;;  %v324_v3 = vld [vmem:[%s5424_s2 + $0x8] sm:$0xff]  ;;  %vm523_vm0 = vcmask 130048   ;;  %vm676_vm1 = vcmask 1046528  }
   0xe   : > { %443 = vmatprep.mubr.bf16.mxu0 %v4620_v1  ;;  %4528 = vset.pattern.permute.xlu0 %v4620_v1  ;;  %s3875_s12 = sshll.u32 %s5432_s30, 7  ;;  %v4563_v20 = vld [vmem:[%s5423_s1] sm:$0xff]   ;;  %v4566_v55 = vld [vmem:[%s5425_s3 + $0x8] sm:$0xff]   ;;  %v4568_v57 = vld [vmem:[%s5425_s3 + $0x10] sm:$0xff]   ;;  %vm663_vm2 = vcmask 449536   ;;  %vm3535_vm7 = vcmask 7168  }
   0xf   : > { %478 = vperm.xlu0 %4528, %v323_v2   ;;  %s300_s15 = scalar_lea.vmem %s5422_s0, %s3875_s12  ;;  %v4564_v43 = vld [vmem:[%s5425_s3] sm:$0xff]   ;;  %v4567_v56 = vld [vmem:[%s5425_s3 + $0x28] sm:$0xff]   ;;  %v3658_v58 = vld [vmem:[%s5427_s5 + $0x98] sm:$0xff]  ;;  %s303_s12 = scalar_lea.vmem %s5430_s8, %s5432_s30  ;;  %vm3551_vm8 = vcmask 0  }
  0x10   : > { %v4539_v4 = vld [vmem:[%s300_s15 + $0x74] ss:$8 sps:$4 sm:$0xff]   ;;  %v4541_v5 = vld [vmem:[%s300_s15 + $0x70] ss:$8 sps:$4 sm:$0xff]   ;;  %v4542_v6 = vld [vmem:[%s300_s15 + $0x64] ss:$8 sps:$4 sm:$0xff]   ;;  %4102 = vmatprep.mubr.msk.bf16.mxu1 %vm523_vm0, %v4564_v43 }
  0x11   : > { %411 = vmatprep.subr.bf16.mxu0 %v4539_v4  ;;  %v4544_v7 = vld [vmem:[%s300_s15 + $0x60] ss:$8 sps:$4 sm:$0xff]   ;;  %v4545_v8 = vld [vmem:[%s300_s15 + $0x54] ss:$8 sps:$4 sm:$0xff]   ;;  %v4547_v9 = vld [vmem:[%s300_s15 + $0x50] ss:$8 sps:$4 sm:$0xff]  }
  0x12   : > { %412 = vmatpush1.bf16.msra.mxu0 %v4541_v5  ;;  %v4548_v10 = vld [vmem:[%s300_s15 + $0x44] ss:$8 sps:$4 sm:$0xff]   ;;  %v4550_v11 = vld [vmem:[%s300_s15 + $0x40] ss:$8 sps:$4 sm:$0xff]   ;;  %v4551_v12 = vld [vmem:[%s300_s15 + $0x34] ss:$8 sps:$4 sm:$0xff]  }
  0x13   : > { %483 = vperm.xlu0 %4528, %v324_v3   ;;  %413 = vmatprep.subr.bf16.mxu0 %v4542_v6  ;;  %v4553_v13 = vld [vmem:[%s300_s15 + $0x30] ss:$8 sps:$4 sm:$0xff]   ;;  %v4554_v14 = vld [vmem:[%s300_s15 + $0x24] ss:$8 sps:$4 sm:$0xff]   ;;  %v4556_v15 = vld [vmem:[%s300_s15 + $0x20] ss:$8 sps:$4 sm:$0xff]  }
  0x14   : > { %v4557_v16 = vld [vmem:[%s300_s15 + $0x14] ss:$8 sps:$4 sm:$0xff]   ;;  %v4559_v17 = vld [vmem:[%s300_s15 + $0x10] ss:$8 sps:$4 sm:$0xff]   ;;  %v4560_v18 = vld [vmem:[%s300_s15 + $0x4] ss:$8 sps:$4 sm:$0xff]  }
  0x15   : > { %v4562_v19 = vld [vmem:[%s300_s15] ss:$8 sps:$4 sm:$0xff]   ;;  %v3657_v59 = vld [vmem:[%s5427_s5 + $0x90] sm:$0xff]  ;;  %v4569_v61 = vld [vmem:[%s5425_s3 + $0x18] sm:$0xff]  }
  0x16   : > { %414 = vmatpush1.bf16.msra.mxu0 %v4544_v7  ;;  %v4565_v44 = vld [vmem:[%s5425_s3 + $0x20] sm:$0xff]   ;;  %v3656_v60 = vld [vmem:[%s5427_s5 + $0x88] sm:$0xff]  ;;  %v3654_v63 = vld [vmem:[%s5427_s5 + $0x78] sm:$0xff] }
  0x17   : > { %415 = vmatprep.subr.bf16.mxu0 %v4545_v8  ;;  %v3659_v54 = vld [vmem:[%s5427_s5 + $0xa0] sm:$0x7f]  ;;  %v3653_v0 = vld [vmem:[%s5427_s5 + $0x70] sm:$0xff]  ;;  %v3638_v1 = vld [vmem:[%s5427_s5 + $0x68] sm:$0x7f] }
  0x18   : > { %v3655_v62 = vld [vmem:[%s5427_s5 + $0x80] sm:$0xff]  ;;  %v3636_v3 = vld [vmem:[%s5427_s5 + $0x58] sm:$0xff]  ;;  %v3635_v4 = vld [vmem:[%s5427_s5 + $0x50] sm:$0xff] }
  0x19   : > { %v3637_v2 = vld [vmem:[%s5427_s5 + $0x60] sm:$0xff]  ;;  %v3634_v5 = vld [vmem:[%s5427_s5 + $0x48] sm:$0xff]  ;;  %v3632_v7 = vld [vmem:[%s5427_s5 + $0x38] sm:$0xff] }
  0x1a   : > { %416 = vmatpush1.bf16.msra.mxu0 %v4547_v9  ;;  %v3633_v6 = vld [vmem:[%s5427_s5 + $0x40] sm:$0xff]  ;;  %v585_v8 = vld [vmem:[%s5427_s5 + $0x30] sm:$0x7f] }
  0x1b   : > { %417 = vmatprep.subr.bf16.mxu0 %v4548_v10  ;;  %v3670_v43 = vld [vmem:[%s5427_s5 + $0xb0] sm:$0xff] }
  0x1e   : > { %418 = vmatpush1.bf16.msra.mxu0 %v4550_v11 }
  0x1f   : > { %419 = vmatprep.subr.bf16.mxu0 %v4551_v12 }
  0x22   : > { %420 = vmatpush1.bf16.msra.mxu0 %v4553_v13 }
  0x23   : > { %421 = vmatprep.subr.bf16.mxu0 %v4554_v14 }
  0x26   : > { %422 = vmatpush1.bf16.msra.mxu0 %v4556_v15 }
  0x27   : > { %423 = vmatprep.subr.bf16.mxu0 %v4557_v16 }
  0x2a   : > { %424 = vmatpush1.bf16.msra.mxu0 %v4559_v17  ;;  %v3691_v17 = vld [vmem:[%s5427_s5 + $0x110] sm:$0x7f] }
  0x2b   : > { %425 = vmatprep.subr.bf16.mxu0 %v4560_v18 }
  0x2e   : > { %426 = vmatpush1.bf16.msra.mxu0 %v4562_v19  ;;  %v4570_v19 = vld [vmem:[%s5425_s3 + $0x40] sm:$0xff]  }
  0x31   : > { %444 = vmatmul.mubr.bf16.vlgmr.msra.gmra.mxu0 %v4563_v20 }
  0x32   : > { %4154 = vmatprep.mubr.msk.bf16.mxu0 %vm523_vm0, %v4565_v44  ;;  %v3669_v44 = vld [vmem:[%s5427_s5 + $0xa8] sm:$0xff] }
  0x8a   : > { %v479_v25 = vpop.permute.xlu0 %478 }
  0x8e   : > { %v484_v26 = vpop.permute.xlu0 %483 }
  0xf1   : > { %v445_v21 = vpop.f32.mrf.mxu0 }
  0xf2   : > { %456 = vrot.lane.b32.xlu1 %v445_v21, %s4621_s18 }
  0xf3   : > { %v447_v22 = vpop.f32.mrf.mxu0 }
  0xf4   : > { %466 = vrot.lane.b32.xlu0 %v447_v22, %s4621_s18 }
  0xf5   : > { %v449_v23 = vpop.f32.mrf.mxu0 }
  0xf6   : > { %458 = vrot.lane.b32.xlu1 %v449_v23, %s4621_s18 }
  0xf7   : > { %v451_v24 = vpop.f32.mrf.mxu0 }
  0xfa   : > { %468 = vrot.lane.b32.xlu1 %v451_v24, %s4621_s18 }
 0x164   : > { %v457_v27 = vpop.permute.xlu1 %456 }
 0x165   : > { %v462_v31 = vmax.f32 %v445_v21, %v457_v27  ;;  %v4571_v21 = vld [vmem:[%s5425_s3 + $0x48] sm:$0xff]   ;;  %v3689_v27 = vld [vmem:[%s5427_s5 + $0x100] sm:$0xff] }
 0x166   : > { %v467_v28 = vpop.permute.xlu0 %466 }
 0x167   : > { %v472_v30 = vmax.f32 %v447_v22, %v467_v28  ;;  %v582_v28 = vld [vmem:[%s5427_s5 + $0x18] sm:$0xff] }
 0x168   : > { %v459_v29 = vpop.permute.xlu1 %458 }
 0x169   : > { %v474_v33 = vmax.f32 %v462_v31, %v472_v30  ;;  %v463_v34 = vmax.f32 %v449_v23, %v459_v29  ;;  %v3688_v29 = vld [vmem:[%s5427_s5 + $0xf8] sm:$0xff]  ;;  %v581_v30 = vld [vmem:[%s5427_s5 + $0x10] sm:$0xff] }
 0x16a   : > { %v3687_v31 = vld [vmem:[%s5427_s5 + $0xf0] sm:$0xff] }
 0x16b   : > { %v486_v37 = vadd.f32 %v479_v25, %v474_v33  ;;  %v3690_v25 = vld [vmem:[%s5427_s5 + $0x108] sm:$0xff] }
 0x16c   : > { %v469_v32 = vpop.permute.xlu1 %468  ;;  %v3686_v33 = vld [vmem:[%s5427_s5 + $0xe8] sm:$0xff] }
 0x16d   : > { %v473_v35 = vmax.f32 %v451_v24, %v469_v32  ;;  %v584_v24 = vld [vmem:[%s5427_s5 + $0x28] sm:$0xff] }
 0x16e   : > { %v580_v32 = vld [vmem:[%s5427_s5 + $0x8] sm:$0xff] }
 0x16f   : > { %v475_v36 = vmax.f32 %v463_v34, %v473_v35  ;;  %v579_v34 = vld [vmem:[%s5427_s5] sm:$0xff] }
 0x170   : > { %v3685_v35 = vld [vmem:[%s5427_s5 + $0xe0] sm:$0xff] }
 0x171   : > { %v487_v38 = vadd.f32 %v484_v26, %v475_v36  ;;  %v583_v26 = vld [vmem:[%s5427_s5 + $0x20] sm:$0xff]  ;;  %v3675_v36 = vld [vmem:[%s5427_s5 + $0xd8] sm:$0x7f] }
 0x173   : > { %v4529_v39 = vpack.i.bf16 %v487_v38, %v486_v37 }
 0x175   : > { %4530 = vrot.lane.b32.xlu0 %v4529_v39, %s4622_s19  ;;  %v3674_v39 = vld [vmem:[%s5427_s5 + $0xd0] sm:$0xff] }
 0x1e7   : > { %v4531_v40 = vpop.permute.xlu0 %4530 }
 0x1e8   : > { %v4533_v41 = vunpack.i.h.bf16 %v4531_v40  ;;  %v4532_v42 = vunpack.i.l.bf16 %v4531_v40  ;;  %v3673_v40 = vld [vmem:[%s5427_s5 + $0xc8] sm:$0xff] }
 0x1ea   : > { %v497_v45 = vmax.f32 %v487_v38, %v4533_v41  ;;  %v496_v46 = vmax.f32 %v486_v37, %v4532_v42  ;;  %v4572_v37 = vld [vmem:[%s5425_s3 + $0x30] sm:$0xff]   ;;  %v4573_v38 = vld [vmem:[%s5425_s3 + $0x38] sm:$0xff]   ;;  %v3672_v41 = vld [vmem:[%s5427_s5 + $0xc0] sm:$0xff] }
 0x1eb   : > { %v3671_v42 = vld [vmem:[%s5427_s5 + $0xb8] sm:$0xff] }
 0x1ec   : > { %v4534_v47 = vpack.i.bf16 %v497_v45, %v496_v46 }
 0x1ee   : > { %4535 = vrot.lane.b32.xlu1 %v4534_v47, %s4623_s24 }
 0x260   : > { %v4536_v48 = vpop.permute.xlu1 %4535 }
 0x261   : > { %v4538_v49 = vunpack.i.h.bf16 %v4536_v48  ;;  %v4537_v50 = vunpack.i.l.bf16 %v4536_v48 }
 0x263   : > { %v507_v51 = vmax.f32 %v497_v45, %v4538_v49  ;;  %v506_v52 = vmax.f32 %v496_v46, %v4537_v50 }
 0x265   : > { %v4703_v53 = vpack.c.bf16 %v507_v51, %v506_v52 }
 0x267   : > { %4100 = vmatprep.subr.bf16.mxu1 %v4703_v53  ;;  %4152 = vmatprep.subr.bf16.mxu0 %v4703_v53 }
 0x268   : > { %4101 = vmatpush3.bf16.msra.mxu1 %v4703_v53  ;;  %4153 = vmatpush3.bf16.msra.mxu0 %v4703_v53 }
 0x269   : > { %4106 = vmatprep.subr.bf16.mxu1 %v4703_v53  ;;  %4158 = vmatprep.subr.msk.mxu0 %vm676_vm1, %v3659_v54 }
 0x26b   : > { %4103 = vmatmul.mubr.msk.bf16.vlgmr.msra.gmra.mxu1 %vm523_vm0, %v4566_v55  ;;  %4155 = vmatmul.mubr.msk.bf16.vlgmr.msra.gmra.mxu0 %vm523_vm0, %v4567_v56  ;;  %v3723_v56 = vld [vmem:[%s5427_s5 + $0x180] sm:$0x7f] }
 0x26c   : > { %4107 = vmatpush3.bf16.msra.mxu1 %v4703_v53  ;;  %4159 = vmatpush3.msk.msra.mxu0 %vm676_vm1, %v3659_v54 }
 0x26d   : > { %4160 = vmatprep.subr.mxu0 %v3658_v58  ;;  %4108 = vmatprep.mubr.msk.bf16.mxu1 %vm523_vm0, %v4568_v57  ;;  %v4574_v57 = vld [vmem:[%s5425_s3 + $0x60] sm:$0xff]  }
 0x26e   : > { %4161 = vmatpush3.msra.mxu0 %v3658_v58  ;;  %4112 = vmatprep.subr.msk.mxu1 %vm676_vm1, %v3638_v1 }
 0x26f   : > { %4162 = vmatprep.subr.mxu0 %v3657_v59 }
 0x270   : > { %4163 = vmatpush3.msra.mxu0 %v3657_v59  ;;  %v4575_v59 = vld [vmem:[%s5425_s3 + $0x68] sm:$0xff]  }
 0x271   : > { %4164 = vmatprep.subr.mxu0 %v3656_v60 }
 0x272   : > { %4165 = vmatpush3.msra.mxu0 %v3656_v60 }
 0x273   : > { %4109 = vmatmul.mubr.msk.bf16.vlgmr.msra.gmra.mxu1 %vm523_vm0, %v4569_v61  ;;  %4166 = vmatprep.subr.mxu0 %v3655_v62  ;;  %v3722_v61 = vld [vmem:[%s5427_s5 + $0x178] sm:$0xff] }
 0x274   : > { %4167 = vmatpush3.msra.mxu0 %v3655_v62  ;;  %4113 = vmatpush3.msk.msra.mxu1 %vm676_vm1, %v3638_v1 }
 0x275   : > { %4168 = vmatprep.subr.mxu0 %v3654_v63  ;;  %4114 = vmatprep.subr.mxu1 %v3637_v2 }
 0x276   : > { %4169 = vmatpush3.msra.mxu0 %v3654_v63  ;;  %4115 = vmatpush3.msra.mxu1 %v3637_v2 }
 0x277   : > { %4170 = vmatprep.subr.mxu0 %v3653_v0  ;;  %4116 = vmatprep.subr.mxu1 %v3636_v3 }
 0x278   : > { %4171 = vmatpush3.msra.mxu0 %v3653_v0  ;;  %4117 = vmatpush3.msra.mxu1 %v3636_v3  ;;  %v3721_v0 = vld [vmem:[%s5427_s5 + $0x170] sm:$0xff]  ;;  %v3720_v3 = vld [vmem:[%s5427_s5 + $0x168] sm:$0xff] }
 0x279   : > { %4204 = vmatprep.subr.bf16.mxu0 %v4703_v53  ;;  %4118 = vmatprep.subr.mxu1 %v3635_v4 }
 0x27a   : > { %4119 = vmatpush3.msra.mxu1 %v3635_v4 }
 0x27b   : > { %4120 = vmatprep.subr.mxu1 %v3634_v5 }
 0x27c   : > { %4121 = vmatpush3.msra.mxu1 %v3634_v5 }
 0x27d   : > { %4122 = vmatprep.subr.mxu1 %v3633_v6 }
 0x27e   : > { %4123 = vmatpush3.msra.mxu1 %v3633_v6 }
 0x27f   : > { %4124 = vmatprep.subr.mxu1 %v3632_v7 }
 0x280   : > { %4125 = vmatpush3.msra.mxu1 %v3632_v7  ;;  %v3719_v7 = vld [vmem:[%s5427_s5 + $0x160] sm:$0xff] }
 0x281   : > { %4132 = vmatprep.subr.msk.mxu1 %vm676_vm1, %v585_v8 }
 0x32b   : > { %v4778_v9 = vpop.f32.mrf.mxu1  ;;  %v4156_v10 = vpop.f32.mrf.mxu0 }
 0x32d   : > { %v564_v11 = vpop.f32.mrf.mxu1  ;;  %v919_v12 = vpop.f32.mrf.mxu0 }
 0x32e   : > { %4172 = vmatprep.mubr.msk.f32.mxu0 %vm663_vm2, %v919_v12 }
 0x32f   : > { %v4781_v13 = vpop.f32.mrf.mxu1  ;;  %v4157_v14 = vpop.f32.mrf.mxu0 }
 0x331   : > { %v567_v15 = vpop.f32.mrf.mxu1  ;;  %v922_v16 = vpop.f32.mrf.mxu0 }
 0x332   : > { %4173 = vmatmul.mubr.msk.f32.vlgmr.msra.gmra.mxu0 %vm663_vm2, %v922_v16 }
 0x333   : > { %4205 = vmatpush3.bf16.msra.mxu0 %v4703_v53  ;;  %v4110_v18 = vpop.f32.mrf.mxu1  ;;  %4175 = vmatprep.mubr.msk.f32.mxu0 %vm663_vm2, %v4156_v10 }
 0x334   : > { %4210 = vmatprep.subr.msk.mxu0 %vm676_vm1, %v3691_v17 }
 0x335   : > { %v640_v20 = vpop.f32.mrf.mxu1 }
 0x336   : > { %4126 = vmatprep.mubr.msk.f32.mxu1 %vm663_vm2, %v640_v20  ;;  %4176 = vmatmul.mubr.msk.f32.gmra.mxu0 %vm663_vm2, %v4157_v14  ;;  %v3717_v14 = vld [vmem:[%s5427_s5 + $0x150] sm:$0xff] }
 0x337   : > { %v4111_v22 = vpop.f32.mrf.mxu1  ;;  %4206 = vmatprep.mubr.msk.bf16.mxu0 %vm523_vm0, %v4570_v19  ;;  %v3707_v19 = vld [vmem:[%s5427_s5 + $0x148] sm:$0x7f]  ;;  %v4576_v20 = vld [vmem:[%s5425_s3 + $0x50] sm:$0xff]  }
 0x339   : > { %v643_v23 = vpop.f32.mrf.mxu1 }
 0x33a   : > { %4127 = vmatmul.mubr.msk.f32.vlgmr.msra.gmra.mxu1 %vm663_vm2, %v643_v23  ;;  %4207 = vmatmul.mubr.msk.bf16.vlgmr.msra.gmra.mxu0 %vm523_vm0, %v4571_v21  ;;  %v4577_v21 = vld [vmem:[%s5425_s3 + $0x58] sm:$0xff]  }
 0x33b   : > { %4133 = vmatpush3.msk.msra.mxu1 %vm676_vm1, %v585_v8  ;;  %4211 = vmatpush3.msk.msra.mxu0 %vm676_vm1, %v3691_v17  ;;  %v3705_v23 = vld [vmem:[%s5427_s5 + $0x138] sm:$0xff] }
 0x33c   : > { %4129 = vmatprep.mubr.msk.f32.mxu1 %vm663_vm2, %v4110_v18  ;;  %4134 = vmatprep.subr.mxu1 %v584_v24 }
 0x33d   : > { %4212 = vmatprep.subr.mxu0 %v3690_v25  ;;  %4135 = vmatpush3.msra.mxu1 %v584_v24  ;;  %v3704_v24 = vld [vmem:[%s5427_s5 + $0x130] sm:$0xff] }
 0x33e   : > { %4213 = vmatpush3.msra.mxu0 %v3690_v25  ;;  %4136 = vmatprep.subr.mxu1 %v583_v26  ;;  %v3703_v25 = vld [vmem:[%s5427_s5 + $0x128] sm:$0xff] }
 0x33f   : > { %4214 = vmatprep.subr.mxu0 %v3689_v27  ;;  %4130 = vmatmul.mubr.msk.f32.gmra.mxu1 %vm663_vm2, %v4111_v22  ;;  %v3706_v22 = vld [vmem:[%s5427_s5 + $0x140] sm:$0xff] }
 0x340   : > { %4137 = vmatpush3.msra.mxu1 %v583_v26  ;;  %4215 = vmatpush3.msra.mxu0 %v3689_v27  ;;  %v3702_v26 = vld [vmem:[%s5427_s5 + $0x120] sm:$0xff]  ;;  %v3701_v27 = vld [vmem:[%s5427_s5 + $0x118] sm:$0xff] }
 0x341   : > { %4138 = vmatprep.subr.mxu1 %v582_v28  ;;  %4146 = vmatprep.mubr.msk.f32.mxu1 %vm663_vm2, %v564_v11  ;;  %v3718_v11 = vld [vmem:[%s5427_s5 + $0x158] sm:$0xff] }
 0x342   : > { %4216 = vmatprep.subr.mxu0 %v3688_v29  ;;  %4139 = vmatpush3.msra.mxu1 %v582_v28 }
 0x343   : > { %4217 = vmatpush3.msra.mxu0 %v3688_v29  ;;  %4140 = vmatprep.subr.mxu1 %v581_v30 }
 0x344   : > { %4218 = vmatprep.subr.mxu0 %v3687_v31  ;;  %4141 = vmatpush3.msra.mxu1 %v581_v30 }
 0x345   : > { %4219 = vmatpush3.msra.mxu0 %v3687_v31  ;;  %4142 = vmatprep.subr.mxu1 %v580_v32 }
 0x346   : > { %4220 = vmatprep.subr.mxu0 %v3686_v33  ;;  %4143 = vmatpush3.msra.mxu1 %v580_v32 }
 0x347   : > { %4221 = vmatpush3.msra.mxu0 %v3686_v33  ;;  %4144 = vmatprep.subr.mxu1 %v579_v34 }
 0x348   : > { %4222 = vmatprep.subr.mxu0 %v3685_v35  ;;  %4145 = vmatpush3.msra.mxu1 %v579_v34 }
 0x349   : > { %4223 = vmatpush3.msra.mxu0 %v3685_v35  ;;  %4147 = vmatmul.mubr.msk.f32.vlgmr.msra.gmra.mxu1 %vm663_vm2, %v567_v15 }
 0x34a   : > { %4178 = vmatprep.subr.bf16.mxu1 %v4703_v53  ;;  %4256 = vmatprep.subr.bf16.mxu0 %v4703_v53 }
 0x34b   : > { %4149 = vmatprep.mubr.msk.f32.mxu1 %vm663_vm2, %v4778_v9  ;;  %4179 = vmatpush3.bf16.msra.mxu1 %v4703_v53 }
 0x34c   : > { %4184 = vmatprep.subr.msk.mxu1 %vm676_vm1, %v3675_v36 }
 0x34d   : > { %4150 = vmatmul.mubr.msk.f32.gmra.mxu1 %vm663_vm2, %v4781_v13 }
 0x34e   : > { %4180 = vmatprep.mubr.msk.bf16.mxu1 %vm523_vm0, %v4572_v37  ;;  %v4578_v37 = vld [vmem:[%s5425_s3 + $0x80] sm:$0xff]  }
 0x351   : > { %4181 = vmatmul.mubr.msk.bf16.vlgmr.msra.gmra.mxu1 %vm523_vm0, %v4573_v38  ;;  %v4579_v38 = vld [vmem:[%s5425_s3 + $0x88] sm:$0xff]  }
 0x352   : > { %4185 = vmatpush3.msk.msra.mxu1 %vm676_vm1, %v3675_v36  ;;  %v3755_v36 = vld [vmem:[%s5427_s5 + $0x1f0] sm:$0x7f] }
 0x353   : > { %4186 = vmatprep.subr.mxu1 %v3674_v39 }
 0x354   : > { %4187 = vmatpush3.msra.mxu1 %v3674_v39  ;;  %v3754_v39 = vld [vmem:[%s5427_s5 + $0x1e8] sm:$0xff] }
 0x355   : > { %4188 = vmatprep.subr.mxu1 %v3673_v40 }
 0x356   : > { %4189 = vmatpush3.msra.mxu1 %v3673_v40 }
 0x357   : > { %4190 = vmatprep.subr.mxu1 %v3672_v41 }
 0x358   : > { %4191 = vmatpush3.msra.mxu1 %v3672_v41 }
 0x359   : > { %4192 = vmatprep.subr.mxu1 %v3671_v42 }
 0x35a   : > { %4193 = vmatpush3.msra.mxu1 %v3671_v42  ;;  %v3753_v42 = vld [vmem:[%s5427_s5 + $0x1e0] sm:$0xff] }
 0x35b   : > { %4194 = vmatprep.subr.mxu1 %v3670_v43 }
 0x35c   : > { %4195 = vmatpush3.msra.mxu1 %v3670_v43 }
 0x35d   : > { %4196 = vmatprep.subr.mxu1 %v3669_v44 }
 0x35e   : > { %4197 = vmatpush3.msra.mxu1 %v3669_v44 }
 0x35f   : > { %4230 = vmatprep.subr.bf16.mxu1 %v4703_v53 }
 0x3f2   : > { %v4174_v45 = vpop.f32.mrf.mxu0 }
 0x3f4   : > { %v1023_v46 = vpop.f32.mrf.mxu0 }
 0x3f6   : > { %v4177_v47 = vpop.f32.mrf.mxu0 }
 0x3f8   : > { %v1033_v48 = vpop.f32.mrf.mxu0 }
 0x3fa   : > { %v4208_v49 = vpop.f32.mrf.mxu0  ;;  %v4128_v50 = vpop.f32.mrf.mxu1 }
 0x3fc   : > { %v1281_v51 = vpop.f32.mrf.mxu0  ;;  %v746_v54 = vpop.f32.mrf.mxu1 }
 0x3fd   : > { %4224 = vmatprep.mubr.msk.f32.mxu0 %vm663_vm2, %v1281_v51 }
 0x3fe   : > { %v4209_v52 = vpop.f32.mrf.mxu0 }
 0x3ff   : > { %v4131_v58 = vpop.f32.mrf.mxu1 }
 0x400   : > { %v1284_v55 = vpop.f32.mrf.mxu0 }
 0x401   : > { %4225 = vmatmul.mubr.msk.f32.vlgmr.msra.gmra.mxu0 %vm663_vm2, %v1284_v55  ;;  %v756_v60 = vpop.f32.mrf.mxu1 }
 0x402   : > { %4257 = vmatpush3.bf16.msra.mxu0 %v4703_v53  ;;  %4227 = vmatprep.mubr.msk.f32.mxu0 %vm663_vm2, %v4208_v49  ;;  %v3751_v49 = vld [vmem:[%s5427_s5 + $0x1d0] sm:$0xff] }
 0x403   : > { %4262 = vmatprep.subr.msk.mxu0 %vm676_vm1, %v3723_v56 }
 0x405   : > { %4228 = vmatmul.mubr.msk.f32.gmra.mxu0 %vm663_vm2, %v4209_v52 }
 0x406   : > { %4258 = vmatprep.mubr.msk.bf16.mxu0 %vm523_vm0, %v4574_v57  ;;  %v3749_v57 = vld [vmem:[%s5427_s5 + $0x1c0] sm:$0xff] }
 0x409   : > { %v4148_v62 = vpop.f32.mrf.mxu1  ;;  %4259 = vmatmul.mubr.msk.bf16.vlgmr.msra.gmra.mxu0 %vm523_vm0, %v4575_v59 }
 0x40a   : > { %v852_v63 = vadd.f32 %v4148_v62, %v4128_v50  ;;  %4263 = vmatpush3.msk.msra.mxu0 %vm676_vm1, %v3723_v56  ;;  %v3739_v62 = vld [vmem:[%s5427_s5 + $0x1b8] sm:$0x7f] }
 0x40b   : > { %v846_v1 = vpop.f32.mrf.mxu1  ;;  %4264 = vmatprep.subr.mxu0 %v3722_v61 }
 0x40c   : > { %v847_v2 = vadd.f32 %v846_v1, %v746_v54  ;;  %4265 = vmatpush3.msra.mxu0 %v3722_v61  ;;  %v4909_v4 = vadd.f32 %v4174_v45, %v852_v63  ;;  %v3752_v45 = vld [vmem:[%s5427_s5 + $0x1d8] sm:$0xff]  ;;  %v3750_v54 = vld [vmem:[%s5427_s5 + $0x1c8] sm:$0xff]  ;;  %v4580_v63 = vld [vmem:[%s5425_s3 + $0x70] sm:$0xff]  }
 0x40d   : > { %v4151_v5 = vpop.f32.mrf.mxu1  ;;  %4266 = vmatprep.subr.mxu0 %v3721_v0  ;;  %v3738_v1 = vld [vmem:[%s5427_s5 + $0x1b0] sm:$0xff] }
 0x40e   : > { %v862_v6 = vadd.f32 %v4151_v5, %v4131_v58  ;;  %4267 = vmatpush3.msra.mxu0 %v3721_v0  ;;  %v4914_v8 = vadd.f32 %v1023_v46, %v847_v2  ;;  %v4581_v0 = vld [vmem:[%s5425_s3 + $0x78] sm:$0xff]   ;;  %v3737_v2 = vld [vmem:[%s5427_s5 + $0x1a8] sm:$0xff]  ;;  %v3734_v5 = vld [vmem:[%s5427_s5 + $0x190] sm:$0xff] }
 0x40f   : > { %v856_v9 = vpop.f32.mrf.mxu1  ;;  %4268 = vmatprep.subr.mxu0 %v3720_v3 }
 0x410   : > { %v857_v10 = vadd.f32 %v856_v9, %v756_v60  ;;  %4269 = vmatpush3.msra.mxu0 %v3720_v3  ;;  %v4919_v12 = vadd.f32 %v4177_v47, %v862_v6  ;;  %v3736_v3 = vld [vmem:[%s5427_s5 + $0x1a0] sm:$0xff]  ;;  %v3733_v6 = vld [vmem:[%s5427_s5 + $0x188] sm:$0xff] }
 0x411   : > { %v4182_v13 = vpop.f32.mrf.mxu1  ;;  %4270 = vmatprep.subr.mxu0 %v3719_v7 }
 0x412   : > { %4271 = vmatpush3.msra.mxu0 %v3719_v7  ;;  %v4924_v15 = vadd.f32 %v1033_v48, %v857_v10 }
 0x413   : > { %v1100_v16 = vpop.f32.mrf.mxu1  ;;  %4272 = vmatprep.subr.mxu0 %v3718_v11 }
 0x414   : > { %4198 = vmatprep.mubr.msk.f32.mxu1 %vm663_vm2, %v1100_v16  ;;  %4273 = vmatpush3.msra.mxu0 %v3718_v11  ;;  %v4582_v16 = vld [vmem:[%s5425_s3 + $0xa0] sm:$0xff]  }
 0x415   : > { %v4183_v17 = vpop.f32.mrf.mxu1  ;;  %4274 = vmatprep.subr.mxu0 %v3717_v14 }
 0x416   : > { %4275 = vmatpush3.msra.mxu0 %v3717_v14 }
 0x417   : > { %v1103_v18 = vpop.f32.mrf.mxu1  ;;  %4308 = vmatprep.subr.bf16.mxu0 %v4703_v53 }
 0x418   : > { %4199 = vmatmul.mubr.msk.f32.vlgmr.msra.gmra.mxu1 %vm663_vm2, %v1103_v18  ;;  %v3786_v18 = vld [vmem:[%s5427_s5 + $0x258] sm:$0xff] }
 0x419   : > { %4231 = vmatpush3.bf16.msra.mxu1 %v4703_v53  ;;  %4201 = vmatprep.mubr.msk.f32.mxu1 %vm663_vm2, %v4182_v13 }
 0x41a   : > { %4236 = vmatprep.subr.msk.mxu1 %vm676_vm1, %v3707_v19 }
 0x41c   : > { %4202 = vmatmul.mubr.msk.f32.gmra.mxu1 %vm663_vm2, %v4183_v17  ;;  %v4583_v17 = vld [vmem:[%s5425_s3 + $0xa8] sm:$0xff]  }
 0x41d   : > { %4232 = vmatprep.mubr.msk.bf16.mxu1 %vm523_vm0, %v4576_v20 }
 0x420   : > { %4233 = vmatmul.mubr.msk.bf16.vlgmr.msra.gmra.mxu1 %vm523_vm0, %v4577_v21  ;;  %v3785_v21 = vld [vmem:[%s5427_s5 + $0x250] sm:$0xff] }
 0x421   : > { %4237 = vmatpush3.msk.msra.mxu1 %vm676_vm1, %v3707_v19 }
 0x422   : > { %4238 = vmatprep.subr.mxu1 %v3706_v22 }
 0x423   : > { %4239 = vmatpush3.msra.mxu1 %v3706_v22 }
 0x424   : > { %4240 = vmatprep.subr.mxu1 %v3705_v23 }
 0x425   : > { %4241 = vmatpush3.msra.mxu1 %v3705_v23 }
 0x426   : > { %4242 = vmatprep.subr.mxu1 %v3704_v24 }
 0x427   : > { %4243 = vmatpush3.msra.mxu1 %v3704_v24  ;;  %v3784_v24 = vld [vmem:[%s5427_s5 + $0x248] sm:$0xff] }
 0x428   : > { %4244 = vmatprep.subr.mxu1 %v3703_v25 }
 0x429   : > { %4245 = vmatpush3.msra.mxu1 %v3703_v25 }
 0x42a   : > { %4246 = vmatprep.subr.mxu1 %v3702_v26 }
 0x42b   : > { %4247 = vmatpush3.msra.mxu1 %v3702_v26 }
 0x42c   : > { %4248 = vmatprep.subr.mxu1 %v3701_v27 }
 0x42d   : > { %4249 = vmatpush3.msra.mxu1 %v3701_v27 }
 0x42e   : > { %4282 = vmatprep.subr.bf16.mxu1 %v4703_v53 }
 0x4c1   : > { %v4226_v28 = vpop.f32.mrf.mxu0 }
 0x4c3   : > { %v1385_v29 = vpop.f32.mrf.mxu0 }
 0x4c5   : > { %v4229_v30 = vpop.f32.mrf.mxu0 }
 0x4c7   : > { %v1395_v31 = vpop.f32.mrf.mxu0 }
 0x4c9   : > { %v4260_v32 = vpop.f32.mrf.mxu0 }
 0x4cb   : > { %v1643_v33 = vpop.f32.mrf.mxu0 }
 0x4cc   : > { %4276 = vmatprep.mubr.msk.f32.mxu0 %vm663_vm2, %v1643_v33 }
 0x4cd   : > { %v4261_v34 = vpop.f32.mrf.mxu0 }
 0x4cf   : > { %v1646_v35 = vpop.f32.mrf.mxu0 }
 0x4d0   : > { %4277 = vmatmul.mubr.msk.f32.vlgmr.msra.gmra.mxu0 %vm663_vm2, %v1646_v35  ;;  %v3781_v35 = vld [vmem:[%s5427_s5 + $0x230] sm:$0xff] }
 0x4d1   : > { %4309 = vmatpush3.bf16.msra.mxu0 %v4703_v53  ;;  %4279 = vmatprep.mubr.msk.f32.mxu0 %vm663_vm2, %v4260_v32  ;;  %v3782_v32 = vld [vmem:[%s5427_s5 + $0x238] sm:$0xff] }
 0x4d2   : > { %4314 = vmatprep.subr.msk.mxu0 %vm676_vm1, %v3755_v36 }
 0x4d4   : > { %4280 = vmatmul.mubr.msk.f32.gmra.mxu0 %vm663_vm2, %v4261_v34 }
 0x4d5   : > { %4310 = vmatprep.mubr.msk.bf16.mxu0 %vm523_vm0, %v4578_v37 }
 0x4d8   : > { %v4200_v40 = vpop.f32.mrf.mxu1  ;;  %4311 = vmatmul.mubr.msk.bf16.vlgmr.msra.gmra.mxu0 %vm523_vm0, %v4579_v38 }
 0x4d9   : > { %v1224_v41 = vadd.f32 %v4200_v40, %v4909_v4  ;;  %4315 = vmatpush3.msk.msra.mxu0 %vm676_vm1, %v3755_v36  ;;  %v3735_v4 = vld [vmem:[%s5427_s5 + $0x198] sm:$0xff]  ;;  %v3771_v40 = vld [vmem:[%s5427_s5 + $0x228] sm:$0x7f] }
 0x4da   : > { %v1204_v43 = vpop.f32.mrf.mxu1  ;;  %4316 = vmatprep.subr.mxu0 %v3754_v39 }
 0x4db   : > { %v1223_v44 = vadd.f32 %v1204_v43, %v4914_v8  ;;  %4317 = vmatpush3.msra.mxu0 %v3754_v39  ;;  %v4993_v46 = vadd.f32 %v4226_v28, %v1224_v41  ;;  %v3783_v28 = vld [vmem:[%s5427_s5 + $0x240] sm:$0xff]  ;;  %v4584_v41 = vld [vmem:[%s5425_s3 + $0x90] sm:$0xff]  }
 0x4dc   : > { %v4203_v47 = vpop.f32.mrf.mxu1  ;;  %4318 = vmatprep.subr.mxu0 %v3753_v42  ;;  %v3770_v43 = vld [vmem:[%s5427_s5 + $0x220] sm:$0xff] }
 0x4dd   : > { %v1226_v48 = vadd.f32 %v4203_v47, %v4919_v12  ;;  %4319 = vmatpush3.msra.mxu0 %v3753_v42  ;;  %v4999_v50 = vadd.f32 %v1385_v29, %v1223_v44  ;;  %v4585_v42 = vld [vmem:[%s5425_s3 + $0x98] sm:$0xff]   ;;  %v3766_v47 = vld [vmem:[%s5427_s5 + $0x200] sm:$0xff] }
 0x4de   : > { %v1214_v51 = vpop.f32.mrf.mxu1  ;;  %4320 = vmatprep.subr.mxu0 %v3752_v45  ;;  %v3769_v44 = vld [vmem:[%s5427_s5 + $0x218] sm:$0xff] }
 0x4df   : > { %v1225_v52 = vadd.f32 %v1214_v51, %v4924_v15  ;;  %4321 = vmatpush3.msra.mxu0 %v3752_v45  ;;  %v5005_v55 = vadd.f32 %v4229_v30, %v1226_v48  ;;  %v3787_v15 = vld [vmem:[%s5427_s5 + $0x260] sm:$0x7f]  ;;  %v3768_v45 = vld [vmem:[%s5427_s5 + $0x210] sm:$0xff]  ;;  %v3765_v48 = vld [vmem:[%s5427_s5 + $0x1f8] sm:$0xff] }
 0x4e0   : > { %v4234_v56 = vpop.f32.mrf.mxu1  ;;  %4322 = vmatprep.subr.mxu0 %v3751_v49 }
 0x4e1   : > { %4323 = vmatpush3.msra.mxu0 %v3751_v49  ;;  %v5010_v58 = vadd.f32 %v1395_v31, %v1225_v52 }
 0x4e2   : > { %v1462_v59 = vpop.f32.mrf.mxu1  ;;  %4324 = vmatprep.subr.mxu0 %v3750_v54 }
 0x4e3   : > { %4250 = vmatprep.mubr.msk.f32.mxu1 %vm663_vm2, %v1462_v59  ;;  %4325 = vmatpush3.msra.mxu0 %v3750_v54  ;;  %v4586_v59 = vld [vmem:[%s5425_s3 + $0xc0] sm:$0xff]  }
 0x4e4   : > { %v4235_v60 = vpop.f32.mrf.mxu1  ;;  %4326 = vmatprep.subr.mxu0 %v3749_v57 }
 0x4e5   : > { %4327 = vmatpush3.msra.mxu0 %v3749_v57 }
 0x4e6   : > { %v1465_v61 = vpop.f32.mrf.mxu1  ;;  %4360 = vmatprep.subr.bf16.mxu0 %v4703_v53 }
 0x4e7   : > { %4251 = vmatmul.mubr.msk.f32.vlgmr.msra.gmra.mxu1 %vm663_vm2, %v1465_v61  ;;  %v3818_v61 = vld [vmem:[%s5427_s5 + $0x2c8] sm:$0xff] }
 0x4e8   : > { %4283 = vmatpush3.bf16.msra.mxu1 %v4703_v53  ;;  %4253 = vmatprep.mubr.msk.f32.mxu1 %vm663_vm2, %v4234_v56 }
 0x4e9   : > { %4288 = vmatprep.subr.msk.mxu1 %vm676_vm1, %v3739_v62 }
 0x4eb   : > { %4254 = vmatmul.mubr.msk.f32.gmra.mxu1 %vm663_vm2, %v4235_v60  ;;  %v4587_v60 = vld [vmem:[%s5425_s3 + $0xc8] sm:$0xff]  }
 0x4ec   : > { %4284 = vmatprep.mubr.msk.bf16.mxu1 %vm523_vm0, %v4580_v63 }
 0x4ef   : > { %4285 = vmatmul.mubr.msk.bf16.vlgmr.msra.gmra.mxu1 %vm523_vm0, %v4581_v0  ;;  %v3817_v0 = vld [vmem:[%s5427_s5 + $0x2c0] sm:$0xff] }
 0x4f0   : > { %4289 = vmatpush3.msk.msra.mxu1 %vm676_vm1, %v3739_v62 }
 0x4f1   : > { %4290 = vmatprep.subr.mxu1 %v3738_v1 }
 0x4f2   : > { %4291 = vmatpush3.msra.mxu1 %v3738_v1 }
 0x4f3   : > { %4292 = vmatprep.subr.mxu1 %v3737_v2 }
 0x4f4   : > { %4293 = vmatpush3.msra.mxu1 %v3737_v2 }
 0x4f5   : > { %4294 = vmatprep.subr.mxu1 %v3736_v3 }
 0x4f6   : > { %4295 = vmatpush3.msra.mxu1 %v3736_v3  ;;  %v3816_v3 = vld [vmem:[%s5427_s5 + $0x2b8] sm:$0xff] }
 0x4f7   : > { %4296 = vmatprep.subr.mxu1 %v3735_v4 }
 0x4f8   : > { %4297 = vmatpush3.msra.mxu1 %v3735_v4 }
 0x4f9   : > { %4298 = vmatprep.subr.mxu1 %v3734_v5 }
 0x4fa   : > { %4299 = vmatpush3.msra.mxu1 %v3734_v5 }
 0x4fb   : > { %4300 = vmatprep.subr.mxu1 %v3733_v6 }
 0x4fc   : > { %4301 = vmatpush3.msra.mxu1 %v3733_v6 }
 0x4fd   : > { %4334 = vmatprep.subr.bf16.mxu1 %v4703_v53 }
 0x590   : > { %v4278_v7 = vpop.f32.mrf.mxu0 }
 0x592   : > { %v1747_v8 = vpop.f32.mrf.mxu0 }
 0x594   : > { %v4281_v9 = vpop.f32.mrf.mxu0 }
 0x596   : > { %v1757_v10 = vpop.f32.mrf.mxu0 }
 0x598   : > { %v4312_v11 = vpop.f32.mrf.mxu0 }
 0x59a   : > { %v2005_v12 = vpop.f32.mrf.mxu0 }
 0x59b   : > { %4328 = vmatprep.mubr.msk.f32.mxu0 %vm663_vm2, %v2005_v12 }
 0x59c   : > { %v4313_v13 = vpop.f32.mrf.mxu0 }
 0x59e   : > { %v2008_v14 = vpop.f32.mrf.mxu0 }
 0x59f   : > { %4329 = vmatmul.mubr.msk.f32.vlgmr.msra.gmra.mxu0 %vm663_vm2, %v2008_v14  ;;  %v3813_v14 = vld [vmem:[%s5427_s5 + $0x2a0] sm:$0xff] }
 0x5a0   : > { %4361 = vmatpush3.bf16.msra.mxu0 %v4703_v53  ;;  %4331 = vmatprep.mubr.msk.f32.mxu0 %vm663_vm2, %v4312_v11  ;;  %v3814_v11 = vld [vmem:[%s5427_s5 + $0x2a8] sm:$0xff] }
 0x5a1   : > { %4366 = vmatprep.subr.msk.mxu0 %vm676_vm1, %v3787_v15 }
 0x5a3   : > { %4332 = vmatmul.mubr.msk.f32.gmra.mxu0 %vm663_vm2, %v4313_v13 }
 0x5a4   : > { %4362 = vmatprep.mubr.msk.bf16.mxu0 %vm523_vm0, %v4582_v16 }
 0x5a7   : > { %v4252_v19 = vpop.f32.mrf.mxu1  ;;  %4363 = vmatmul.mubr.msk.bf16.vlgmr.msra.gmra.mxu0 %vm523_vm0, %v4583_v17 }
 0x5a8   : > { %v1586_v20 = vadd.f32 %v4252_v19, %v4993_v46  ;;  %4367 = vmatpush3.msk.msra.mxu0 %vm676_vm1, %v3787_v15  ;;  %v3767_v46 = vld [vmem:[%s5427_s5 + $0x208] sm:$0xff]  ;;  %v3803_v19 = vld [vmem:[%s5427_s5 + $0x298] sm:$0x7f] }
 0x5a9   : > { %v1566_v22 = vpop.f32.mrf.mxu1  ;;  %4368 = vmatprep.subr.mxu0 %v3786_v18 }
 0x5aa   : > { %v1585_v23 = vadd.f32 %v1566_v22, %v4999_v50  ;;  %4369 = vmatpush3.msra.mxu0 %v3786_v18  ;;  %v5079_v25 = vadd.f32 %v4278_v7, %v1586_v20  ;;  %v3815_v7 = vld [vmem:[%s5427_s5 + $0x2b0] sm:$0xff] }
 0x5ab   : > { %v4255_v26 = vpop.f32.mrf.mxu1  ;;  %4370 = vmatprep.subr.mxu0 %v3785_v21  ;;  %v4588_v20 = vld [vmem:[%s5425_s3 + $0xb0] sm:$0xff]  }
 0x5ac   : > { %v1588_v27 = vadd.f32 %v4255_v26, %v5005_v55  ;;  %4371 = vmatpush3.msra.mxu0 %v3785_v21  ;;  %v5085_v29 = vadd.f32 %v1747_v8, %v1585_v23  ;;  %v4589_v21 = vld [vmem:[%s5425_s3 + $0xb8] sm:$0xff]   ;;  %v3802_v22 = vld [vmem:[%s5427_s5 + $0x290] sm:$0xff]  ;;  %v3801_v23 = vld [vmem:[%s5427_s5 + $0x288] sm:$0xff] }
 0x5ad   : > { %v1576_v30 = vpop.f32.mrf.mxu1  ;;  %4372 = vmatprep.subr.mxu0 %v3784_v24  ;;  %v3798_v26 = vld [vmem:[%s5427_s5 + $0x270] sm:$0xff] }
 0x5ae   : > { %v1587_v31 = vadd.f32 %v1576_v30, %v5010_v58  ;;  %4373 = vmatpush3.msra.mxu0 %v3784_v24  ;;  %v5091_v33 = vadd.f32 %v4281_v9, %v1588_v27  ;;  %v3819_v58 = vld [vmem:[%s5427_s5 + $0x2d0] sm:$0x7f]  ;;  %v3800_v24 = vld [vmem:[%s5427_s5 + $0x280] sm:$0xff]  ;;  %v3797_v27 = vld [vmem:[%s5427_s5 + $0x268] sm:$0xff] }
 0x5af   : > { %v4286_v34 = vpop.f32.mrf.mxu1  ;;  %4374 = vmatprep.subr.mxu0 %v3783_v28 }
 0x5b0   : > { %4375 = vmatpush3.msra.mxu0 %v3783_v28  ;;  %v5096_v36 = vadd.f32 %v1757_v10, %v1587_v31 }
 0x5b1   : > { %v1824_v37 = vpop.f32.mrf.mxu1  ;;  %4376 = vmatprep.subr.mxu0 %v3782_v32 }
 0x5b2   : > { %4302 = vmatprep.mubr.msk.f32.mxu1 %vm663_vm2, %v1824_v37  ;;  %4377 = vmatpush3.msra.mxu0 %v3782_v32  ;;  %v4593_v37 = vld [vmem:[%s5425_s3 + $0xe8] sm:$0xff]  }
 0x5b3   : > { %v4287_v38 = vpop.f32.mrf.mxu1  ;;  %4378 = vmatprep.subr.mxu0 %v3781_v35 }
 0x5b4   : > { %4379 = vmatpush3.msra.mxu0 %v3781_v35 }
 0x5b5   : > { %v1827_v39 = vpop.f32.mrf.mxu1  ;;  %4412 = vmatprep.subr.bf16.mxu0 %v4703_v53 }
 0x5b6   : > { %4303 = vmatmul.mubr.msk.f32.vlgmr.msra.gmra.mxu1 %vm663_vm2, %v1827_v39 }
 0x5b7   : > { %4335 = vmatpush3.bf16.msra.mxu1 %v4703_v53  ;;  %4305 = vmatprep.mubr.msk.f32.mxu1 %vm663_vm2, %v4286_v34 }
 0x5b8   : > { %4340 = vmatprep.subr.msk.mxu1 %vm676_vm1, %v3771_v40 }
 0x5ba   : > { %4306 = vmatmul.mubr.msk.f32.gmra.mxu1 %vm663_vm2, %v4287_v38 }
 0x5bb   : > { %4336 = vmatprep.mubr.msk.bf16.mxu1 %vm523_vm0, %v4584_v41 }
 0x5be   : > { %4337 = vmatmul.mubr.msk.bf16.vlgmr.msra.gmra.mxu1 %vm523_vm0, %v4585_v42 }
 0x5bf   : > { %4341 = vmatpush3.msk.msra.mxu1 %vm676_vm1, %v3771_v40 }
 0x5c0   : > { %4342 = vmatprep.subr.mxu1 %v3770_v43 }
 0x5c1   : > { %4343 = vmatpush3.msra.mxu1 %v3770_v43 }
 0x5c2   : > { %4344 = vmatprep.subr.mxu1 %v3769_v44 }
 0x5c3   : > { %4345 = vmatpush3.msra.mxu1 %v3769_v44 }
 0x5c4   : > { %4346 = vmatprep.subr.mxu1 %v3768_v45 }
 0x5c5   : > { %4347 = vmatpush3.msra.mxu1 %v3768_v45 }
 0x5c6   : > { %4348 = vmatprep.subr.mxu1 %v3767_v46 }
 0x5c7   : > { %4349 = vmatpush3.msra.mxu1 %v3767_v46 }
 0x5c8   : > { %4350 = vmatprep.subr.mxu1 %v3766_v47 }
 0x5c9   : > { %4351 = vmatpush3.msra.mxu1 %v3766_v47 }
 0x5ca   : > { %4352 = vmatprep.subr.mxu1 %v3765_v48 }
 0x5cb   : > { %4353 = vmatpush3.msra.mxu1 %v3765_v48 }
 0x5cc   : > { %4386 = vmatprep.subr.bf16.mxu1 %v4703_v53 }
 0x65f   : > { %v4330_v49 = vpop.f32.mrf.mxu0 }
 0x661   : > { %v2109_v50 = vpop.f32.mrf.mxu0 }
 0x663   : > { %v4333_v51 = vpop.f32.mrf.mxu0 }
 0x665   : > { %v2119_v52 = vpop.f32.mrf.mxu0 }
 0x667   : > { %v4364_v54 = vpop.f32.mrf.mxu0 }
 0x669   : > { %v2367_v55 = vpop.f32.mrf.mxu0 }
 0x66a   : > { %4380 = vmatprep.mubr.msk.f32.mxu0 %vm663_vm2, %v2367_v55  ;;  %v3835_v55 = vld [vmem:[%s5427_s5 + $0x308] sm:$0x7f] }
 0x66b   : > { %v4365_v56 = vpop.f32.mrf.mxu0 }
 0x66d   : > { %v2370_v57 = vpop.f32.mrf.mxu0 }
 0x66e   : > { %4381 = vmatmul.mubr.msk.f32.vlgmr.msra.gmra.mxu0 %vm663_vm2, %v2370_v57  ;;  %v4591_v57 = vld [vmem:[%s5425_s3 + $0xd8] sm:$0xff]  }
 0x66f   : > { %4413 = vmatpush3.bf16.msra.mxu0 %v4703_v53  ;;  %4383 = vmatprep.mubr.msk.f32.mxu0 %vm663_vm2, %v4364_v54 }
 0x670   : > { %4418 = vmatprep.subr.msk.mxu0 %vm676_vm1, %v3819_v58 }
 0x672   : > { %4384 = vmatmul.mubr.msk.f32.gmra.mxu0 %vm663_vm2, %v4365_v56  ;;  %v4590_v56 = vld [vmem:[%s5425_s3 + $0xd0] sm:$0xff]  }
 0x673   : > { %4414 = vmatprep.mubr.msk.bf16.mxu0 %vm523_vm0, %v4586_v59  ;;  %v3833_v59 = vld [vmem:[%s5427_s5 + $0x2f8] sm:$0xff] }
 0x676   : > { %v4304_v62 = vpop.f32.mrf.mxu1  ;;  %4415 = vmatmul.mubr.msk.bf16.vlgmr.msra.gmra.mxu0 %vm523_vm0, %v4587_v60  ;;  %v3832_v60 = vld [vmem:[%s5427_s5 + $0x2f0] sm:$0xff] }
 0x677   : > { %v1948_v63 = vadd.f32 %v4304_v62, %v5079_v25  ;;  %4419 = vmatpush3.msk.msra.mxu0 %vm676_vm1, %v3819_v58  ;;  %v3799_v25 = vld [vmem:[%s5427_s5 + $0x278] sm:$0xff]  ;;  %v3834_v58 = vld [vmem:[%s5427_s5 + $0x300] sm:$0xff] }
 0x678   : > { %v1928_v1 = vpop.f32.mrf.mxu1  ;;  %4420 = vmatprep.subr.mxu0 %v3818_v61  ;;  %v3830_v62 = vld [vmem:[%s5427_s5 + $0x2e0] sm:$0xff] }
 0x679   : > { %v1947_v2 = vadd.f32 %v1928_v1, %v5085_v29  ;;  %4421 = vmatpush3.msra.mxu0 %v3818_v61  ;;  %v5165_v4 = vadd.f32 %v4330_v49, %v1948_v63  ;;  %v3831_v61 = vld [vmem:[%s5427_s5 + $0x2e8] sm:$0xff]  ;;  %v3829_v63 = vld [vmem:[%s5427_s5 + $0x2d8] sm:$0xff] }
 0x67a   : > { %v4307_v5 = vpop.f32.mrf.mxu1  ;;  %4422 = vmatprep.subr.mxu0 %v3817_v0  ;;  %v3850_v1 = vld [vmem:[%s5427_s5 + $0x338] sm:$0xff] }
 0x67b   : > { %v1950_v6 = vadd.f32 %v4307_v5, %v5091_v33  ;;  %4423 = vmatpush3.msra.mxu0 %v3817_v0  ;;  %v5171_v8 = vadd.f32 %v2109_v50, %v1947_v2  ;;  %v3851_v0 = vld [vmem:[%s5427_s5 + $0x340] sm:$0x7f]  ;;  %v3849_v2 = vld [vmem:[%s5427_s5 + $0x330] sm:$0xff]  ;;  %v3846_v5 = vld [vmem:[%s5427_s5 + $0x318] sm:$0xff] }
 0x67c   : > { %v1938_v9 = vpop.f32.mrf.mxu1  ;;  %4424 = vmatprep.subr.mxu0 %v3816_v3 }
 0x67d   : > { %v1949_v10 = vadd.f32 %v1938_v9, %v5096_v36  ;;  %4425 = vmatpush3.msra.mxu0 %v3816_v3  ;;  %v5177_v12 = vadd.f32 %v4333_v51, %v1950_v6  ;;  %v4592_v36 = vld [vmem:[%s5425_s3 + $0xe0] sm:$0xff]   ;;  %v3848_v3 = vld [vmem:[%s5427_s5 + $0x328] sm:$0xff]  ;;  %v3845_v6 = vld [vmem:[%s5427_s5 + $0x310] sm:$0xff] }
 0x67e   : > { %v4338_v13 = vpop.f32.mrf.mxu1  ;;  %4426 = vmatprep.subr.mxu0 %v3815_v7 }
 0x67f   : > { %4427 = vmatpush3.msra.mxu0 %v3815_v7  ;;  %v5182_v15 = vadd.f32 %v2119_v52, %v1949_v10 }
 0x680   : > { %v2186_v16 = vpop.f32.mrf.mxu1  ;;  %4428 = vmatprep.subr.mxu0 %v3814_v11 }
 0x681   : > { %4354 = vmatprep.mubr.msk.f32.mxu1 %vm663_vm2, %v2186_v16  ;;  %4429 = vmatpush3.msra.mxu0 %v3814_v11 }
 0x682   : > { %v4339_v17 = vpop.f32.mrf.mxu1  ;;  %4430 = vmatprep.subr.mxu0 %v3813_v14 }
 0x683   : > { %4431 = vmatpush3.msra.mxu0 %v3813_v14 }
 0x684   : > { %v2189_v18 = vpop.f32.mrf.mxu1  ;;  %4464 = vmatprep.subr.bf16.mxu0 %v4703_v53 }
 0x685   : > { %4355 = vmatmul.mubr.msk.f32.vlgmr.msra.gmra.mxu1 %vm663_vm2, %v2189_v18 }
 0x686   : > { %4387 = vmatpush3.bf16.msra.mxu1 %v4703_v53  ;;  %4357 = vmatprep.mubr.msk.f32.mxu1 %vm663_vm2, %v4338_v13 }
 0x687   : > { %4392 = vmatprep.subr.msk.mxu1 %vm676_vm1, %v3803_v19 }
 0x689   : > { %4358 = vmatmul.mubr.msk.f32.gmra.mxu1 %vm663_vm2, %v4339_v17 }
 0x68a   : > { %4388 = vmatprep.mubr.msk.bf16.mxu1 %vm523_vm0, %v4588_v20 }
 0x68d   : > { %4389 = vmatmul.mubr.msk.bf16.vlgmr.msra.gmra.mxu1 %vm523_vm0, %v4589_v21 }
 0x68e   : > { %4393 = vmatpush3.msk.msra.mxu1 %vm676_vm1, %v3803_v19 }
 0x68f   : > { %4394 = vmatprep.subr.mxu1 %v3802_v22 }
 0x690   : > { %4395 = vmatpush3.msra.mxu1 %v3802_v22 }
 0x691   : > { %4396 = vmatprep.subr.mxu1 %v3801_v23 }
 0x692   : > { %4397 = vmatpush3.msra.mxu1 %v3801_v23 }
 0x693   : > { %4398 = vmatprep.subr.mxu1 %v3800_v24 }
 0x694   : > { %4399 = vmatpush3.msra.mxu1 %v3800_v24 }
 0x695   : > { %4400 = vmatprep.subr.mxu1 %v3799_v25 }
 0x696   : > { %4401 = vmatpush3.msra.mxu1 %v3799_v25 }
 0x697   : > { %4402 = vmatprep.subr.mxu1 %v3798_v26 }
 0x698   : > { %4403 = vmatpush3.msra.mxu1 %v3798_v26 }
 0x699   : > { %4404 = vmatprep.subr.mxu1 %v3797_v27 }
 0x69a   : > { %4405 = vmatpush3.msra.mxu1 %v3797_v27 }
 0x69b   : > { %4438 = vmatprep.subr.bf16.mxu1 %v4703_v53 }
 0x72e   : > { %v4382_v28 = vpop.f32.mrf.mxu0 }
 0x730   : > { %v2471_v29 = vpop.f32.mrf.mxu0 }
 0x732   : > { %v4385_v30 = vpop.f32.mrf.mxu0 }
 0x734   : > { %v2481_v31 = vpop.f32.mrf.mxu0 }
 0x736   : > { %v4416_v32 = vpop.f32.mrf.mxu0 }
 0x738   : > { %v2729_v33 = vpop.f32.mrf.mxu0 }
 0x739   : > { %4432 = vmatprep.mubr.msk.f32.mxu0 %vm663_vm2, %v2729_v33  ;;  %v3866_v33 = vld [vmem:[%s5427_s5 + $0x370] sm:$0xff] }
 0x73a   : > { %v4417_v34 = vpop.f32.mrf.mxu0 }
 0x73c   : > { %v2732_v35 = vpop.f32.mrf.mxu0 }
 0x73d   : > { %4433 = vmatmul.mubr.msk.f32.vlgmr.msra.gmra.mxu0 %vm663_vm2, %v2732_v35  ;;  %v3864_v35 = vld [vmem:[%s5427_s5 + $0x360] sm:$0xff] }
 0x73e   : > { %4465 = vmatpush3.bf16.msra.mxu0 %v4703_v53  ;;  %4435 = vmatprep.mubr.msk.f32.mxu0 %vm663_vm2, %v4416_v32  ;;  %v4595_v32 = vld [vmem:[%s5425_s3 + $0xf8] sm:$0xff]  }
 0x73f   : > { %4470 = vmatprep.subr.msk.mxu0 %vm676_vm1, %v3851_v0 }
 0x741   : > { %4436 = vmatmul.mubr.msk.f32.gmra.mxu0 %vm663_vm2, %v4417_v34  ;;  %v3865_v34 = vld [vmem:[%s5427_s5 + $0x368] sm:$0xff] }
 0x742   : > { %4466 = vmatprep.mubr.msk.bf16.mxu0 %vm523_vm0, %v4592_v36  ;;  %v3863_v36 = vld [vmem:[%s5427_s5 + $0x358] sm:$0xff] }
 0x745   : > { %v4356_v38 = vpop.f32.mrf.mxu1  ;;  %4467 = vmatmul.mubr.msk.bf16.vlgmr.msra.gmra.mxu0 %vm523_vm0, %v4593_v37  ;;  %v3862_v37 = vld [vmem:[%s5427_s5 + $0x350] sm:$0xff] }
 0x746   : > { %v2310_v39 = vadd.f32 %v4356_v38, %v5165_v4  ;;  %4471 = vmatpush3.msk.msra.mxu0 %vm676_vm1, %v3851_v0  ;;  %v3847_v4 = vld [vmem:[%s5427_s5 + $0x320] sm:$0xff]  ;;  %v3861_v38 = vld [vmem:[%s5427_s5 + $0x348] sm:$0xff] }
 0x747   : > { %v2290_v40 = vpop.f32.mrf.mxu1  ;;  %4472 = vmatprep.subr.mxu0 %v3850_v1 }
 0x748   : > { %v2309_v41 = vadd.f32 %v2290_v40, %v5171_v8  ;;  %v5237_v42 = vadd.f32 %v4382_v28, %v2310_v39  ;;  %4473 = vmatpush3.msra.mxu0 %v3850_v1 }
 0x749   : > { %v4359_v43 = vpop.f32.mrf.mxu1  ;;  %4474 = vmatprep.subr.mxu0 %v3849_v2 }
 0x74a   : > { %v2312_v44 = vadd.f32 %v4359_v43, %v5177_v12  ;;  %v5240_v45 = vadd.f32 %v2471_v29, %v2309_v41  ;;  %4475 = vmatpush3.msra.mxu0 %v3849_v2 }
 0x74b   : > { %v2300_v46 = vpop.f32.mrf.mxu1  ;;  %4476 = vmatprep.subr.mxu0 %v3848_v3 }
 0x74c   : > { %v2311_v47 = vadd.f32 %v2300_v46, %v5182_v15  ;;  %v5243_v48 = vadd.f32 %v4385_v30, %v2312_v44  ;;  %4477 = vmatpush3.msra.mxu0 %v3848_v3 }
 0x74d   : > { %v4390_v49 = vpop.f32.mrf.mxu1  ;;  %4478 = vmatprep.subr.mxu0 %v3847_v4 }
 0x74e   : > { %v5245_v50 = vadd.f32 %v2481_v31, %v2311_v47  ;;  %4479 = vmatpush3.msra.mxu0 %v3847_v4  ;;  %v4594_v31 = vld [vmem:[%s5425_s3 + $0xf0] sm:$0xff]  }
 0x74f   : > { %v2548_v51 = vpop.f32.mrf.mxu1  ;;  %4480 = vmatprep.subr.mxu0 %v3846_v5 }
 0x750   : > { %4406 = vmatprep.mubr.msk.f32.mxu1 %vm663_vm2, %v2548_v51  ;;  %4481 = vmatpush3.msra.mxu0 %v3846_v5 }
 0x751   : > { %v4391_v52 = vpop.f32.mrf.mxu1  ;;  %4482 = vmatprep.subr.mxu0 %v3845_v6 }
 0x752   : > { %4483 = vmatpush3.msra.mxu0 %v3845_v6 }
 0x753   : > { %v2551_v54 = vpop.f32.mrf.mxu1 }
 0x754   : > { %4407 = vmatmul.mubr.msk.f32.vlgmr.msra.gmra.mxu1 %vm663_vm2, %v2551_v54 }
 0x755   : > { %4439 = vmatpush3.bf16.msra.mxu1 %v4703_v53  ;;  %4409 = vmatprep.mubr.msk.f32.mxu1 %vm663_vm2, %v4390_v49 }
 0x756   : > { %4444 = vmatprep.subr.msk.mxu1 %vm676_vm1, %v3835_v55 }
 0x758   : > { %4410 = vmatmul.mubr.msk.f32.gmra.mxu1 %vm663_vm2, %v4391_v52 }
 0x759   : > { %4440 = vmatprep.mubr.msk.bf16.mxu1 %vm523_vm0, %v4590_v56 }
 0x75c   : > { %4441 = vmatmul.mubr.msk.bf16.vlgmr.msra.gmra.mxu1 %vm523_vm0, %v4591_v57 }
 0x75d   : > { %4445 = vmatpush3.msk.msra.mxu1 %vm676_vm1, %v3835_v55 }
 0x75e   : > { %4446 = vmatprep.subr.mxu1 %v3834_v58 }
 0x75f   : > { %4447 = vmatpush3.msra.mxu1 %v3834_v58 }
 0x760   : > { %4448 = vmatprep.subr.mxu1 %v3833_v59 }
 0x761   : > { %4449 = vmatpush3.msra.mxu1 %v3833_v59 }
 0x762   : > { %4450 = vmatprep.subr.mxu1 %v3832_v60 }
 0x763   : > { %4451 = vmatpush3.msra.mxu1 %v3832_v60 }
 0x764   : > { %4452 = vmatprep.subr.mxu1 %v3831_v61 }
 0x765   : > { %4453 = vmatpush3.msra.mxu1 %v3831_v61 }
 0x766   : > { %4454 = vmatprep.subr.mxu1 %v3830_v62 }
 0x767   : > { %4455 = vmatpush3.msra.mxu1 %v3830_v62 }
 0x768   : > { %4456 = vmatprep.subr.mxu1 %v3829_v63 }
 0x769   : > { %4457 = vmatpush3.msra.mxu1 %v3829_v63 }
 0x76a   : > { %4490 = vmatprep.subr.bf16.mxu1 %v4703_v53 }
 0x7fd   : > { %v4434_v7 = vpop.f32.mrf.mxu0 }
 0x7ff   : > { %v2833_v8 = vpop.f32.mrf.mxu0 }
 0x801   : > { %v4437_v9 = vpop.f32.mrf.mxu0 }
 0x803   : > { %v2843_v10 = vpop.f32.mrf.mxu0 }
 0x805   : > { %v4468_v11 = vpop.f32.mrf.mxu0 }
 0x807   : > { %v3091_v12 = vpop.f32.mrf.mxu0 }
 0x808   : > { %4484 = vmatprep.mubr.msk.f32.mxu0 %vm663_vm2, %v3091_v12 }
 0x809   : > { %v4469_v13 = vpop.f32.mrf.mxu0 }
 0x80b   : > { %v3094_v14 = vpop.f32.mrf.mxu0 }
 0x80c   : > { %4485 = vmatmul.mubr.msk.f32.vlgmr.msra.gmra.mxu0 %vm663_vm2, %v3094_v14 }
 0x80d   : > { %4487 = vmatprep.mubr.msk.f32.mxu0 %vm663_vm2, %v4468_v11 }
 0x810   : > { %4488 = vmatmul.mubr.msk.f32.gmra.mxu0 %vm663_vm2, %v4469_v13 }
 0x814   : > { %v4408_v15 = vpop.f32.mrf.mxu1 }
 0x815   : > { %v2672_v16 = vadd.f32 %v4408_v15, %v5237_v42 }
 0x816   : > { %v2652_v17 = vpop.f32.mrf.mxu1 }
 0x817   : > { %v2671_v18 = vadd.f32 %v2652_v17, %v5240_v45  ;;  %v2853_v19 = vadd.f32 %v4434_v7, %v2672_v16  ;;  %v3413_v17 = vld [vmem:[%s5426_s4 + $0x10] sm:$0xff] }
 0x818   : > { %v4411_v20 = vpop.f32.mrf.mxu1 }
 0x819   : > { %v2674_v21 = vadd.f32 %v4411_v20, %v5243_v48  ;;  %v2852_v22 = vadd.f32 %v2833_v8, %v2671_v18  ;;  %v3412_v8 = vld [vmem:[%s5426_s4 + $0x8] sm:$0xff] }
 0x81a   : > { %v2662_v23 = vpop.f32.mrf.mxu1 }
 0x81b   : > { %v2673_v24 = vadd.f32 %v2662_v23, %v5245_v50  ;;  %v2855_v25 = vadd.f32 %v4437_v9, %v2674_v21 }
 0x81c   : > { %v4442_v26 = vpop.f32.mrf.mxu1 }
 0x81d   : > { %v2854_v27 = vadd.f32 %v2843_v10, %v2673_v24  ;;  %v3411_v10 = vld [vmem:[%s5426_s4] sm:$0xff]  ;;  %v3414_v24 = vld [vmem:[%s5426_s4 + $0x18] sm:$0xff] }
 0x81e   : > { %v2910_v28 = vpop.f32.mrf.mxu1 }
 0x81f   : > { %4458 = vmatprep.mubr.msk.f32.mxu1 %vm663_vm2, %v2910_v28 }
 0x820   : > { %v4443_v29 = vpop.f32.mrf.mxu1 }
 0x822   : > { %v2913_v30 = vpop.f32.mrf.mxu1 }
 0x823   : > { %4459 = vmatmul.mubr.msk.f32.vlgmr.msra.gmra.mxu1 %vm663_vm2, %v2913_v30 }
 0x824   : > { %4491 = vmatpush3.bf16.msra.mxu1 %v4703_v53  ;;  %4461 = vmatprep.mubr.msk.f32.mxu1 %vm663_vm2, %v4442_v26  ;;  %v3867_v53 = vld [vmem:[%s5427_s5 + $0x378] sm:$0x7f] }
 0x825   : > { %4496 = vmatprep.subr.msk.mxu1 %vm676_vm1, %v3867_v53 }
 0x827   : > { %4462 = vmatmul.mubr.msk.f32.gmra.mxu1 %vm663_vm2, %v4443_v29 }
 0x828   : > { %4492 = vmatprep.mubr.msk.bf16.mxu1 %vm523_vm0, %v4594_v31 }
 0x82b   : > { %4493 = vmatmul.mubr.msk.bf16.vlgmr.msra.gmra.mxu1 %vm523_vm0, %v4595_v32 }
 0x82c   : > { %4497 = vmatpush3.msk.msra.mxu1 %vm676_vm1, %v3867_v53 }
 0x82d   : > { %4498 = vmatprep.subr.mxu1 %v3866_v33 }
 0x82e   : > { %4499 = vmatpush3.msra.mxu1 %v3866_v33 }
 0x82f   : > { %4500 = vmatprep.subr.mxu1 %v3865_v34 }
 0x830   : > { %4501 = vmatpush3.msra.mxu1 %v3865_v34 }
 0x831   : > { %4502 = vmatprep.subr.mxu1 %v3864_v35 }
 0x832   : > { %4503 = vmatpush3.msra.mxu1 %v3864_v35 }
 0x833   : > { %4504 = vmatprep.subr.mxu1 %v3863_v36 }
 0x834   : > { %4505 = vmatpush3.msra.mxu1 %v3863_v36 }
 0x835   : > { %4506 = vmatprep.subr.mxu1 %v3862_v37 }
 0x836   : > { %4507 = vmatpush3.msra.mxu1 %v3862_v37 }
 0x837   : > { %4508 = vmatprep.subr.mxu1 %v3861_v38 }
 0x838   : > { %4509 = vmatpush3.msra.mxu1 %v3861_v38 }
 0x8cc   : > { %v4486_v51 = vpop.f32.mrf.mxu0 }
 0x8ce   : > { %v3195_v52 = vpop.f32.mrf.mxu0 }
 0x8d0   : > { %v4489_v54 = vpop.f32.mrf.mxu0 }
 0x8d2   : > { %v3205_v59 = vpop.f32.mrf.mxu0 }
 0x8e3   : > { %v4460_v39 = vpop.f32.mrf.mxu1 }
 0x8e4   : > { %v3034_v40 = vadd.f32 %v4460_v39, %v2853_v19 }
 0x8e5   : > { %v3014_v41 = vpop.f32.mrf.mxu1 }
 0x8e6   : > { %v3033_v42 = vadd.f32 %v3014_v41, %v2852_v22  ;;  %v3215_v55 = vadd.f32 %v4486_v51, %v3034_v40 }
 0x8e7   : > { %v4463_v43 = vpop.f32.mrf.mxu1 }
 0x8e8   : > { %v3036_v44 = vadd.f32 %v4463_v43, %v2855_v25  ;;  %v3214_v57 = vadd.f32 %v3195_v52, %v3033_v42 }
 0x8e9   : > { %v3024_v45 = vpop.f32.mrf.mxu1 }
 0x8ea   : > { %v3035_v46 = vadd.f32 %v3024_v45, %v2854_v27  ;;  %v3217_v3 = vadd.f32 %v4489_v54, %v3036_v44 }
 0x8eb   : > { %v4494_v47 = vpop.f32.mrf.mxu1 }
 0x8ec   : > { %v3216_v0 = vadd.f32 %v3205_v59, %v3035_v46 }
 0x8ed   : > { %v3272_v48 = vpop.f32.mrf.mxu1 }
 0x8ee   : > { %4510 = vmatprep.mubr.msk.f32.mxu1 %vm663_vm2, %v3272_v48 }
 0x8ef   : > { %v4495_v49 = vpop.f32.mrf.mxu1 }
 0x8f1   : > { %v3275_v50 = vpop.f32.mrf.mxu1 }
 0x8f2   : > { %4511 = vmatmul.mubr.msk.f32.vlgmr.msra.gmra.mxu1 %vm663_vm2, %v3275_v50 }
 0x8f3   : > { %4513 = vmatprep.mubr.msk.f32.mxu1 %vm663_vm2, %v4494_v47 }
 0x8f6   : > { %4514 = vmatmul.mubr.msk.f32.gmra.mxu1 %vm663_vm2, %v4495_v49 }
 0x9b2   : > { %v4512_v56 = vpop.f32.mrf.mxu1 }
 0x9b3   : > { %v3396_v58 = vadd.f32 %v4512_v56, %v3215_v55 }
 0x9b4   : > { %v3376_v60 = vpop.f32.mrf.mxu1 }
 0x9b5   : > { %v3395_v61 = vadd.f32 %v3376_v60, %v3214_v57  ;;  %v3402_v62 = vsel %vm523_vm0, %v3396_v58, -inf }
 0x9b6   : > { %3403 = vmax.xlane.f32.xlu1 %v3402_v62  ;;  %v4515_v63 = vpop.f32.mrf.mxu1 }
 0x9b7   : > { %v3399_v1 = vsel %vm523_vm0, %v3395_v61, -inf  ;;  %v3398_v5 = vadd.f32 %v4515_v63, %v3217_v3 }
 0x9b8   : > { %v3386_v2 = vpop.f32.mrf.mxu1  ;;  %3400 = vmax.xlane.f32.xlu0 %v3399_v1 }
 0x9b9   : > { %v3397_v4 = vadd.f32 %v3386_v2, %v3216_v0  ;;  %v3408_v7 = vsel %vm523_vm0, %v3398_v5, -inf }
 0x9bb   : > { %v3405_v6 = vsel %vm523_vm0, %v3397_v4, -inf }
 0x9bc   : > { %3406 = vmax.xlane.f32.xlu0 %v3405_v6 }
 0x9c0   : > { %3409 = vmax.xlane.f32.xlu0 %v3408_v7 }
 0xa3f   : > { %v3404_v9 = vpop.xlane.xlu1 %3403 }
 0xa40   : > { %v5365_v11 = vadd.f32 %v3412_v8, %v3404_v9 }
 0xa41   : > { %v3401_v12 = vpop.xlane.xlu0 %3400 }
 0xa42   : > { %v5368_v13 = vmul.f32 0.70710677, %v5365_v11  ;;  %v5370_v14 = vadd.f32 %v3411_v10, %v3401_v12 }
 0xa44   : > { %v3428_v15 = vand.u32 2147483647, %v5368_v13  ;;  %v5374_v16 = vmul.f32 0.70710677, %v5370_v14  ;;  %vm3508_vm3 = vcmp.ge.f32.partialorder %v5368_v13, 0.0  ;;  %v3420_v13 = vmul.f32 0.5, %v5365_v11 }
 0xa45   : > { %v3407_v18 = vpop.xlane.xlu0 %3406 }
 0xa46   : > { %v3432_v19 = vmul.f32 0.3275911, %v3428_v15  ;;  %v3427_v20 = vand.u32 2147483647, %v5374_v16  ;;  %v5380_v21 = vadd.f32 %v3413_v17, %v3407_v18  ;;  %v3484_v53 = vsub.f32 0.0, %v3428_v15 }
 0xa47   : > { %vm3507_vm4 = vcmp.ge.f32.partialorder %v5374_v16, 0.0 }
 0xa48   : > { %v3436_v22 = vadd.f32 1.0, %v3432_v19  ;;  %v3431_v23 = vmul.f32 0.3275911, %v3427_v20  ;;  %v5386_v25 = vmul.f32 0.70710677, %v5380_v21  ;;  %v3483_v35 = vsub.f32 0.0, %v3427_v20 }
 0xa49   : > { %v3410_v26 = vpop.xlane.xlu0 %3409  ;;  %v3488_v36 = vmul.f32 %v3484_v53, %v3428_v15 }
 0xa4a   : > { %4596 = vrcp.f32 %v3436_v22  ;;  %v3435_v27 = vadd.f32 1.0, %v3431_v23  ;;  %v3429_v28 = vand.u32 2147483647, %v5386_v25  ;;  %v5389_v29 = vadd.f32 %v3414_v24, %v3410_v26 }
 0xa4b   : > { %v3487_v39 = vmul.f32 %v3483_v35, %v3427_v20  ;;  %v3493_v42 = vmul.f32 1.442695, %v3488_v36  ;;  %vm3509_vm5 = vcmp.ge.f32.partialorder %v5386_v25, 0.0 }
 0xa4c   : > { %4598 = vrcp.f32 %v3435_v27  ;;  %v3433_v30 = vmul.f32 0.3275911, %v3429_v28  ;;  %v5392_v31 = vmul.f32 0.70710677, %v5389_v29  ;;  %v3485_v40 = vsub.f32 0.0, %v3429_v28 }
 0xa4d   : > { %v3491_v46 = vmul.f32 1.442695, %v3487_v39 }
 0xa4e   : > { %v3437_v32 = vadd.f32 1.0, %v3433_v30  ;;  %v3430_v33 = vand.u32 2147483647, %v5392_v31  ;;  %v3489_v47 = vmul.f32 %v3485_v40, %v3429_v28  ;;  %vm3510_vm6 = vcmp.ge.f32.partialorder %v5392_v31, 0.0 }
 0xa50   : > { %4600 = vrcp.f32 %v3437_v32  ;;  %v3434_v34 = vmul.f32 0.3275911, %v3430_v33  ;;  %v3486_v49 = vsub.f32 0.0, %v3430_v33  ;;  %v3495_v56 = vmul.f32 1.442695, %v3489_v47 }
 0xa52   : > { %v3438_v37 = vadd.f32 1.0, %v3434_v34  ;;  %v3490_v58 = vmul.f32 %v3486_v49, %v3430_v33  ;;  %v3527_v49 = vld [vmem:[%s5428_s6] sm:$0xff] }
 0xa54   : > { %4602 = vrcp.f32 %v3438_v37  ;;  %v3497_v3 = vmul.f32 1.442695, %v3490_v58 }
 0xa55   : > { %4604 = vpow2.f32 %v3493_v42 }
 0xa56   : > { %4606 = vpow2.f32 %v3491_v46 }
 0xa57   : > { %v4597_v38 = vpop.eup %4596  ;;  %4608 = vpow2.f32 %v3495_v56 }
 0xa58   : > { %v3448_v41 = vmul.f32 1.0614054, %v4597_v38  ;;  %4610 = vpow2.f32 %v3497_v3 }
 0xa59   : > { %v4599_v43 = vpop.eup %4598 }
 0xa5a   : > { %v3452_v44 = vadd.f32 -1.4531521, %v3448_v41  ;;  %v3447_v45 = vmul.f32 1.0614054, %v4599_v43 }
 0xa5c   : > { %v3456_v48 = vmul.f32 %v4597_v38, %v3452_v44  ;;  %v3451_v50 = vadd.f32 -1.4531521, %v3447_v45  ;;  %v3419_v44 = vmul.f32 0.5, %v5370_v14  ;;  %v3528_v14 = vld [vmem:[%s5428_s6 + $0x8] sm:$0xff] }
 0xa5d   : > { %v4601_v51 = vpop.eup %4600 }
 0xa5e   : > { %v3460_v52 = vadd.f32 1.4214138, %v3456_v48  ;;  %v3455_v54 = vmul.f32 %v4599_v43, %v3451_v50  ;;  %v3449_v55 = vmul.f32 1.0614054, %v4601_v51 }
 0xa60   : > { %v3464_v57 = vmul.f32 %v4597_v38, %v3460_v52  ;;  %v3459_v59 = vadd.f32 1.4214138, %v3455_v54  ;;  %v3453_v60 = vadd.f32 -1.4531521, %v3449_v55  ;;  %v3421_v54 = vmul.f32 0.5, %v5380_v21  ;;  %v3530_v21 = vld [vmem:[%s5428_s6 + $0x18] sm:$0xff] }
 0xa61   : > { %v4603_v62 = vpop.eup %4602 }
 0xa62   : > { %v3468_v61 = vadd.f32 -0.28449672, %v3464_v57  ;;  %v3463_v63 = vmul.f32 %v4599_v43, %v3459_v59  ;;  %v3457_v0 = vmul.f32 %v4601_v51, %v3453_v60  ;;  %v3450_v2 = vmul.f32 1.0614054, %v4603_v62  ;;  %v4605_v15 = vpop.eup %4604  ;;  %v3529_v57 = vld [vmem:[%s5428_s6 + $0x10] sm:$0xff] }
 0xa63   : > { %v4607_v24 = vpop.eup %4606 }
 0xa64   : > { %v3472_v1 = vmul.f32 %v4597_v38, %v3468_v61  ;;  %v3467_v4 = vadd.f32 -0.28449672, %v3463_v63  ;;  %v3461_v5 = vadd.f32 1.4214138, %v3457_v0  ;;  %v3454_v7 = vadd.f32 -1.4531521, %v3450_v2  ;;  %v4609_v35 = vpop.eup %4608 }
 0xa65   : > { %v4611_v47 = vpop.eup %4610  ;;  %v3422_v63 = vmul.f32 0.5, %v5389_v29  ;;  %v3549_v29 = vld [vmem:[#allocation2] sm:$0x1] }
 0xa66   : > { %v3476_v6 = vadd.f32 0.2548296, %v3472_v1  ;;  %v3471_v8 = vmul.f32 %v4599_v43, %v3467_v4  ;;  %v3465_v9 = vmul.f32 %v4601_v51, %v3461_v5  ;;  %v3458_v12 = vmul.f32 %v4603_v62, %v3454_v7 }
 0xa68   : > { %v3480_v10 = vmul.f32 %v4597_v38, %v3476_v6  ;;  %v3475_v17 = vadd.f32 0.2548296, %v3471_v8  ;;  %v3469_v18 = vadd.f32 -0.28449672, %v3465_v9  ;;  %v3462_v20 = vadd.f32 1.4214138, %v3458_v12 }
 0xa6a   : > { %v3500_v19 = vmul.f32 %v4605_v15, %v3480_v10  ;;  %v3479_v22 = vmul.f32 %v4599_v43, %v3475_v17  ;;  %v3473_v23 = vmul.f32 %v4601_v51, %v3469_v18  ;;  %v3466_v27 = vmul.f32 %v4603_v62, %v3462_v20 }
 0xa6c   : > { %v3504_v26 = vsub.f32 1.0, %v3500_v19  ;;  %v3499_v28 = vmul.f32 %v4607_v24, %v3479_v22  ;;  %v3477_v30 = vadd.f32 0.2548296, %v3473_v23  ;;  %v3470_v53 = vadd.f32 -0.28449672, %v3466_v27 }
 0xa6e   : > { %v3512_v32 = vsub.f32 0.0, %v3504_v26  ;;  %v3503_v33 = vsub.f32 1.0, %v3499_v28  ;;  %v3481_v34 = vmul.f32 %v4601_v51, %v3477_v30  ;;  %v3474_v37 = vmul.f32 %v4603_v62, %v3470_v53 }
 0xa70   : > { %v3516_v36 = vsel %vm3508_vm3, %v3504_v26, %v3512_v32  ;;  %v3511_v38 = vsub.f32 0.0, %v3503_v33  ;;  %v3501_v39 = vmul.f32 %v4609_v35, %v3481_v34  ;;  %v3478_v40 = vadd.f32 0.2548296, %v3474_v37 }
 0xa71   : > { %v3520_v41 = vadd.f32 1.0, %v3516_v36 }
 0xa72   : > { %v3515_v42 = vsel %vm3507_vm4, %v3503_v33, %v3511_v38  ;;  %v3505_v43 = vsub.f32 1.0, %v3501_v39  ;;  %v3482_v46 = vmul.f32 %v4603_v62, %v3478_v40 }
 0xa73   : > { %v3519_v45 = vadd.f32 1.0, %v3515_v42  ;;  %v3524_v51 = vmul.f32 %v3520_v41, %v3420_v13 }
 0xa74   : > { %v3513_v48 = vsub.f32 0.0, %v3505_v43  ;;  %v3502_v16 = vmul.f32 %v4611_v47, %v3482_v46 }
 0xa75   : > { %v3523_v50 = vmul.f32 %v3519_v45, %v3419_v44  ;;  %v3532_v60 = vmul.f32 %v3528_v14, %v3524_v51 }
 0xa76   : > { %v3517_v52 = vsel %vm3509_vm5, %v3505_v43, %v3513_v48  ;;  %v3506_v56 = vsub.f32 1.0, %v3502_v16 }
 0xa77   : > { %v3521_v55 = vadd.f32 1.0, %v3517_v52  ;;  %v3531_v11 = vmul.f32 %v3527_v49, %v3523_v50  ;;  %v3537_v1 = vsel %vm3535_vm7, %v3532_v60, 0.0 }
 0xa78   : > { %v3514_v59 = vsub.f32 0.0, %v3506_v56 }
 0xa79   : > { %v3525_v58 = vmul.f32 %v3521_v55, %v3421_v54  ;;  %v3536_v62 = vsel %vm3535_vm7, %v3531_v11, 0.0 }
 0xa7a   : > { %v3518_v61 = vsel %vm3510_vm6, %v3506_v56, %v3514_v59  ;;  %v3538_v4 = vadd.f32 %v3537_v1, %v3536_v62 }
 0xa7b   : > { %v3533_v25 = vmul.f32 %v3529_v57, %v3525_v58  ;;  %v3522_v0 = vadd.f32 1.0, %v3518_v61 }
 0xa7d   : > { %v3539_v2 = vsel %vm3535_vm7, %v3533_v25, 0.0  ;;  %v3526_v3 = vmul.f32 %v3522_v0, %v3422_v63 }
 0xa7e   : > { %v3540_v6 = vadd.f32 %v3539_v2, %v3538_v4 }
 0xa7f   : > { %v3534_v5 = vmul.f32 %v3530_v21, %v3526_v3 }
 0xa81   : > { %v3541_v7 = vsel %vm3535_vm7, %v3534_v5, 0.0 }
 0xa82   : > { %v3542_v31 = vadd.f32 %v3541_v7, %v3540_v6 }
 0xa84   : > { %v3543_v8 = vrot.slane %v3542_v31, 4 }
 0xa86   : > { %v3544_v9 = vadd.f32 %v3543_v8, %v3542_v31 }
 0xa88   : > { %v3545_v10 = vrot.slane %v3544_v9, 2 }
 0xa8a   : > { %v3546_v12 = vadd.f32 %v3545_v10, %v3544_v9 }
 0xa8c   : > { %v3547_v15 = vrot.slane %v3546_v12, 1 }
 0xa8e   : > { %v3548_v17 = vadd.f32 %v3547_v15, %v3546_v12 }
 0xa90   : > { %v3550_v18 = vadd.f32 %v3549_v29, %v3548_v17 }
 0xa92   : > { %3552 = vst.msk [vmem:[%s303_s12] sm:$0x1] %vm3551_vm8, %v3550_v18 }
 0xa93 PF: > { %s20_s29 = sadd.s32 1, %s4618_s29  }
 0xa94   : > { %p17_p4 = scmp.ge.s32.totalorder %s20_s29, 4  }
 0xa96   :  { %19 = sbr.rel (!%p17_p4) target bundleno = 3 (0x3), region = 97 }

</bundles_post_ra>
